<compile_context>
chip_gen: v5e
topology: v5e:2x2
jax: 0.10.0
libtpu: 0.0.40
codegen_flags: <defaults>
</compile_context>

<pallas_src>
import jax
import jax.numpy as jnp
from jax.experimental import pallas as pl
from jax.experimental.pallas import tpu as pltpu

# ------------------------- config (small test sizes) -------------------------
B           = 2
Q_MAX       = 8
DIM_WORD    = 16
DIM_HIDDEN  = 32
DIM_VISION  = 32
MID         = 32            # mid_size; must equal DIM_HIDDEN (q = q + atten_h in ApplyAttention)
MID3        = MID * 3       # BiAttention hidden_aug = 3
GLIMPSES    = 6             # hardcoded in Net.__init__
NUM_OBJ     = 8
STATE       = NUM_OBJ       # state_size (must match num_obj for TimeReasoning)
DIM_EDGE    = 8
MAX_LEN     = 4             # entity sequence length (MAX_LEN-1 <= GLIMPSES)
T_STEPS     = MAX_LEN - 1
NUM_TOKEN   = 20            # len(vocab['question_token_to_idx'])
NUM_CLASSES = 10            # len(vocab['answer_token_to_idx'])
CLS_PAD     = 128           # lane-dense classifier output width (sliced back to NUM_CLASSES)

assert MID == DIM_HIDDEN, "ApplyAttention requires mid_size == dim_hidden (q = q + atten_h)"


# ========================= kernel 1: bidirectional GRU =========================
def _bigru_kernel(gx_ref, wzr_f_ref, wn_f_ref, wzr_b_ref, wn_b_ref, out_ref):
    """Fused bidirectional GRU recurrence; x-side gate projections are precomputed.

    gx_ref: (Q_MAX, B, 6H). Columns [0:2H)=fwd z|r, [2H:3H)=fwd n, [3H:5H)=bwd z|r, [5H:6H)=bwd n.
    Fully unrolled; the two independent direction chains sit in one basic block so the
    scheduler interleaves their MXU pushes with the other direction's EUP tanh/sigmoid.
    """
    H = DIM_HIDDEN
    f32 = jnp.float32
    hf = jnp.zeros((B, H), f32)
    hb = jnp.zeros((B, H), f32)
    hf_out = [None] * Q_MAX
    hb_out = [None] * Q_MAX
    for t in range(Q_MAX):
        # ---- forward direction, time step t ----
        gxt = gx_ref[t]                                                    # (B, 6H)
        pre_zr = gxt[:, :2 * H] + jnp.dot(hf, wzr_f_ref[...], preferred_element_type=f32)
        zr = 0.5 * jnp.tanh(0.5 * pre_zr) + 0.5                            # sigmoid via tanh (EUP)
        z, r = zr[:, :H], zr[:, H:]
        n = jnp.tanh(gxt[:, 2 * H:3 * H] +
                     jnp.dot(r * hf, wn_f_ref[...], preferred_element_type=f32))
        hf = (1.0 - z) * n + z * hf
        hf_out[t] = hf
        # ---- backward direction, time step Q_MAX-1-t ----
        tb = Q_MAX - 1 - t
        gxb = gx_ref[tb]
        pre_zrb = gxb[:, 3 * H:5 * H] + jnp.dot(hb, wzr_b_ref[...], preferred_element_type=f32)
        zrb = 0.5 * jnp.tanh(0.5 * pre_zrb) + 0.5
        zb, rb = zrb[:, :H], zrb[:, H:]
        nb = jnp.tanh(gxb[:, 5 * H:] +
                      jnp.dot(rb * hb, wn_b_ref[...], preferred_element_type=f32))
        hb = (1.0 - zb) * nb + zb * hb
        hb_out[tb] = hb
    out_ref[...] = jnp.stack([hf_out[t] + hb_out[t] for t in range(Q_MAX)], axis=0)


def bigru_encode(w_emb, p):
    """w_emb: (Q_MAX, B, DIM_WORD) -> h_fwd + h_bwd: (Q_MAX, B, DIM_HIDDEN)."""
    # x-side projections for every timestep and BOTH directions in one matmul.
    gx = (w_emb.reshape(Q_MAX * B, DIM_WORD) @ p['wx_all'] + p['bx_all'])
    gx = gx.reshape(Q_MAX, B, 6 * DIM_HIDDEN)
    return pl.pallas_call(
        _bigru_kernel,
        grid=(1,),
        in_specs=[
            pl.BlockSpec((Q_MAX, B, 6 * DIM_HIDDEN), lambda i: (0, 0, 0)),
            pl.BlockSpec((DIM_HIDDEN, 2 * DIM_HIDDEN), lambda i: (0, 0)),
            pl.BlockSpec((DIM_HIDDEN, DIM_HIDDEN), lambda i: (0, 0)),
            pl.BlockSpec((DIM_HIDDEN, 2 * DIM_HIDDEN), lambda i: (0, 0)),
            pl.BlockSpec((DIM_HIDDEN, DIM_HIDDEN), lambda i: (0, 0)),
        ],
        out_specs=pl.BlockSpec((Q_MAX, B, DIM_HIDDEN), lambda i: (0, 0, 0)),
        out_shape=jax.ShapeDtypeStruct((Q_MAX, B, DIM_HIDDEN), jnp.float32),
        compiler_params=pltpu.CompilerParams(dimension_semantics=("arbitrary",)),
    )(gx, p['whzr_f'], p['whn_f'], p['whzr_b'], p['whn_b'])


# ====== kernel 2: fused BiAttention + ApplyAttention + Classifier (whole batch) ======
def _attn_cls_kernel(v_ref, q_ref, vm_ref, hb_ref,
                     bvw_ref, bvb_ref, bqw_ref, bqb_ref, hwr_ref,
                     avw_ref, avb_ref, aqw_ref, aqb_ref, aaw_ref, aab_ref,
                     c1w_ref, c1b_ref, c2w_ref, c2b_ref,
                     ans_ref, lgr_ref):
    f32 = jnp.float32
    v2 = v_ref[...].reshape(B * NUM_OBJ, DIM_VISION)                 # batch folded into rows
    q0 = q_ref[...]                                                  # (B, MAX_LEN, DIM_HIDDEN)
    vm = vm_ref[...]                                                 # (B, NUM_OBJ), exact {0,1}/0

    # ---- BiAttention projections (one matmul each for the whole batch) ----
    vproj = jnp.maximum(jnp.dot(v2, bvw_ref[...], preferred_element_type=f32) + bvb_ref[...], 0.0)
    qproj = jnp.maximum(jnp.dot(q0.reshape(B * MAX_LEN, DIM_HIDDEN), bqw_ref[...],
                                preferred_element_type=f32) + bqb_ref[...], 0.0)
    vproj_b = vproj.reshape(B, NUM_OBJ, MID3)
    qproj_b = qproj.reshape(B, MAX_LEN, MID3)

    # ---- all 6 glimpse logits in ONE batched MXU push per batch row ----
    # logitsT[b, g*ML+l, o] = sum_c qproj[b,l,c] * hw[g,c] * vproj[b,o,c]
    # (equivalent to torch's (vproj ⊙ hw_g) @ qprojᵀ, bias added per glimpse below)
    qh = jnp.concatenate([qproj_b] * GLIMPSES, axis=1) * hwr_ref[...][None, :, :]
    logitsT = jnp.einsum('bkc,boc->bko', qh, vproj_b, preferred_element_type=f32)  # (B, G*ML, NO)

    # ---- ApplyAttention v-projections: all 6 glimpses in one matmul ----
    va = jnp.maximum(jnp.dot(v2, avw_ref[...], preferred_element_type=f32) + avb_ref[...], 0.0)

    # ---- per-glimpse joint softmax over (obj * len) + the q-independent attᵀ@v_proj term,
    #      hoisted off the serial q-update chain (atten never leaves VMEM) ----
    t_list = []
    lg_parts = []
    for g in range(GLIMPSES):
        lg_g = logitsT[:, g * MAX_LEN:(g + 1) * MAX_LEN, :] + hb_ref[g]    # (B, ML, NO), scalar bias
        if g < T_STEPS:
            # TimeReasoning only consumes logits[:, :T].sum(-1); reduce in-kernel.
            lg_parts.append(jnp.sum(lg_g, axis=1, keepdims=True))          # (B, 1, NO)
        # q_mask is all-ones in Net.forward, so the mask reduces to v_mask (exact 0/1 floats).
        masked = jnp.where(vm[:, None, :] == 0.0, -1e30, lg_g)
        m = jnp.max(jnp.max(masked, axis=2, keepdims=True), axis=1, keepdims=True)
        e = jnp.exp(masked - m)
        s = jnp.sum(jnp.sum(e, axis=2, keepdims=True), axis=1, keepdims=True)
        att = e * pl.reciprocal(s, approx=True)                            # joint softmax (torch view(-1,G,NO*ML))
        va_g = va[:, g * MID:(g + 1) * MID].reshape(B, NUM_OBJ, MID)
        t_list.append(jnp.einsum('blo,bom->blm', att, va_g,
                                 preferred_element_type=f32))              # (B, ML, MID)

    lgr_ref[...] = jnp.concatenate(lg_parts, axis=1)                       # (B, T, NO)

    # ---- sequential 6-glimpse q-update: only q-dependent matmuls left in the chain ----
    q_cur = q0
    for g in range(GLIMPSES):
        qp = jnp.maximum(
            jnp.dot(q_cur.reshape(B * MAX_LEN, DIM_HIDDEN), aqw_ref[g],
                    preferred_element_type=f32) + aqb_ref[g:g + 1, :], 0.0)
        qp = qp.reshape(B, MAX_LEN, MID)
        # h[b,m] = sum_{o,l} vp[b,o,m] * att[b,o,l] * qp[b,l,m]
        h = jnp.sum(t_list[g] * qp, axis=1)                                # (B, MID)
        ah = jnp.dot(h, aaw_ref[g], preferred_element_type=f32) + aab_ref[g:g + 1, :]
        q_cur = q_cur + ah[:, None, :]                                     # broadcast over que_len

    # ---- Classifier, lane-dense (padded to 128 lanes, sliced in JAX) ----
    q_sum = jnp.sum(q_cur, axis=1)                                         # (B, DIM_HIDDEN)
    x = jnp.maximum(jnp.dot(q_sum, c1w_ref[...], preferred_element_type=f32) + c1b_ref[...], 0.0)
    ans_ref[...] = jnp.dot(x, c2w_ref[...], preferred_element_type=f32) + c2b_ref[...]


def fused_attention_classifier(v, q_input, v_mask, bi, ap, cls):
    """Returns (answer (B, NUM_CLASSES), reduced raw logits (B, MAX_LEN-1, NUM_OBJ))."""
    # NOTE(v7x): at B=2 keep a single TC ("arbitrary"); mark the batch axis "parallel"
    # only if B is scaled up enough for cross-TC sharding to pay off.
    ans, lgr = pl.pallas_call(
        _attn_cls_kernel,
        grid=(1,),
        in_specs=[
            pl.BlockSpec((B, NUM_OBJ, DIM_VISION), lambda i: (0, 0, 0)),
            pl.BlockSpec((B, MAX_LEN, DIM_HIDDEN), lambda i: (0, 0, 0)),
            pl.BlockSpec((B, NUM_OBJ), lambda i: (0, 0)),
            pl.BlockSpec(memory_space=pltpu.MemorySpace.SMEM),             # h_bias scalars
            pl.BlockSpec((DIM_VISION, MID3), lambda i: (0, 0)),
            pl.BlockSpec((1, MID3), lambda i: (0, 0)),
            pl.BlockSpec((DIM_HIDDEN, MID3), lambda i: (0, 0)),
            pl.BlockSpec((1, MID3), lambda i: (0, 0)),
            pl.BlockSpec((GLIMPSES * MAX_LEN, MID3), lambda i: (0, 0)),
            pl.BlockSpec((DIM_VISION, GLIMPSES * MID), lambda i: (0, 0)),
            pl.BlockSpec((1, GLIMPSES * MID), lambda i: (0, 0)),
            pl.BlockSpec((GLIMPSES, DIM_HIDDEN, MID), lambda i: (0, 0, 0)),
            pl.BlockSpec((GLIMPSES, MID), lambda i: (0, 0)),
            pl.BlockSpec((GLIMPSES, MID, MID), lambda i: (0, 0, 0)),
            pl.BlockSpec((GLIMPSES, MID), lambda i: (0, 0)),
            pl.BlockSpec((DIM_HIDDEN, 2 * MID), lambda i: (0, 0)),
            pl.BlockSpec((1, 2 * MID), lambda i: (0, 0)),
            pl.BlockSpec((2 * MID, CLS_PAD), lambda i: (0, 0)),
            pl.BlockSpec((1, CLS_PAD), lambda i: (0, 0)),
        ],
        out_specs=[
            pl.BlockSpec((B, CLS_PAD), lambda i: (0, 0)),
            pl.BlockSpec((B, T_STEPS, NUM_OBJ), lambda i: (0, 0, 0)),
        ],
        out_shape=[
            jax.ShapeDtypeStruct((B, CLS_PAD), jnp.float32),
            jax.ShapeDtypeStruct((B, T_STEPS, NUM_OBJ), jnp.float32),
        ],
        compiler_params=pltpu.CompilerParams(dimension_semantics=("arbitrary",)),
    )(v, q_input, v_mask, bi['h_bias'],
      bi['v_w'], bi['v_b'], bi['q_w'], bi['q_b'], bi['hw_rep'],
      ap['vw'], ap['vb'], ap['qw'], ap['qb'], ap['aw'], ap['ab'],
      cls['c1_w'], cls['c1_b'], cls['c2_w_pad'], cls['c2_b_pad'])
    return ans[:, :NUM_CLASSES], lgr


# ============================== model components ==============================
def text_encoder(w_emb, e_s, e_e, params):
    # TODO(synk): modulars.BiGRUEncoder_2 is an external, undefined module; approximated with a
    # plain bidirectional GRU + gathers at entity start/end positions (q_len packing ignored).
    h = bigru_encode(w_emb, params['gru'])                       # (Q_MAX, B, DIM_HIDDEN)
    bidx = jnp.arange(B)[None, :]
    hidden_entity = h[e_e.T, bidx]                               # (MAX_LEN, B, DIM_HIDDEN)
    hidden_start = h[e_s.T, bidx]                                # (MAX_LEN, B, DIM_HIDDEN)
    hidden_trans = (hidden_start.reshape(-1, DIM_HIDDEN) @ params['w_trans']
                    + params['b_trans']).reshape(MAX_LEN, B, MID)
    return hidden_entity, hidden_trans


def bce_with_logits(x, y):
    return jnp.maximum(x, 0.0) - x * y + jnp.log1p(jnp.exp(-jnp.abs(x)))


def time_reasoning(hidden_trans, v, e_label, e_mask, edge, r_mask, lgr, v_mask, p):
    """TimeReasoning.forward, vectorized over the MAX_LEN-1 steps (plain JAX; tiny GEMMs fuse in XLA).

    `lgr` is the per-object raw logits already reduced over the question dim by the fused
    attention kernel (== logits_out[:, :T].sum(-1)).  The -100000.0 posterior mask constant
    matches the torch code exactly (it flows linearly into the transition prior), while pure
    softmax masks use -1e30 (NaN-safe stand-in for -inf).
    TODO(synk): modulars.GumbelCategorical sampling is stochastic; replaced with the
    deterministic zero-noise Gumbel-softmax relaxation (sample == softmax(logits)).
    """
    T = T_STEPS
    vmask3 = v_mask[:, None, :]                                          # (B, 1, NUM_OBJ)
    post_all = jnp.where(vmask3 == 0.0, -100000.0, lgr)                  # (B, T, NUM_OBJ)

    # ---- reconstruction branch (parallel over steps) ----
    act_all = jax.nn.softmax(jnp.where(vmask3 == 0.0, -1e30, post_all), axis=-1)
    h_act = jnp.einsum('bod,bto->btd', v, act_all)                       # (B, T, DIM_VISION)
    recons = h_act @ p['dec_w'] + p['dec_b']                             # Decoder(num_layers=0) ~ Linear
    recon = bce_with_logits(recons, e_label[:, :T]).mean(-1)             # (B, T)

    # ---- transition priors (TransCell); edge projection hoisted, steps batched ----
    tm = edge @ p['r_w'] + p['r_b']                                      # (B, NO, NO, 256), computed ONCE
    qh = hidden_trans[:T - 1] @ p['tq_w'] + p['tq_b']                    # (T-1, B, 256)
    rel = jnp.einsum('bijc,tbc->tbij', tm, qh * p['to_w'][:, 0]) + p['to_b'][0]   # (T-1, B, NO, NO)
    rel = jnp.where(r_mask[None] == 0.0, -1e30, rel)
    rel_mat = jax.nn.softmax(rel, axis=2)                                # torch softmax(dim=1)
    prior = jnp.einsum('tbij,btj->bti', rel_mat, post_all[:, :T - 1])    # prior for steps 1..T-1

    # ---- forward KL term (steps >= 1) ----
    z = jax.nn.softmax(post_all[:, 1:], axis=-1)
    l_fwd = jnp.sum(z * (jax.nn.log_softmax(post_all[:, 1:], axis=-1)
                         - jax.nn.log_softmax(prior, axis=-1)), axis=-1)  # (B, T-1)

    l_t = jnp.concatenate([recon[:, :1], recon[:, 1:] + l_fwd], axis=1)   # (B, T)
    return jnp.sum(l_t * e_mask[:, :T], axis=1).mean(0)


def net_forward(params, q_tokens, v, e_s, e_e, e_mask, e_label, edge, r_mask, q_mask_in, q_len):
    del q_mask_in, q_len  # q_mask is overwritten in the torch forward; q_len only affects packing
    q_t = q_tokens.T                                             # q.permute(1, 0) -> (Q_MAX, B)
    w_emb = params['embedding'][q_t]                             # (Q_MAX, B, DIM_WORD)
    hidden_entity, hidden_trans = text_encoder(w_emb, e_s, e_e, params)
    v_sum = v.sum(-1)
    v_mask = jnp.where(v_sum != 0.0, 1.0, v_sum)                 # masked_fill(v_sum != 0, 1) -> exact {0,1}/0
    q_input = jnp.transpose(hidden_entity, (1, 0, 2))            # (B, MAX_LEN, DIM_HIDDEN)
    answer, lgr = fused_attention_classifier(v, q_input, v_mask,
                                             params['biatt'], params['apply'], params['cls'])
    loss_time = time_reasoning(hidden_trans, v, e_label, e_mask, edge, r_mask, lgr, v_mask,
                               params['tr'])
    return answer, loss_time


# ============================== parameter init ================================
def _dense(key, d_in, d_out, scale=0.1):
    kw, kb = jax.random.split(key)
    return (scale * jax.random.normal(kw, (d_in, d_out), jnp.float32),
            scale * jax.random.normal(kb, (d_out,), jnp.float32))


def init_params(key):
    keys = iter(jax.random.split(key, 64))
    p = {}
    p['embedding'] = 0.1 * jax.random.normal(next(keys), (NUM_TOKEN, DIM_WORD), jnp.float32)

    def gru_dir(k):
        k1, k2, k3 = jax.random.split(k, 3)
        d = DIM_WORD + DIM_HIDDEN
        wz = 0.1 * jax.random.normal(k1, (d, DIM_HIDDEN), jnp.float32)
        wr = 0.1 * jax.random.normal(k2, (d, DIM_HIDDEN), jnp.float32)
        wn = 0.1 * jax.random.normal(k3, (d, DIM_HIDDEN), jnp.float32)
        wx = jnp.concatenate([wz[:DIM_WORD], wr[:DIM_WORD], wn[:DIM_WORD]], axis=1)   # (DW, 3H)
        bx = jnp.zeros((3 * DIM_HIDDEN,), jnp.float32)
        whzr = jnp.concatenate([wz[DIM_WORD:], wr[DIM_WORD:]], axis=1)                # (H, 2H)
        whn = wn[DIM_WORD:]                                                           # (H, H)
        return wx, bx, whzr, whn

    wx_f, bx_f, whzr_f, whn_f = gru_dir(next(keys))
    wx_b, bx_b, whzr_b, whn_b = gru_dir(next(keys))
    p['gru'] = {
        'wx_all': jnp.concatenate([wx_f, wx_b], axis=1),          # (DW, 6H): both directions, one matmul
        'bx_all': jnp.concatenate([bx_f, bx_b], axis=0),          # (6H,)
        'whzr_f': whzr_f, 'whn_f': whn_f, 'whzr_b': whzr_b, 'whn_b': whn_b,
    }
    p['w_trans'], p['b_trans'] = _dense(next(keys), DIM_HIDDEN, MID)

    bi = {}
    v_w, v_b = _dense(next(keys), DIM_VISION, MID3)
    q_w, q_b = _dense(next(keys), DIM_HIDDEN, MID3)
    h_weight = jax.random.normal(next(keys), (GLIMPSES, MID3), jnp.float32)  # weight_norm == identity at init
    bi['v_w'], bi['v_b'] = v_w, v_b.reshape(1, MID3)
    bi['q_w'], bi['q_b'] = q_w, q_b.reshape(1, MID3)
    bi['hw_rep'] = jnp.repeat(h_weight, MAX_LEN, axis=0)                     # (G*MAX_LEN, MID3)
    bi['h_bias'] = jax.random.normal(next(keys), (GLIMPSES,), jnp.float32)   # SMEM scalars
    p['biatt'] = bi

    # ApplyAttention: per-glimpse weights stacked/concatenated so the fused kernel can
    # batch the 6 independent v-projections and keep everything resident in VMEM.
    vws, vbs, qws, qbs, aws, abs_ = [], [], [], [], [], []
    for _ in range(GLIMPSES):
        vw, vb = _dense(next(keys), DIM_VISION, MID); vws.append(vw); vbs.append(vb)
        qw, qb = _dense(next(keys), DIM_HIDDEN, MID); qws.append(qw); qbs.append(qb)
        aw, ab = _dense(next(keys), MID, MID);        aws.append(aw); abs_.append(ab)
    p['apply'] = {
        'vw': jnp.concatenate(vws, axis=1),                              # (DIM_VISION, G*MID)
        'vb': jnp.concatenate(vbs, axis=0).reshape(1, GLIMPSES * MID),   # (1, G*MID)
        'qw': jnp.stack(qws), 'qb': jnp.stack(qbs),                      # (G, DIM_HIDDEN, MID), (G, MID)
        'aw': jnp.stack(aws), 'ab': jnp.stack(abs_),                     # (G, MID, MID), (G, MID)
    }

    cls = {}
    c1_w, c1_b = _dense(next(keys), DIM_HIDDEN, 2 * MID)
    c2_w, c2_b = _dense(next(keys), 2 * MID, NUM_CLASSES)
    cls['c1_w'], cls['c1_b'] = c1_w, c1_b.reshape(1, 2 * MID)
    # lane-dense padded output projection; padded columns are zero and sliced off in JAX
    cls['c2_w_pad'] = jnp.zeros((2 * MID, CLS_PAD), jnp.float32).at[:, :NUM_CLASSES].set(c2_w)
    cls['c2_b_pad'] = jnp.zeros((1, CLS_PAD), jnp.float32).at[0, :NUM_CLASSES].set(c2_b)
    p['cls'] = cls

    tr = {}
    tr['r_w'], tr['r_b'] = _dense(next(keys), DIM_EDGE, 256)
    tr['tq_w'], tr['tq_b'] = _dense(next(keys), MID, 256)
    tr['to_w'], tr['to_b'] = _dense(next(keys), 256, 1)
    tr['dec_w'], tr['dec_b'] = _dense(next(keys), DIM_VISION, NUM_TOKEN)
    p['tr'] = tr
    return p


# ==================================== main ====================================
if __name__ == "__main__":
    key = jax.random.PRNGKey(0)
    ks = jax.random.split(key, 12)
    params = init_params(ks[0])

    q_tokens = jax.random.randint(ks[1], (B, Q_MAX), 0, NUM_TOKEN, dtype=jnp.int32)
    v = jax.random.normal(ks[2], (B, NUM_OBJ, DIM_VISION), jnp.float32)
    v = v.at[1, -1].set(0.0)                                  # an empty object slot -> v_mask == 0 there
    e_s = jax.random.randint(ks[3], (B, MAX_LEN), 0, Q_MAX, dtype=jnp.int32)
    e_e = jax.random.randint(ks[4], (B, MAX_LEN), 0, Q_MAX, dtype=jnp.int32)
    e_mask = jnp.ones((B, MAX_LEN), jnp.float32).at[1, -1].set(0.0)
    e_label = jax.random.uniform(ks[5], (B, MAX_LEN, NUM_TOKEN), jnp.float32)
    edge = jax.random.normal(ks[6], (B, NUM_OBJ, NUM_OBJ, DIM_EDGE), jnp.float32)
    r_mask = jnp.ones((B, NUM_OBJ, NUM_OBJ), jnp.float32)
    q_mask_in = jnp.ones((B, Q_MAX), jnp.float32)
    q_len = jnp.full((B,), Q_MAX, jnp.int32)

    answer, loss_time = jax.jit(net_forward)(params, q_tokens, v, e_s, e_e, e_mask,
                                             e_label, edge, r_mask, q_mask_in, q_len)
    jax.block_until_ready((answer, loss_time))

    assert answer.shape == (B, NUM_CLASSES)
    assert bool(jnp.isfinite(answer).all()) and bool(jnp.isfinite(loss_time))
    print("KERNEL_OK")
</pallas_src>

<mosaic_0001>
module attributes {stable_mosaic.version = 11 : i64} {
  func.func @_bigru_kernel(%arg0: i32, %arg1: memref<8x2x192xf32, #tpu.memory_space<vmem>>, %arg2: memref<32x64xf32, #tpu.memory_space<vmem>>, %arg3: memref<32x32xf32, #tpu.memory_space<vmem>>, %arg4: memref<32x64xf32, #tpu.memory_space<vmem>>, %arg5: memref<32x32xf32, #tpu.memory_space<vmem>>, %arg6: memref<8x2x32xf32, #tpu.memory_space<vmem>>) attributes {dimension_semantics = [#tpu.dimension_semantics<arbitrary>], iteration_bounds = array<i64: 1>, scalar_prefetch = 0 : i64, scratch_operands = 0 : i64, tpu.core_type = #tpu.core_type<tc>, window_params = [{pipeline_mode = #tpu.pipeline_mode<synchronous>, transform_indices = @transform_0, window_bounds = array<i64: 8, 2, 192>}, {pipeline_mode = #tpu.pipeline_mode<synchronous>, transform_indices = @transform_1, window_bounds = array<i64: 32, 64>}, {pipeline_mode = #tpu.pipeline_mode<synchronous>, transform_indices = @transform_2, window_bounds = array<i64: 32, 32>}, {pipeline_mode = #tpu.pipeline_mode<synchronous>, transform_indices = @transform_3, window_bounds = array<i64: 32, 64>}, {pipeline_mode = #tpu.pipeline_mode<synchronous>, transform_indices = @transform_4, window_bounds = array<i64: 32, 32>}, {pipeline_mode = #tpu.pipeline_mode<synchronous>, transform_indices = @transform_5, window_bounds = array<i64: 8, 2, 32>}]} {
    %cst = arith.constant 0.000000e+00 : f32
    %0 = vector.broadcast %cst : f32 to vector<2x32xf32>
    %cst_0 = arith.constant 0.000000e+00 : f32
    %1 = vector.broadcast %cst_0 : f32 to vector<2x32xf32>
    %c0 = arith.constant 0 : index
    %c0_1 = arith.constant 0 : index
    %c0_2 = arith.constant 0 : index
    %2 = vector.load %arg1[%c0, %c0_1, %c0_2] : memref<8x2x192xf32, #tpu.memory_space<vmem>>, vector<1x2x192xf32>
    %3 = vector.shape_cast %2 : vector<1x2x192xf32> to vector<2x192xf32>
    %4 = vector.extract_strided_slice %3 {offsets = [0, 0], sizes = [2, 64], strides = [1, 1]} : vector<2x192xf32> to vector<2x64xf32>
    %c0_3 = arith.constant 0 : index
    %c0_4 = arith.constant 0 : index
    %5 = vector.load %arg2[%c0_3, %c0_4] : memref<32x64xf32, #tpu.memory_space<vmem>>, vector<32x64xf32>
    %cst_5 = arith.constant dense<0.000000e+00> : vector<2x64xf32>
    %6 = tpu.matmul %0, %5, %cst_5 {dimension_numbers = #tpu.dot_dimension_numbers<[1], [0], [0], [1], [0, 0, 1, 1], [], []>} : vector<2x32xf32>, vector<32x64xf32>, vector<2x64xf32> -> vector<2x64xf32>
    %7 = arith.addf %4, %6 : vector<2x64xf32>
    %cst_6 = arith.constant 5.000000e-01 : f32
    %8 = vector.broadcast %cst_6 : f32 to vector<2x64xf32>
    %9 = arith.mulf %8, %7 : vector<2x64xf32>
    %10 = math.tanh %9 : vector<2x64xf32>
    %cst_7 = arith.constant 5.000000e-01 : f32
    %11 = vector.broadcast %cst_7 : f32 to vector<2x64xf32>
    %12 = arith.mulf %11, %10 : vector<2x64xf32>
    %cst_8 = arith.constant 5.000000e-01 : f32
    %13 = vector.broadcast %cst_8 : f32 to vector<2x64xf32>
    %14 = arith.addf %12, %13 : vector<2x64xf32>
    %15 = vector.extract_strided_slice %14 {offsets = [0, 0], sizes = [2, 32], strides = [1, 1]} : vector<2x64xf32> to vector<2x32xf32>
    %16 = vector.extract_strided_slice %14 {offsets = [0, 32], sizes = [2, 32], strides = [1, 1]} : vector<2x64xf32> to vector<2x32xf32>
    %17 = vector.extract_strided_slice %3 {offsets = [0, 64], sizes = [2, 32], strides = [1, 1]} : vector<2x192xf32> to vector<2x32xf32>
    %18 = arith.mulf %16, %0 : vector<2x32xf32>
    %c0_9 = arith.constant 0 : index
    %c0_10 = arith.constant 0 : index
    %19 = vector.load %arg3[%c0_9, %c0_10] : memref<32x32xf32, #tpu.memory_space<vmem>>, vector<32x32xf32>
    %cst_11 = arith.constant dense<0.000000e+00> : vector<2x32xf32>
    %20 = tpu.matmul %18, %19, %cst_11 {dimension_numbers = #tpu.dot_dimension_numbers<[1], [0], [0], [1], [0, 0, 1, 1], [], []>} : vector<2x32xf32>, vector<32x32xf32>, vector<2x32xf32> -> vector<2x32xf32>
    %21 = arith.addf %17, %20 : vector<2x32xf32>
    %22 = math.tanh %21 : vector<2x32xf32>
    %cst_12 = arith.constant 1.000000e+00 : f32
    %23 = vector.broadcast %cst_12 : f32 to vector<2x32xf32>
    %24 = arith.subf %23, %15 : vector<2x32xf32>
    %25 = arith.mulf %24, %22 : vector<2x32xf32>
    %26 = arith.mulf %15, %0 : vector<2x32xf32>
    %27 = arith.addf %25, %26 : vector<2x32xf32>
    %c7 = arith.constant 7 : index
    %c0_13 = arith.constant 0 : index
    %c0_14 = arith.constant 0 : index
    %28 = vector.load %arg1[%c7, %c0_13, %c0_14] : memref<8x2x192xf32, #tpu.memory_space<vmem>>, vector<1x2x192xf32>
    %29 = vector.shape_cast %28 : vector<1x2x192xf32> to vector<2x192xf32>
    %30 = vector.extract_strided_slice %29 {offsets = [0, 96], sizes = [2, 64], strides = [1, 1]} : vector<2x192xf32> to vector<2x64xf32>
    %c0_15 = arith.constant 0 : index
    %c0_16 = arith.constant 0 : index
    %31 = vector.load %arg4[%c0_15, %c0_16] : memref<32x64xf32, #tpu.memory_space<vmem>>, vector<32x64xf32>
    %cst_17 = arith.constant dense<0.000000e+00> : vector<2x64xf32>
    %32 = tpu.matmul %1, %31, %cst_17 {dimension_numbers = #tpu.dot_dimension_numbers<[1], [0], [0], [1], [0, 0, 1, 1], [], []>} : vector<2x32xf32>, vector<32x64xf32>, vector<2x64xf32> -> vector<2x64xf32>
    %33 = arith.addf %30, %32 : vector<2x64xf32>
    %cst_18 = arith.constant 5.000000e-01 : f32
    %34 = vector.broadcast %cst_18 : f32 to vector<2x64xf32>
    %35 = arith.mulf %34, %33 : vector<2x64xf32>
    %36 = math.tanh %35 : vector<2x64xf32>
    %cst_19 = arith.constant 5.000000e-01 : f32
    %37 = vector.broadcast %cst_19 : f32 to vector<2x64xf32>
    %38 = arith.mulf %37, %36 : vector<2x64xf32>
    %cst_20 = arith.constant 5.000000e-01 : f32
    %39 = vector.broadcast %cst_20 : f32 to vector<2x64xf32>
    %40 = arith.addf %38, %39 : vector<2x64xf32>
    %41 = vector.extract_strided_slice %40 {offsets = [0, 0], sizes = [2, 32], strides = [1, 1]} : vector<2x64xf32> to vector<2x32xf32>
    %42 = vector.extract_strided_slice %40 {offsets = [0, 32], sizes = [2, 32], strides = [1, 1]} : vector<2x64xf32> to vector<2x32xf32>
    %43 = vector.extract_strided_slice %29 {offsets = [0, 160], sizes = [2, 32], strides = [1, 1]} : vector<2x192xf32> to vector<2x32xf32>
    %44 = arith.mulf %42, %1 : vector<2x32xf32>
    %c0_21 = arith.constant 0 : index
    %c0_22 = arith.constant 0 : index
    %45 = vector.load %arg5[%c0_21, %c0_22] : memref<32x32xf32, #tpu.memory_space<vmem>>, vector<32x32xf32>
    %cst_23 = arith.constant dense<0.000000e+00> : vector<2x32xf32>
    %46 = tpu.matmul %44, %45, %cst_23 {dimension_numbers = #tpu.dot_dimension_numbers<[1], [0], [0], [1], [0, 0, 1, 1], [], []>} : vector<2x32xf32>, vector<32x32xf32>, vector<2x32xf32> -> vector<2x32xf32>
    %47 = arith.addf %43, %46 : vector<2x32xf32>
    %48 = math.tanh %47 : vector<2x32xf32>
    %cst_24 = arith.constant 1.000000e+00 : f32
    %49 = vector.broadcast %cst_24 : f32 to vector<2x32xf32>
    %50 = arith.subf %49, %41 : vector<2x32xf32>
    %51 = arith.mulf %50, %48 : vector<2x32xf32>
    %52 = arith.mulf %41, %1 : vector<2x32xf32>
    %53 = arith.addf %51, %52 : vector<2x32xf32>
    %c1 = arith.constant 1 : index
    %c0_25 = arith.constant 0 : index
    %c0_26 = arith.constant 0 : index
    %54 = vector.load %arg1[%c1, %c0_25, %c0_26] : memref<8x2x192xf32, #tpu.memory_space<vmem>>, vector<1x2x192xf32>
    %55 = vector.shape_cast %54 : vector<1x2x192xf32> to vector<2x192xf32>
    %56 = vector.extract_strided_slice %55 {offsets = [0, 0], sizes = [2, 64], strides = [1, 1]} : vector<2x192xf32> to vector<2x64xf32>
    %c0_27 = arith.constant 0 : index
    %c0_28 = arith.constant 0 : index
    %57 = vector.load %arg2[%c0_27, %c0_28] : memref<32x64xf32, #tpu.memory_space<vmem>>, vector<32x64xf32>
    %cst_29 = arith.constant dense<0.000000e+00> : vector<2x64xf32>
    %58 = tpu.matmul %27, %57, %cst_29 {dimension_numbers = #tpu.dot_dimension_numbers<[1], [0], [0], [1], [0, 0, 1, 1], [], []>} : vector<2x32xf32>, vector<32x64xf32>, vector<2x64xf32> -> vector<2x64xf32>
    %59 = arith.addf %56, %58 : vector<2x64xf32>
    %cst_30 = arith.constant 5.000000e-01 : f32
    %60 = vector.broadcast %cst_30 : f32 to vector<2x64xf32>
    %61 = arith.mulf %60, %59 : vector<2x64xf32>
    %62 = math.tanh %61 : vector<2x64xf32>
    %cst_31 = arith.constant 5.000000e-01 : f32
    %63 = vector.broadcast %cst_31 : f32 to vector<2x64xf32>
    %64 = arith.mulf %63, %62 : vector<2x64xf32>
    %cst_32 = arith.constant 5.000000e-01 : f32
    %65 = vector.broadcast %cst_32 : f32 to vector<2x64xf32>
    %66 = arith.addf %64, %65 : vector<2x64xf32>
    %67 = vector.extract_strided_slice %66 {offsets = [0, 0], sizes = [2, 32], strides = [1, 1]} : vector<2x64xf32> to vector<2x32xf32>
    %68 = vector.extract_strided_slice %66 {offsets = [0, 32], sizes = [2, 32], strides = [1, 1]} : vector<2x64xf32> to vector<2x32xf32>
    %69 = vector.extract_strided_slice %55 {offsets = [0, 64], sizes = [2, 32], strides = [1, 1]} : vector<2x192xf32> to vector<2x32xf32>
    %70 = arith.mulf %68, %27 : vector<2x32xf32>
    %c0_33 = arith.constant 0 : index
    %c0_34 = arith.constant 0 : index
    %71 = vector.load %arg3[%c0_33, %c0_34] : memref<32x32xf32, #tpu.memory_space<vmem>>, vector<32x32xf32>
    %cst_35 = arith.constant dense<0.000000e+00> : vector<2x32xf32>
    %72 = tpu.matmul %70, %71, %cst_35 {dimension_numbers = #tpu.dot_dimension_numbers<[1], [0], [0], [1], [0, 0, 1, 1], [], []>} : vector<2x32xf32>, vector<32x32xf32>, vector<2x32xf32> -> vector<2x32xf32>
    %73 = arith.addf %69, %72 : vector<2x32xf32>
    %74 = math.tanh %73 : vector<2x32xf32>
    %cst_36 = arith.constant 1.000000e+00 : f32
    %75 = vector.broadcast %cst_36 : f32 to vector<2x32xf32>
    %76 = arith.subf %75, %67 : vector<2x32xf32>
    %77 = arith.mulf %76, %74 : vector<2x32xf32>
    %78 = arith.mulf %67, %27 : vector<2x32xf32>
    %79 = arith.addf %77, %78 : vector<2x32xf32>
    %c6 = arith.constant 6 : index
    %c0_37 = arith.constant 0 : index
    %c0_38 = arith.constant 0 : index
    %80 = vector.load %arg1[%c6, %c0_37, %c0_38] : memref<8x2x192xf32, #tpu.memory_space<vmem>>, vector<1x2x192xf32>
    %81 = vector.shape_cast %80 : vector<1x2x192xf32> to vector<2x192xf32>
    %82 = vector.extract_strided_slice %81 {offsets = [0, 96], sizes = [2, 64], strides = [1, 1]} : vector<2x192xf32> to vector<2x64xf32>
    %c0_39 = arith.constant 0 : index
    %c0_40 = arith.constant 0 : index
    %83 = vector.load %arg4[%c0_39, %c0_40] : memref<32x64xf32, #tpu.memory_space<vmem>>, vector<32x64xf32>
    %cst_41 = arith.constant dense<0.000000e+00> : vector<2x64xf32>
    %84 = tpu.matmul %53, %83, %cst_41 {dimension_numbers = #tpu.dot_dimension_numbers<[1], [0], [0], [1], [0, 0, 1, 1], [], []>} : vector<2x32xf32>, vector<32x64xf32>, vector<2x64xf32> -> vector<2x64xf32>
    %85 = arith.addf %82, %84 : vector<2x64xf32>
    %cst_42 = arith.constant 5.000000e-01 : f32
    %86 = vector.broadcast %cst_42 : f32 to vector<2x64xf32>
    %87 = arith.mulf %86, %85 : vector<2x64xf32>
    %88 = math.tanh %87 : vector<2x64xf32>
    %cst_43 = arith.constant 5.000000e-01 : f32
    %89 = vector.broadcast %cst_43 : f32 to vector<2x64xf32>
    %90 = arith.mulf %89, %88 : vector<2x64xf32>
    %cst_44 = arith.constant 5.000000e-01 : f32
    %91 = vector.broadcast %cst_44 : f32 to vector<2x64xf32>
    %92 = arith.addf %90, %91 : vector<2x64xf32>
    %93 = vector.extract_strided_slice %92 {offsets = [0, 0], sizes = [2, 32], strides = [1, 1]} : vector<2x64xf32> to vector<2x32xf32>
    %94 = vector.extract_strided_slice %92 {offsets = [0, 32], sizes = [2, 32], strides = [1, 1]} : vector<2x64xf32> to vector<2x32xf32>
    %95 = vector.extract_strided_slice %81 {offsets = [0, 160], sizes = [2, 32], strides = [1, 1]} : vector<2x192xf32> to vector<2x32xf32>
    %96 = arith.mulf %94, %53 : vector<2x32xf32>
    %c0_45 = arith.constant 0 : index
    %c0_46 = arith.constant 0 : index
    %97 = vector.load %arg5[%c0_45, %c0_46] : memref<32x32xf32, #tpu.memory_space<vmem>>, vector<32x32xf32>
    %cst_47 = arith.constant dense<0.000000e+00> : vector<2x32xf32>
    %98 = tpu.matmul %96, %97, %cst_47 {dimension_numbers = #tpu.dot_dimension_numbers<[1], [0], [0], [1], [0, 0, 1, 1], [], []>} : vector<2x32xf32>, vector<32x32xf32>, vector<2x32xf32> -> vector<2x32xf32>
    %99 = arith.addf %95, %98 : vector<2x32xf32>
    %100 = math.tanh %99 : vector<2x32xf32>
    %cst_48 = arith.constant 1.000000e+00 : f32
    %101 = vector.broadcast %cst_48 : f32 to vector<2x32xf32>
    %102 = arith.subf %101, %93 : vector<2x32xf32>
    %103 = arith.mulf %102, %100 : vector<2x32xf32>
    %104 = arith.mulf %93, %53 : vector<2x32xf32>
    %105 = arith.addf %103, %104 : vector<2x32xf32>
    %c2 = arith.constant 2 : index
    %c0_49 = arith.constant 0 : index
    %c0_50 = arith.constant 0 : index
    %106 = vector.load %arg1[%c2, %c0_49, %c0_50] : memref<8x2x192xf32, #tpu.memory_space<vmem>>, vector<1x2x192xf32>
    %107 = vector.shape_cast %106 : vector<1x2x192xf32> to vector<2x192xf32>
    %108 = vector.extract_strided_slice %107 {offsets = [0, 0], sizes = [2, 64], strides = [1, 1]} : vector<2x192xf32> to vector<2x64xf32>
    %c0_51 = arith.constant 0 : index
    %c0_52 = arith.constant 0 : index
    %109 = vector.load %arg2[%c0_51, %c0_52] : memref<32x64xf32, #tpu.memory_space<vmem>>, vector<32x64xf32>
    %cst_53 = arith.constant dense<0.000000e+00> : vector<2x64xf32>
    %110 = tpu.matmul %79, %109, %cst_53 {dimension_numbers = #tpu.dot_dimension_numbers<[1], [0], [0], [1], [0, 0, 1, 1], [], []>} : vector<2x32xf32>, vector<32x64xf32>, vector<2x64xf32> -> vector<2x64xf32>
    %111 = arith.addf %108, %110 : vector<2x64xf32>
    %cst_54 = arith.constant 5.000000e-01 : f32
    %112 = vector.broadcast %cst_54 : f32 to vector<2x64xf32>
    %113 = arith.mulf %112, %111 : vector<2x64xf32>
    %114 = math.tanh %113 : vector<2x64xf32>
    %cst_55 = arith.constant 5.000000e-01 : f32
    %115 = vector.broadcast %cst_55 : f32 to vector<2x64xf32>
    %116 = arith.mulf %115, %114 : vector<2x64xf32>
    %cst_56 = arith.constant 5.000000e-01 : f32
    %117 = vector.broadcast %cst_56 : f32 to vector<2x64xf32>
    %118 = arith.addf %116, %117 : vector<2x64xf32>
    %119 = vector.extract_strided_slice %118 {offsets = [0, 0], sizes = [2, 32], strides = [1, 1]} : vector<2x64xf32> to vector<2x32xf32>
    %120 = vector.extract_strided_slice %118 {offsets = [0, 32], sizes = [2, 32], strides = [1, 1]} : vector<2x64xf32> to vector<2x32xf32>
    %121 = vector.extract_strided_slice %107 {offsets = [0, 64], sizes = [2, 32], strides = [1, 1]} : vector<2x192xf32> to vector<2x32xf32>
    %122 = arith.mulf %120, %79 : vector<2x32xf32>
    %c0_57 = arith.constant 0 : index
    %c0_58 = arith.constant 0 : index
    %123 = vector.load %arg3[%c0_57, %c0_58] : memref<32x32xf32, #tpu.memory_space<vmem>>, vector<32x32xf32>
    %cst_59 = arith.constant dense<0.000000e+00> : vector<2x32xf32>
    %124 = tpu.matmul %122, %123, %cst_59 {dimension_numbers = #tpu.dot_dimension_numbers<[1], [0], [0], [1], [0, 0, 1, 1], [], []>} : vector<2x32xf32>, vector<32x32xf32>, vector<2x32xf32> -> vector<2x32xf32>
    %125 = arith.addf %121, %124 : vector<2x32xf32>
    %126 = math.tanh %125 : vector<2x32xf32>
    %cst_60 = arith.constant 1.000000e+00 : f32
    %127 = vector.broadcast %cst_60 : f32 to vector<2x32xf32>
    %128 = arith.subf %127, %119 : vector<2x32xf32>
    %129 = arith.mulf %128, %126 : vector<2x32xf32>
    %130 = arith.mulf %119, %79 : vector<2x32xf32>
    %131 = arith.addf %129, %130 : vector<2x32xf32>
    %c5 = arith.constant 5 : index
    %c0_61 = arith.constant 0 : index
    %c0_62 = arith.constant 0 : index
    %132 = vector.load %arg1[%c5, %c0_61, %c0_62] : memref<8x2x192xf32, #tpu.memory_space<vmem>>, vector<1x2x192xf32>
    %133 = vector.shape_cast %132 : vector<1x2x192xf32> to vector<2x192xf32>
    %134 = vector.extract_strided_slice %133 {offsets = [0, 96], sizes = [2, 64], strides = [1, 1]} : vector<2x192xf32> to vector<2x64xf32>
    %c0_63 = arith.constant 0 : index
    %c0_64 = arith.constant 0 : index
    %135 = vector.load %arg4[%c0_63, %c0_64] : memref<32x64xf32, #tpu.memory_space<vmem>>, vector<32x64xf32>
    %cst_65 = arith.constant dense<0.000000e+00> : vector<2x64xf32>
    %136 = tpu.matmul %105, %135, %cst_65 {dimension_numbers = #tpu.dot_dimension_numbers<[1], [0], [0], [1], [0, 0, 1, 1], [], []>} : vector<2x32xf32>, vector<32x64xf32>, vector<2x64xf32> -> vector<2x64xf32>
    %137 = arith.addf %134, %136 : vector<2x64xf32>
    %cst_66 = arith.constant 5.000000e-01 : f32
    %138 = vector.broadcast %cst_66 : f32 to vector<2x64xf32>
    %139 = arith.mulf %138, %137 : vector<2x64xf32>
    %140 = math.tanh %139 : vector<2x64xf32>
    %cst_67 = arith.constant 5.000000e-01 : f32
    %141 = vector.broadcast %cst_67 : f32 to vector<2x64xf32>
    %142 = arith.mulf %141, %140 : vector<2x64xf32>
    %cst_68 = arith.constant 5.000000e-01 : f32
    %143 = vector.broadcast %cst_68 : f32 to vector<2x64xf32>
    %144 = arith.addf %142, %143 : vector<2x64xf32>
    %145 = vector.extract_strided_slice %144 {offsets = [0, 0], sizes = [2, 32], strides = [1, 1]} : vector<2x64xf32> to vector<2x32xf32>
    %146 = vector.extract_strided_slice %144 {offsets = [0, 32], sizes = [2, 32], strides = [1, 1]} : vector<2x64xf32> to vector<2x32xf32>
    %147 = vector.extract_strided_slice %133 {offsets = [0, 160], sizes = [2, 32], strides = [1, 1]} : vector<2x192xf32> to vector<2x32xf32>
    %148 = arith.mulf %146, %105 : vector<2x32xf32>
    %c0_69 = arith.constant 0 : index
    %c0_70 = arith.constant 0 : index
    %149 = vector.load %arg5[%c0_69, %c0_70] : memref<32x32xf32, #tpu.memory_space<vmem>>, vector<32x32xf32>
    %cst_71 = arith.constant dense<0.000000e+00> : vector<2x32xf32>
    %150 = tpu.matmul %148, %149, %cst_71 {dimension_numbers = #tpu.dot_dimension_numbers<[1], [0], [0], [1], [0, 0, 1, 1], [], []>} : vector<2x32xf32>, vector<32x32xf32>, vector<2x32xf32> -> vector<2x32xf32>
    %151 = arith.addf %147, %150 : vector<2x32xf32>
    %152 = math.tanh %151 : vector<2x32xf32>
    %cst_72 = arith.constant 1.000000e+00 : f32
    %153 = vector.broadcast %cst_72 : f32 to vector<2x32xf32>
    %154 = arith.subf %153, %145 : vector<2x32xf32>
    %155 = arith.mulf %154, %152 : vector<2x32xf32>
    %156 = arith.mulf %145, %105 : vector<2x32xf32>
    %157 = arith.addf %155, %156 : vector<2x32xf32>
    %c3 = arith.constant 3 : index
    %c0_73 = arith.constant 0 : index
    %c0_74 = arith.constant 0 : index
    %158 = vector.load %arg1[%c3, %c0_73, %c0_74] : memref<8x2x192xf32, #tpu.memory_space<vmem>>, vector<1x2x192xf32>
    %159 = vector.shape_cast %158 : vector<1x2x192xf32> to vector<2x192xf32>
    %160 = vector.extract_strided_slice %159 {offsets = [0, 0], sizes = [2, 64], strides = [1, 1]} : vector<2x192xf32> to vector<2x64xf32>
    %c0_75 = arith.constant 0 : index
    %c0_76 = arith.constant 0 : index
    %161 = vector.load %arg2[%c0_75, %c0_76] : memref<32x64xf32, #tpu.memory_space<vmem>>, vector<32x64xf32>
    %cst_77 = arith.constant dense<0.000000e+00> : vector<2x64xf32>
    %162 = tpu.matmul %131, %161, %cst_77 {dimension_numbers = #tpu.dot_dimension_numbers<[1], [0], [0], [1], [0, 0, 1, 1], [], []>} : vector<2x32xf32>, vector<32x64xf32>, vector<2x64xf32> -> vector<2x64xf32>
    %163 = arith.addf %160, %162 : vector<2x64xf32>
    %cst_78 = arith.constant 5.000000e-01 : f32
    %164 = vector.broadcast %cst_78 : f32 to vector<2x64xf32>
    %165 = arith.mulf %164, %163 : vector<2x64xf32>
    %166 = math.tanh %165 : vector<2x64xf32>
    %cst_79 = arith.constant 5.000000e-01 : f32
    %167 = vector.broadcast %cst_79 : f32 to vector<2x64xf32>
    %168 = arith.mulf %167, %166 : vector<2x64xf32>
    %cst_80 = arith.constant 5.000000e-01 : f32
    %169 = vector.broadcast %cst_80 : f32 to vector<2x64xf32>
    %170 = arith.addf %168, %169 : vector<2x64xf32>
    %171 = vector.extract_strided_slice %170 {offsets = [0, 0], sizes = [2, 32], strides = [1, 1]} : vector<2x64xf32> to vector<2x32xf32>
    %172 = vector.extract_strided_slice %170 {offsets = [0, 32], sizes = [2, 32], strides = [1, 1]} : vector<2x64xf32> to vector<2x32xf32>
    %173 = vector.extract_strided_slice %159 {offsets = [0, 64], sizes = [2, 32], strides = [1, 1]} : vector<2x192xf32> to vector<2x32xf32>
    %174 = arith.mulf %172, %131 : vector<2x32xf32>
    %c0_81 = arith.constant 0 : index
    %c0_82 = arith.constant 0 : index
    %175 = vector.load %arg3[%c0_81, %c0_82] : memref<32x32xf32, #tpu.memory_space<vmem>>, vector<32x32xf32>
    %cst_83 = arith.constant dense<0.000000e+00> : vector<2x32xf32>
    %176 = tpu.matmul %174, %175, %cst_83 {dimension_numbers = #tpu.dot_dimension_numbers<[1], [0], [0], [1], [0, 0, 1, 1], [], []>} : vector<2x32xf32>, vector<32x32xf32>, vector<2x32xf32> -> vector<2x32xf32>
    %177 = arith.addf %173, %176 : vector<2x32xf32>
    %178 = math.tanh %177 : vector<2x32xf32>
    %cst_84 = arith.constant 1.000000e+00 : f32
    %179 = vector.broadcast %cst_84 : f32 to vector<2x32xf32>
    %180 = arith.subf %179, %171 : vector<2x32xf32>
    %181 = arith.mulf %180, %178 : vector<2x32xf32>
    %182 = arith.mulf %171, %131 : vector<2x32xf32>
    %183 = arith.addf %181, %182 : vector<2x32xf32>
    %c4 = arith.constant 4 : index
    %c0_85 = arith.constant 0 : index
    %c0_86 = arith.constant 0 : index
    %184 = vector.load %arg1[%c4, %c0_85, %c0_86] : memref<8x2x192xf32, #tpu.memory_space<vmem>>, vector<1x2x192xf32>
    %185 = vector.shape_cast %184 : vector<1x2x192xf32> to vector<2x192xf32>
    %186 = vector.extract_strided_slice %185 {offsets = [0, 96], sizes = [2, 64], strides = [1, 1]} : vector<2x192xf32> to vector<2x64xf32>
    %c0_87 = arith.constant 0 : index
    %c0_88 = arith.constant 0 : index
    %187 = vector.load %arg4[%c0_87, %c0_88] : memref<32x64xf32, #tpu.memory_space<vmem>>, vector<32x64xf32>
    %cst_89 = arith.constant dense<0.000000e+00> : vector<2x64xf32>
    %188 = tpu.matmul %157, %187, %cst_89 {dimension_numbers = #tpu.dot_dimension_numbers<[1], [0], [0], [1], [0, 0, 1, 1], [], []>} : vector<2x32xf32>, vector<32x64xf32>, vector<2x64xf32> -> vector<2x64xf32>
    %189 = arith.addf %186, %188 : vector<2x64xf32>
    %cst_90 = arith.constant 5.000000e-01 : f32
    %190 = vector.broadcast %cst_90 : f32 to vector<2x64xf32>
    %191 = arith.mulf %190, %189 : vector<2x64xf32>
    %192 = math.tanh %191 : vector<2x64xf32>
    %cst_91 = arith.constant 5.000000e-01 : f32
    %193 = vector.broadcast %cst_91 : f32 to vector<2x64xf32>
    %194 = arith.mulf %193, %192 : vector<2x64xf32>
    %cst_92 = arith.constant 5.000000e-01 : f32
    %195 = vector.broadcast %cst_92 : f32 to vector<2x64xf32>
    %196 = arith.addf %194, %195 : vector<2x64xf32>
    %197 = vector.extract_strided_slice %196 {offsets = [0, 0], sizes = [2, 32], strides = [1, 1]} : vector<2x64xf32> to vector<2x32xf32>
    %198 = vector.extract_strided_slice %196 {offsets = [0, 32], sizes = [2, 32], strides = [1, 1]} : vector<2x64xf32> to vector<2x32xf32>
    %199 = vector.extract_strided_slice %185 {offsets = [0, 160], sizes = [2, 32], strides = [1, 1]} : vector<2x192xf32> to vector<2x32xf32>
    %200 = arith.mulf %198, %157 : vector<2x32xf32>
    %c0_93 = arith.constant 0 : index
    %c0_94 = arith.constant 0 : index
    %201 = vector.load %arg5[%c0_93, %c0_94] : memref<32x32xf32, #tpu.memory_space<vmem>>, vector<32x32xf32>
    %cst_95 = arith.constant dense<0.000000e+00> : vector<2x32xf32>
    %202 = tpu.matmul %200, %201, %cst_95 {dimension_numbers = #tpu.dot_dimension_numbers<[1], [0], [0], [1], [0, 0, 1, 1], [], []>} : vector<2x32xf32>, vector<32x32xf32>, vector<2x32xf32> -> vector<2x32xf32>
    %203 = arith.addf %199, %202 : vector<2x32xf32>
    %204 = math.tanh %203 : vector<2x32xf32>
    %cst_96 = arith.constant 1.000000e+00 : f32
    %205 = vector.broadcast %cst_96 : f32 to vector<2x32xf32>
    %206 = arith.subf %205, %197 : vector<2x32xf32>
    %207 = arith.mulf %206, %204 : vector<2x32xf32>
    %208 = arith.mulf %197, %157 : vector<2x32xf32>
    %209 = arith.addf %207, %208 : vector<2x32xf32>
    %c4_97 = arith.constant 4 : index
    %c0_98 = arith.constant 0 : index
    %c0_99 = arith.constant 0 : index
    %210 = vector.load %arg1[%c4_97, %c0_98, %c0_99] : memref<8x2x192xf32, #tpu.memory_space<vmem>>, vector<1x2x192xf32>
    %211 = vector.shape_cast %210 : vector<1x2x192xf32> to vector<2x192xf32>
    %212 = vector.extract_strided_slice %211 {offsets = [0, 0], sizes = [2, 64], strides = [1, 1]} : vector<2x192xf32> to vector<2x64xf32>
    %c0_100 = arith.constant 0 : index
    %c0_101 = arith.constant 0 : index
    %213 = vector.load %arg2[%c0_100, %c0_101] : memref<32x64xf32, #tpu.memory_space<vmem>>, vector<32x64xf32>
    %cst_102 = arith.constant dense<0.000000e+00> : vector<2x64xf32>
    %214 = tpu.matmul %183, %213, %cst_102 {dimension_numbers = #tpu.dot_dimension_numbers<[1], [0], [0], [1], [0, 0, 1, 1], [], []>} : vector<2x32xf32>, vector<32x64xf32>, vector<2x64xf32> -> vector<2x64xf32>
    %215 = arith.addf %212, %214 : vector<2x64xf32>
    %cst_103 = arith.constant 5.000000e-01 : f32
    %216 = vector.broadcast %cst_103 : f32 to vector<2x64xf32>
    %217 = arith.mulf %216, %215 : vector<2x64xf32>
    %218 = math.tanh %217 : vector<2x64xf32>
    %cst_104 = arith.constant 5.000000e-01 : f32
    %219 = vector.broadcast %cst_104 : f32 to vector<2x64xf32>
    %220 = arith.mulf %219, %218 : vector<2x64xf32>
    %cst_105 = arith.constant 5.000000e-01 : f32
    %221 = vector.broadcast %cst_105 : f32 to vector<2x64xf32>
    %222 = arith.addf %220, %221 : vector<2x64xf32>
    %223 = vector.extract_strided_slice %222 {offsets = [0, 0], sizes = [2, 32], strides = [1, 1]} : vector<2x64xf32> to vector<2x32xf32>
    %224 = vector.extract_strided_slice %222 {offsets = [0, 32], sizes = [2, 32], strides = [1, 1]} : vector<2x64xf32> to vector<2x32xf32>
    %225 = vector.extract_strided_slice %211 {offsets = [0, 64], sizes = [2, 32], strides = [1, 1]} : vector<2x192xf32> to vector<2x32xf32>
    %226 = arith.mulf %224, %183 : vector<2x32xf32>
    %c0_106 = arith.constant 0 : index
    %c0_107 = arith.constant 0 : index
    %227 = vector.load %arg3[%c0_106, %c0_107] : memref<32x32xf32, #tpu.memory_space<vmem>>, vector<32x32xf32>
    %cst_108 = arith.constant dense<0.000000e+00> : vector<2x32xf32>
    %228 = tpu.matmul %226, %227, %cst_108 {dimension_numbers = #tpu.dot_dimension_numbers<[1], [0], [0], [1], [0, 0, 1, 1], [], []>} : vector<2x32xf32>, vector<32x32xf32>, vector<2x32xf32> -> vector<2x32xf32>
    %229 = arith.addf %225, %228 : vector<2x32xf32>
    %230 = math.tanh %229 : vector<2x32xf32>
    %cst_109 = arith.constant 1.000000e+00 : f32
    %231 = vector.broadcast %cst_109 : f32 to vector<2x32xf32>
    %232 = arith.subf %231, %223 : vector<2x32xf32>
    %233 = arith.mulf %232, %230 : vector<2x32xf32>
    %234 = arith.mulf %223, %183 : vector<2x32xf32>
    %235 = arith.addf %233, %234 : vector<2x32xf32>
    %c3_110 = arith.constant 3 : index
    %c0_111 = arith.constant 0 : index
    %c0_112 = arith.constant 0 : index
    %236 = vector.load %arg1[%c3_110, %c0_111, %c0_112] : memref<8x2x192xf32, #tpu.memory_space<vmem>>, vector<1x2x192xf32>
    %237 = vector.shape_cast %236 : vector<1x2x192xf32> to vector<2x192xf32>
    %238 = vector.extract_strided_slice %237 {offsets = [0, 96], sizes = [2, 64], strides = [1, 1]} : vector<2x192xf32> to vector<2x64xf32>
    %c0_113 = arith.constant 0 : index
    %c0_114 = arith.constant 0 : index
    %239 = vector.load %arg4[%c0_113, %c0_114] : memref<32x64xf32, #tpu.memory_space<vmem>>, vector<32x64xf32>
    %cst_115 = arith.constant dense<0.000000e+00> : vector<2x64xf32>
    %240 = tpu.matmul %209, %239, %cst_115 {dimension_numbers = #tpu.dot_dimension_numbers<[1], [0], [0], [1], [0, 0, 1, 1], [], []>} : vector<2x32xf32>, vector<32x64xf32>, vector<2x64xf32> -> vector<2x64xf32>
    %241 = arith.addf %238, %240 : vector<2x64xf32>
    %cst_116 = arith.constant 5.000000e-01 : f32
    %242 = vector.broadcast %cst_116 : f32 to vector<2x64xf32>
    %243 = arith.mulf %242, %241 : vector<2x64xf32>
    %244 = math.tanh %243 : vector<2x64xf32>
    %cst_117 = arith.constant 5.000000e-01 : f32
    %245 = vector.broadcast %cst_117 : f32 to vector<2x64xf32>
    %246 = arith.mulf %245, %244 : vector<2x64xf32>
    %cst_118 = arith.constant 5.000000e-01 : f32
    %247 = vector.broadcast %cst_118 : f32 to vector<2x64xf32>
    %248 = arith.addf %246, %247 : vector<2x64xf32>
    %249 = vector.extract_strided_slice %248 {offsets = [0, 0], sizes = [2, 32], strides = [1, 1]} : vector<2x64xf32> to vector<2x32xf32>
    %250 = vector.extract_strided_slice %248 {offsets = [0, 32], sizes = [2, 32], strides = [1, 1]} : vector<2x64xf32> to vector<2x32xf32>
    %251 = vector.extract_strided_slice %237 {offsets = [0, 160], sizes = [2, 32], strides = [1, 1]} : vector<2x192xf32> to vector<2x32xf32>
    %252 = arith.mulf %250, %209 : vector<2x32xf32>
    %c0_119 = arith.constant 0 : index
    %c0_120 = arith.constant 0 : index
    %253 = vector.load %arg5[%c0_119, %c0_120] : memref<32x32xf32, #tpu.memory_space<vmem>>, vector<32x32xf32>
    %cst_121 = arith.constant dense<0.000000e+00> : vector<2x32xf32>
    %254 = tpu.matmul %252, %253, %cst_121 {dimension_numbers = #tpu.dot_dimension_numbers<[1], [0], [0], [1], [0, 0, 1, 1], [], []>} : vector<2x32xf32>, vector<32x32xf32>, vector<2x32xf32> -> vector<2x32xf32>
    %255 = arith.addf %251, %254 : vector<2x32xf32>
    %256 = math.tanh %255 : vector<2x32xf32>
    %cst_122 = arith.constant 1.000000e+00 : f32
    %257 = vector.broadcast %cst_122 : f32 to vector<2x32xf32>
    %258 = arith.subf %257, %249 : vector<2x32xf32>
    %259 = arith.mulf %258, %256 : vector<2x32xf32>
    %260 = arith.mulf %249, %209 : vector<2x32xf32>
    %261 = arith.addf %259, %260 : vector<2x32xf32>
    %c5_123 = arith.constant 5 : index
    %c0_124 = arith.constant 0 : index
    %c0_125 = arith.constant 0 : index
    %262 = vector.load %arg1[%c5_123, %c0_124, %c0_125] : memref<8x2x192xf32, #tpu.memory_space<vmem>>, vector<1x2x192xf32>
    %263 = vector.shape_cast %262 : vector<1x2x192xf32> to vector<2x192xf32>
    %264 = vector.extract_strided_slice %263 {offsets = [0, 0], sizes = [2, 64], strides = [1, 1]} : vector<2x192xf32> to vector<2x64xf32>
    %c0_126 = arith.constant 0 : index
    %c0_127 = arith.constant 0 : index
    %265 = vector.load %arg2[%c0_126, %c0_127] : memref<32x64xf32, #tpu.memory_space<vmem>>, vector<32x64xf32>
    %cst_128 = arith.constant dense<0.000000e+00> : vector<2x64xf32>
    %266 = tpu.matmul %235, %265, %cst_128 {dimension_numbers = #tpu.dot_dimension_numbers<[1], [0], [0], [1], [0, 0, 1, 1], [], []>} : vector<2x32xf32>, vector<32x64xf32>, vector<2x64xf32> -> vector<2x64xf32>
    %267 = arith.addf %264, %266 : vector<2x64xf32>
    %cst_129 = arith.constant 5.000000e-01 : f32
    %268 = vector.broadcast %cst_129 : f32 to vector<2x64xf32>
    %269 = arith.mulf %268, %267 : vector<2x64xf32>
    %270 = math.tanh %269 : vector<2x64xf32>
    %cst_130 = arith.constant 5.000000e-01 : f32
    %271 = vector.broadcast %cst_130 : f32 to vector<2x64xf32>
    %272 = arith.mulf %271, %270 : vector<2x64xf32>
    %cst_131 = arith.constant 5.000000e-01 : f32
    %273 = vector.broadcast %cst_131 : f32 to vector<2x64xf32>
    %274 = arith.addf %272, %273 : vector<2x64xf32>
    %275 = vector.extract_strided_slice %274 {offsets = [0, 0], sizes = [2, 32], strides = [1, 1]} : vector<2x64xf32> to vector<2x32xf32>
    %276 = vector.extract_strided_slice %274 {offsets = [0, 32], sizes = [2, 32], strides = [1, 1]} : vector<2x64xf32> to vector<2x32xf32>
    %277 = vector.extract_strided_slice %263 {offsets = [0, 64], sizes = [2, 32], strides = [1, 1]} : vector<2x192xf32> to vector<2x32xf32>
    %278 = arith.mulf %276, %235 : vector<2x32xf32>
    %c0_132 = arith.constant 0 : index
    %c0_133 = arith.constant 0 : index
    %279 = vector.load %arg3[%c0_132, %c0_133] : memref<32x32xf32, #tpu.memory_space<vmem>>, vector<32x32xf32>
    %cst_134 = arith.constant dense<0.000000e+00> : vector<2x32xf32>
    %280 = tpu.matmul %278, %279, %cst_134 {dimension_numbers = #tpu.dot_dimension_numbers<[1], [0], [0], [1], [0, 0, 1, 1], [], []>} : vector<2x32xf32>, vector<32x32xf32>, vector<2x32xf32> -> vector<2x32xf32>
    %281 = arith.addf %277, %280 : vector<2x32xf32>
    %282 = math.tanh %281 : vector<2x32xf32>
    %cst_135 = arith.constant 1.000000e+00 : f32
    %283 = vector.broadcast %cst_135 : f32 to vector<2x32xf32>
    %284 = arith.subf %283, %275 : vector<2x32xf32>
    %285 = arith.mulf %284, %282 : vector<2x32xf32>
    %286 = arith.mulf %275, %235 : vector<2x32xf32>
    %287 = arith.addf %285, %286 : vector<2x32xf32>
    %c2_136 = arith.constant 2 : index
    %c0_137 = arith.constant 0 : index
    %c0_138 = arith.constant 0 : index
    %288 = vector.load %arg1[%c2_136, %c0_137, %c0_138] : memref<8x2x192xf32, #tpu.memory_space<vmem>>, vector<1x2x192xf32>
    %289 = vector.shape_cast %288 : vector<1x2x192xf32> to vector<2x192xf32>
    %290 = vector.extract_strided_slice %289 {offsets = [0, 96], sizes = [2, 64], strides = [1, 1]} : vector<2x192xf32> to vector<2x64xf32>
    %c0_139 = arith.constant 0 : index
    %c0_140 = arith.constant 0 : index
    %291 = vector.load %arg4[%c0_139, %c0_140] : memref<32x64xf32, #tpu.memory_space<vmem>>, vector<32x64xf32>
    %cst_141 = arith.constant dense<0.000000e+00> : vector<2x64xf32>
    %292 = tpu.matmul %261, %291, %cst_141 {dimension_numbers = #tpu.dot_dimension_numbers<[1], [0], [0], [1], [0, 0, 1, 1], [], []>} : vector<2x32xf32>, vector<32x64xf32>, vector<2x64xf32> -> vector<2x64xf32>
    %293 = arith.addf %290, %292 : vector<2x64xf32>
    %cst_142 = arith.constant 5.000000e-01 : f32
    %294 = vector.broadcast %cst_142 : f32 to vector<2x64xf32>
    %295 = arith.mulf %294, %293 : vector<2x64xf32>
    %296 = math.tanh %295 : vector<2x64xf32>
    %cst_143 = arith.constant 5.000000e-01 : f32
    %297 = vector.broadcast %cst_143 : f32 to vector<2x64xf32>
    %298 = arith.mulf %297, %296 : vector<2x64xf32>
    %cst_144 = arith.constant 5.000000e-01 : f32
    %299 = vector.broadcast %cst_144 : f32 to vector<2x64xf32>
    %300 = arith.addf %298, %299 : vector<2x64xf32>
    %301 = vector.extract_strided_slice %300 {offsets = [0, 0], sizes = [2, 32], strides = [1, 1]} : vector<2x64xf32> to vector<2x32xf32>
    %302 = vector.extract_strided_slice %300 {offsets = [0, 32], sizes = [2, 32], strides = [1, 1]} : vector<2x64xf32> to vector<2x32xf32>
    %303 = vector.extract_strided_slice %289 {offsets = [0, 160], sizes = [2, 32], strides = [1, 1]} : vector<2x192xf32> to vector<2x32xf32>
    %304 = arith.mulf %302, %261 : vector<2x32xf32>
    %c0_145 = arith.constant 0 : index
    %c0_146 = arith.constant 0 : index
    %305 = vector.load %arg5[%c0_145, %c0_146] : memref<32x32xf32, #tpu.memory_space<vmem>>, vector<32x32xf32>
    %cst_147 = arith.constant dense<0.000000e+00> : vector<2x32xf32>
    %306 = tpu.matmul %304, %305, %cst_147 {dimension_numbers = #tpu.dot_dimension_numbers<[1], [0], [0], [1], [0, 0, 1, 1], [], []>} : vector<2x32xf32>, vector<32x32xf32>, vector<2x32xf32> -> vector<2x32xf32>
    %307 = arith.addf %303, %306 : vector<2x32xf32>
    %308 = math.tanh %307 : vector<2x32xf32>
    %cst_148 = arith.constant 1.000000e+00 : f32
    %309 = vector.broadcast %cst_148 : f32 to vector<2x32xf32>
    %310 = arith.subf %309, %301 : vector<2x32xf32>
    %311 = arith.mulf %310, %308 : vector<2x32xf32>
    %312 = arith.mulf %301, %261 : vector<2x32xf32>
    %313 = arith.addf %311, %312 : vector<2x32xf32>
    %c6_149 = arith.constant 6 : index
    %c0_150 = arith.constant 0 : index
    %c0_151 = arith.constant 0 : index
    %314 = vector.load %arg1[%c6_149, %c0_150, %c0_151] : memref<8x2x192xf32, #tpu.memory_space<vmem>>, vector<1x2x192xf32>
    %315 = vector.shape_cast %314 : vector<1x2x192xf32> to vector<2x192xf32>
    %316 = vector.extract_strided_slice %315 {offsets = [0, 0], sizes = [2, 64], strides = [1, 1]} : vector<2x192xf32> to vector<2x64xf32>
    %c0_152 = arith.constant 0 : index
    %c0_153 = arith.constant 0 : index
    %317 = vector.load %arg2[%c0_152, %c0_153] : memref<32x64xf32, #tpu.memory_space<vmem>>, vector<32x64xf32>
    %cst_154 = arith.constant dense<0.000000e+00> : vector<2x64xf32>
    %318 = tpu.matmul %287, %317, %cst_154 {dimension_numbers = #tpu.dot_dimension_numbers<[1], [0], [0], [1], [0, 0, 1, 1], [], []>} : vector<2x32xf32>, vector<32x64xf32>, vector<2x64xf32> -> vector<2x64xf32>
    %319 = arith.addf %316, %318 : vector<2x64xf32>
    %cst_155 = arith.constant 5.000000e-01 : f32
    %320 = vector.broadcast %cst_155 : f32 to vector<2x64xf32>
    %321 = arith.mulf %320, %319 : vector<2x64xf32>
    %322 = math.tanh %321 : vector<2x64xf32>
    %cst_156 = arith.constant 5.000000e-01 : f32
    %323 = vector.broadcast %cst_156 : f32 to vector<2x64xf32>
    %324 = arith.mulf %323, %322 : vector<2x64xf32>
    %cst_157 = arith.constant 5.000000e-01 : f32
    %325 = vector.broadcast %cst_157 : f32 to vector<2x64xf32>
    %326 = arith.addf %324, %325 : vector<2x64xf32>
    %327 = vector.extract_strided_slice %326 {offsets = [0, 0], sizes = [2, 32], strides = [1, 1]} : vector<2x64xf32> to vector<2x32xf32>
    %328 = vector.extract_strided_slice %326 {offsets = [0, 32], sizes = [2, 32], strides = [1, 1]} : vector<2x64xf32> to vector<2x32xf32>
    %329 = vector.extract_strided_slice %315 {offsets = [0, 64], sizes = [2, 32], strides = [1, 1]} : vector<2x192xf32> to vector<2x32xf32>
    %330 = arith.mulf %328, %287 : vector<2x32xf32>
    %c0_158 = arith.constant 0 : index
    %c0_159 = arith.constant 0 : index
    %331 = vector.load %arg3[%c0_158, %c0_159] : memref<32x32xf32, #tpu.memory_space<vmem>>, vector<32x32xf32>
    %cst_160 = arith.constant dense<0.000000e+00> : vector<2x32xf32>
    %332 = tpu.matmul %330, %331, %cst_160 {dimension_numbers = #tpu.dot_dimension_numbers<[1], [0], [0], [1], [0, 0, 1, 1], [], []>} : vector<2x32xf32>, vector<32x32xf32>, vector<2x32xf32> -> vector<2x32xf32>
    %333 = arith.addf %329, %332 : vector<2x32xf32>
    %334 = math.tanh %333 : vector<2x32xf32>
    %cst_161 = arith.constant 1.000000e+00 : f32
    %335 = vector.broadcast %cst_161 : f32 to vector<2x32xf32>
    %336 = arith.subf %335, %327 : vector<2x32xf32>
    %337 = arith.mulf %336, %334 : vector<2x32xf32>
    %338 = arith.mulf %327, %287 : vector<2x32xf32>
    %339 = arith.addf %337, %338 : vector<2x32xf32>
    %c1_162 = arith.constant 1 : index
    %c0_163 = arith.constant 0 : index
    %c0_164 = arith.constant 0 : index
    %340 = vector.load %arg1[%c1_162, %c0_163, %c0_164] : memref<8x2x192xf32, #tpu.memory_space<vmem>>, vector<1x2x192xf32>
    %341 = vector.shape_cast %340 : vector<1x2x192xf32> to vector<2x192xf32>
    %342 = vector.extract_strided_slice %341 {offsets = [0, 96], sizes = [2, 64], strides = [1, 1]} : vector<2x192xf32> to vector<2x64xf32>
    %c0_165 = arith.constant 0 : index
    %c0_166 = arith.constant 0 : index
    %343 = vector.load %arg4[%c0_165, %c0_166] : memref<32x64xf32, #tpu.memory_space<vmem>>, vector<32x64xf32>
    %cst_167 = arith.constant dense<0.000000e+00> : vector<2x64xf32>
    %344 = tpu.matmul %313, %343, %cst_167 {dimension_numbers = #tpu.dot_dimension_numbers<[1], [0], [0], [1], [0, 0, 1, 1], [], []>} : vector<2x32xf32>, vector<32x64xf32>, vector<2x64xf32> -> vector<2x64xf32>
    %345 = arith.addf %342, %344 : vector<2x64xf32>
    %cst_168 = arith.constant 5.000000e-01 : f32
    %346 = vector.broadcast %cst_168 : f32 to vector<2x64xf32>
    %347 = arith.mulf %346, %345 : vector<2x64xf32>
    %348 = math.tanh %347 : vector<2x64xf32>
    %cst_169 = arith.constant 5.000000e-01 : f32
    %349 = vector.broadcast %cst_169 : f32 to vector<2x64xf32>
    %350 = arith.mulf %349, %348 : vector<2x64xf32>
    %cst_170 = arith.constant 5.000000e-01 : f32
    %351 = vector.broadcast %cst_170 : f32 to vector<2x64xf32>
    %352 = arith.addf %350, %351 : vector<2x64xf32>
    %353 = vector.extract_strided_slice %352 {offsets = [0, 0], sizes = [2, 32], strides = [1, 1]} : vector<2x64xf32> to vector<2x32xf32>
    %354 = vector.extract_strided_slice %352 {offsets = [0, 32], sizes = [2, 32], strides = [1, 1]} : vector<2x64xf32> to vector<2x32xf32>
    %355 = vector.extract_strided_slice %341 {offsets = [0, 160], sizes = [2, 32], strides = [1, 1]} : vector<2x192xf32> to vector<2x32xf32>
    %356 = arith.mulf %354, %313 : vector<2x32xf32>
    %c0_171 = arith.constant 0 : index
    %c0_172 = arith.constant 0 : index
    %357 = vector.load %arg5[%c0_171, %c0_172] : memref<32x32xf32, #tpu.memory_space<vmem>>, vector<32x32xf32>
    %cst_173 = arith.constant dense<0.000000e+00> : vector<2x32xf32>
    %358 = tpu.matmul %356, %357, %cst_173 {dimension_numbers = #tpu.dot_dimension_numbers<[1], [0], [0], [1], [0, 0, 1, 1], [], []>} : vector<2x32xf32>, vector<32x32xf32>, vector<2x32xf32> -> vector<2x32xf32>
    %359 = arith.addf %355, %358 : vector<2x32xf32>
    %360 = math.tanh %359 : vector<2x32xf32>
    %cst_174 = arith.constant 1.000000e+00 : f32
    %361 = vector.broadcast %cst_174 : f32 to vector<2x32xf32>
    %362 = arith.subf %361, %353 : vector<2x32xf32>
    %363 = arith.mulf %362, %360 : vector<2x32xf32>
    %364 = arith.mulf %353, %313 : vector<2x32xf32>
    %365 = arith.addf %363, %364 : vector<2x32xf32>
    %c7_175 = arith.constant 7 : index
    %c0_176 = arith.constant 0 : index
    %c0_177 = arith.constant 0 : index
    %366 = vector.load %arg1[%c7_175, %c0_176, %c0_177] : memref<8x2x192xf32, #tpu.memory_space<vmem>>, vector<1x2x192xf32>
    %367 = vector.shape_cast %366 : vector<1x2x192xf32> to vector<2x192xf32>
    %368 = vector.extract_strided_slice %367 {offsets = [0, 0], sizes = [2, 64], strides = [1, 1]} : vector<2x192xf32> to vector<2x64xf32>
    %c0_178 = arith.constant 0 : index
    %c0_179 = arith.constant 0 : index
    %369 = vector.load %arg2[%c0_178, %c0_179] : memref<32x64xf32, #tpu.memory_space<vmem>>, vector<32x64xf32>
    %cst_180 = arith.constant dense<0.000000e+00> : vector<2x64xf32>
    %370 = tpu.matmul %339, %369, %cst_180 {dimension_numbers = #tpu.dot_dimension_numbers<[1], [0], [0], [1], [0, 0, 1, 1], [], []>} : vector<2x32xf32>, vector<32x64xf32>, vector<2x64xf32> -> vector<2x64xf32>
    %371 = arith.addf %368, %370 : vector<2x64xf32>
    %cst_181 = arith.constant 5.000000e-01 : f32
    %372 = vector.broadcast %cst_181 : f32 to vector<2x64xf32>
    %373 = arith.mulf %372, %371 : vector<2x64xf32>
    %374 = math.tanh %373 : vector<2x64xf32>
    %cst_182 = arith.constant 5.000000e-01 : f32
    %375 = vector.broadcast %cst_182 : f32 to vector<2x64xf32>
    %376 = arith.mulf %375, %374 : vector<2x64xf32>
    %cst_183 = arith.constant 5.000000e-01 : f32
    %377 = vector.broadcast %cst_183 : f32 to vector<2x64xf32>
    %378 = arith.addf %376, %377 : vector<2x64xf32>
    %379 = vector.extract_strided_slice %378 {offsets = [0, 0], sizes = [2, 32], strides = [1, 1]} : vector<2x64xf32> to vector<2x32xf32>
    %380 = vector.extract_strided_slice %378 {offsets = [0, 32], sizes = [2, 32], strides = [1, 1]} : vector<2x64xf32> to vector<2x32xf32>
    %381 = vector.extract_strided_slice %367 {offsets = [0, 64], sizes = [2, 32], strides = [1, 1]} : vector<2x192xf32> to vector<2x32xf32>
    %382 = arith.mulf %380, %339 : vector<2x32xf32>
    %c0_184 = arith.constant 0 : index
    %c0_185 = arith.constant 0 : index
    %383 = vector.load %arg3[%c0_184, %c0_185] : memref<32x32xf32, #tpu.memory_space<vmem>>, vector<32x32xf32>
    %cst_186 = arith.constant dense<0.000000e+00> : vector<2x32xf32>
    %384 = tpu.matmul %382, %383, %cst_186 {dimension_numbers = #tpu.dot_dimension_numbers<[1], [0], [0], [1], [0, 0, 1, 1], [], []>} : vector<2x32xf32>, vector<32x32xf32>, vector<2x32xf32> -> vector<2x32xf32>
    %385 = arith.addf %381, %384 : vector<2x32xf32>
    %386 = math.tanh %385 : vector<2x32xf32>
    %cst_187 = arith.constant 1.000000e+00 : f32
    %387 = vector.broadcast %cst_187 : f32 to vector<2x32xf32>
    %388 = arith.subf %387, %379 : vector<2x32xf32>
    %389 = arith.mulf %388, %386 : vector<2x32xf32>
    %390 = arith.mulf %379, %339 : vector<2x32xf32>
    %391 = arith.addf %389, %390 : vector<2x32xf32>
    %c0_188 = arith.constant 0 : index
    %c0_189 = arith.constant 0 : index
    %c0_190 = arith.constant 0 : index
    %392 = vector.load %arg1[%c0_188, %c0_189, %c0_190] : memref<8x2x192xf32, #tpu.memory_space<vmem>>, vector<1x2x192xf32>
    %393 = vector.shape_cast %392 : vector<1x2x192xf32> to vector<2x192xf32>
    %394 = vector.extract_strided_slice %393 {offsets = [0, 96], sizes = [2, 64], strides = [1, 1]} : vector<2x192xf32> to vector<2x64xf32>
    %c0_191 = arith.constant 0 : index
    %c0_192 = arith.constant 0 : index
    %395 = vector.load %arg4[%c0_191, %c0_192] : memref<32x64xf32, #tpu.memory_space<vmem>>, vector<32x64xf32>
    %cst_193 = arith.constant dense<0.000000e+00> : vector<2x64xf32>
    %396 = tpu.matmul %365, %395, %cst_193 {dimension_numbers = #tpu.dot_dimension_numbers<[1], [0], [0], [1], [0, 0, 1, 1], [], []>} : vector<2x32xf32>, vector<32x64xf32>, vector<2x64xf32> -> vector<2x64xf32>
    %397 = arith.addf %394, %396 : vector<2x64xf32>
    %cst_194 = arith.constant 5.000000e-01 : f32
    %398 = vector.broadcast %cst_194 : f32 to vector<2x64xf32>
    %399 = arith.mulf %398, %397 : vector<2x64xf32>
    %400 = math.tanh %399 : vector<2x64xf32>
    %cst_195 = arith.constant 5.000000e-01 : f32
    %401 = vector.broadcast %cst_195 : f32 to vector<2x64xf32>
    %402 = arith.mulf %401, %400 : vector<2x64xf32>
    %cst_196 = arith.constant 5.000000e-01 : f32
    %403 = vector.broadcast %cst_196 : f32 to vector<2x64xf32>
    %404 = arith.addf %402, %403 : vector<2x64xf32>
    %405 = vector.extract_strided_slice %404 {offsets = [0, 0], sizes = [2, 32], strides = [1, 1]} : vector<2x64xf32> to vector<2x32xf32>
    %406 = vector.extract_strided_slice %404 {offsets = [0, 32], sizes = [2, 32], strides = [1, 1]} : vector<2x64xf32> to vector<2x32xf32>
    %407 = vector.extract_strided_slice %393 {offsets = [0, 160], sizes = [2, 32], strides = [1, 1]} : vector<2x192xf32> to vector<2x32xf32>
    %408 = arith.mulf %406, %365 : vector<2x32xf32>
    %c0_197 = arith.constant 0 : index
    %c0_198 = arith.constant 0 : index
    %409 = vector.load %arg5[%c0_197, %c0_198] : memref<32x32xf32, #tpu.memory_space<vmem>>, vector<32x32xf32>
    %cst_199 = arith.constant dense<0.000000e+00> : vector<2x32xf32>
    %410 = tpu.matmul %408, %409, %cst_199 {dimension_numbers = #tpu.dot_dimension_numbers<[1], [0], [0], [1], [0, 0, 1, 1], [], []>} : vector<2x32xf32>, vector<32x32xf32>, vector<2x32xf32> -> vector<2x32xf32>
    %411 = arith.addf %407, %410 : vector<2x32xf32>
    %412 = math.tanh %411 : vector<2x32xf32>
    %cst_200 = arith.constant 1.000000e+00 : f32
    %413 = vector.broadcast %cst_200 : f32 to vector<2x32xf32>
    %414 = arith.subf %413, %405 : vector<2x32xf32>
    %415 = arith.mulf %414, %412 : vector<2x32xf32>
    %416 = arith.mulf %405, %365 : vector<2x32xf32>
    %417 = arith.addf %415, %416 : vector<2x32xf32>
    %418 = arith.addf %27, %417 : vector<2x32xf32>
    %419 = arith.addf %79, %365 : vector<2x32xf32>
    %420 = arith.addf %131, %313 : vector<2x32xf32>
    %421 = arith.addf %183, %261 : vector<2x32xf32>
    %422 = arith.addf %235, %209 : vector<2x32xf32>
    %423 = arith.addf %287, %157 : vector<2x32xf32>
    %424 = arith.addf %339, %105 : vector<2x32xf32>
    %425 = arith.addf %391, %53 : vector<2x32xf32>
    %426 = vector.shape_cast %418 : vector<2x32xf32> to vector<1x2x32xf32>
    %427 = vector.shape_cast %419 : vector<2x32xf32> to vector<1x2x32xf32>
    %428 = vector.shape_cast %420 : vector<2x32xf32> to vector<1x2x32xf32>
    %429 = vector.shape_cast %421 : vector<2x32xf32> to vector<1x2x32xf32>
    %430 = vector.shape_cast %422 : vector<2x32xf32> to vector<1x2x32xf32>
    %431 = vector.shape_cast %423 : vector<2x32xf32> to vector<1x2x32xf32>
    %432 = vector.shape_cast %424 : vector<2x32xf32> to vector<1x2x32xf32>
    %433 = vector.shape_cast %425 : vector<2x32xf32> to vector<1x2x32xf32>
    %434 = tpu.concatenate %426, %427, %428, %429, %430, %431, %432, %433 in 0 : vector<1x2x32xf32>, vector<1x2x32xf32>, vector<1x2x32xf32>, vector<1x2x32xf32>, vector<1x2x32xf32>, vector<1x2x32xf32>, vector<1x2x32xf32>, vector<1x2x32xf32> -> vector<8x2x32xf32>
    %c0_201 = arith.constant 0 : index
    %c0_202 = arith.constant 0 : index
    %c0_203 = arith.constant 0 : index
    %435 = vector.load %arg6[%c0_201, %c0_202, %c0_203] : memref<8x2x32xf32, #tpu.memory_space<vmem>>, vector<8x2x32xf32>
    tpu.vector_store %arg6[%c0_201, %c0_202, %c0_203], %434 {strides = array<i32>} : memref<8x2x32xf32, #tpu.memory_space<vmem>>, vector<8x2x32xf32>,
    return
  }
  func.func @transform_0(%arg0: i32) -> (i32, i32, i32) {
    %c0_i32 = arith.constant 0 : i32
    %c0_i32_0 = arith.constant 0 : i32
    %c0_i32_1 = arith.constant 0 : i32
    %c0_i32_2 = arith.constant 0 : i32
    return %c0_i32, %c0_i32_0, %c0_i32_1 : i32, i32, i32
  }
  func.func @transform_1(%arg0: i32) -> (i32, i32) {
    %c0_i32 = arith.constant 0 : i32
    %c0_i32_0 = arith.constant 0 : i32
    %c0_i32_1 = arith.constant 0 : i32
    return %c0_i32, %c0_i32_0 : i32, i32
  }
  func.func @transform_2(%arg0: i32) -> (i32, i32) {
    %c0_i32 = arith.constant 0 : i32
    %c0_i32_0 = arith.constant 0 : i32
    %c0_i32_1 = arith.constant 0 : i32
    return %c0_i32, %c0_i32_0 : i32, i32
  }
  func.func @transform_3(%arg0: i32) -> (i32, i32) {
    %c0_i32 = arith.constant 0 : i32
    %c0_i32_0 = arith.constant 0 : i32
    %c0_i32_1 = arith.constant 0 : i32
    return %c0_i32, %c0_i32_0 : i32, i32
  }
  func.func @transform_4(%arg0: i32) -> (i32, i32) {
    %c0_i32 = arith.constant 0 : i32
    %c0_i32_0 = arith.constant 0 : i32
    %c0_i32_1 = arith.constant 0 : i32
    return %c0_i32, %c0_i32_0 : i32, i32
  }
  func.func @transform_5(%arg0: i32) -> (i32, i32, i32) {
    %c0_i32 = arith.constant 0 : i32
    %c0_i32_0 = arith.constant 0 : i32
    %c0_i32_1 = arith.constant 0 : i32
    %c0_i32_2 = arith.constant 0 : i32
    return %c0_i32, %c0_i32_0, %c0_i32_1 : i32, i32, i32
  }
}

module attributes {stable_mosaic.version = 11 : i64} {
  func.func @_attn_cls_kernel(%arg0: i32, %arg1: memref<2x8x32xf32, #tpu.memory_space<vmem>>, %arg2: memref<2x4x32xf32, #tpu.memory_space<vmem>>, %arg3: memref<2x8xf32, #tpu.memory_space<vmem>>, %arg4: memref<6xf32, #tpu.memory_space<smem>>, %arg5: memref<32x96xf32, #tpu.memory_space<vmem>>, %arg6: memref<1x96xf32, #tpu.memory_space<vmem>>, %arg7: memref<32x96xf32, #tpu.memory_space<vmem>>, %arg8: memref<1x96xf32, #tpu.memory_space<vmem>>, %arg9: memref<24x96xf32, #tpu.memory_space<vmem>>, %arg10: memref<32x192xf32, #tpu.memory_space<vmem>>, %arg11: memref<1x192xf32, #tpu.memory_space<vmem>>, %arg12: memref<6x32x32xf32, #tpu.memory_space<vmem>>, %arg13: memref<6x32xf32, #tpu.memory_space<vmem>>, %arg14: memref<6x32x32xf32, #tpu.memory_space<vmem>>, %arg15: memref<6x32xf32, #tpu.memory_space<vmem>>, %arg16: memref<32x64xf32, #tpu.memory_space<vmem>>, %arg17: memref<1x64xf32, #tpu.memory_space<vmem>>, %arg18: memref<64x128xf32, #tpu.memory_space<vmem>>, %arg19: memref<1x128xf32, #tpu.memory_space<vmem>>, %arg20: memref<2x128xf32, #tpu.memory_space<vmem>>, %arg21: memref<2x3x8xf32, #tpu.memory_space<vmem>>) attributes {dimension_semantics = [#tpu.dimension_semantics<arbitrary>], iteration_bounds = array<i64: 1>, scalar_prefetch = 0 : i64, scratch_operands = 0 : i64, tpu.core_type = #tpu.core_type<tc>, window_params = [{pipeline_mode = #tpu.pipeline_mode<synchronous>, transform_indices = @transform_0, window_bounds = array<i64: 2, 8, 32>}, {pipeline_mode = #tpu.pipeline_mode<synchronous>, transform_indices = @transform_1, window_bounds = array<i64: 2, 4, 32>}, {pipeline_mode = #tpu.pipeline_mode<synchronous>, transform_indices = @transform_2, window_bounds = array<i64: 2, 8>}, {transform_indices = @transform_3, window_bounds = array<i64: 6>}, {pipeline_mode = #tpu.pipeline_mode<synchronous>, transform_indices = @transform_4, window_bounds = array<i64: 32, 96>}, {pipeline_mode = #tpu.pipeline_mode<synchronous>, transform_indices = @transform_5, window_bounds = array<i64: 1, 96>}, {pipeline_mode = #tpu.pipeline_mode<synchronous>, transform_indices = @transform_6, window_bounds = array<i64: 32, 96>}, {pipeline_mode = #tpu.pipeline_mode<synchronous>, transform_indices = @transform_7, window_bounds = array<i64: 1, 96>}, {pipeline_mode = #tpu.pipeline_mode<synchronous>, transform_indices = @transform_8, window_bounds = array<i64: 24, 96>}, {pipeline_mode = #tpu.pipeline_mode<synchronous>, transform_indices = @transform_9, window_bounds = array<i64: 32, 192>}, {pipeline_mode = #tpu.pipeline_mode<synchronous>, transform_indices = @transform_10, window_bounds = array<i64: 1, 192>}, {pipeline_mode = #tpu.pipeline_mode<synchronous>, transform_indices = @transform_11, window_bounds = array<i64: 6, 32, 32>}, {pipeline_mode = #tpu.pipeline_mode<synchronous>, transform_indices = @transform_12, window_bounds = array<i64: 6, 32>}, {pipeline_mode = #tpu.pipeline_mode<synchronous>, transform_indices = @transform_13, window_bounds = array<i64: 6, 32, 32>}, {pipeline_mode = #tpu.pipeline_mode<synchronous>, transform_indices = @transform_14, window_bounds = array<i64: 6, 32>}, {pipeline_mode = #tpu.pipeline_mode<synchronous>, transform_indices = @transform_15, window_bounds = array<i64: 32, 64>}, {pipeline_mode = #tpu.pipeline_mode<synchronous>, transform_indices = @transform_16, window_bounds = array<i64: 1, 64>}, {pipeline_mode = #tpu.pipeline_mode<synchronous>, transform_indices = @transform_17, window_bounds = array<i64: 64, 128>}, {pipeline_mode = #tpu.pipeline_mode<synchronous>, transform_indices = @transform_18, window_bounds = array<i64: 1, 128>}, {pipeline_mode = #tpu.pipeline_mode<synchronous>, transform_indices = @transform_19, window_bounds = array<i64: 2, 128>}, {pipeline_mode = #tpu.pipeline_mode<synchronous>, transform_indices = @transform_20, window_bounds = array<i64: 2, 3, 8>}]} {
    %c0 = arith.constant 0 : index
    %c0_0 = arith.constant 0 : index
    %c0_1 = arith.constant 0 : index
    %0 = vector.load %arg1[%c0, %c0_0, %c0_1] : memref<2x8x32xf32, #tpu.memory_space<vmem>>, vector<2x8x32xf32>
    %1 = vector.shape_cast %0 : vector<2x8x32xf32> to vector<16x32xf32>
    %c0_2 = arith.constant 0 : index
    %c0_3 = arith.constant 0 : index
    %c0_4 = arith.constant 0 : index
    %2 = vector.load %arg2[%c0_2, %c0_3, %c0_4] : memref<2x4x32xf32, #tpu.memory_space<vmem>>, vector<2x4x32xf32>
    %c0_5 = arith.constant 0 : index
    %c0_6 = arith.constant 0 : index
    %3 = vector.load %arg3[%c0_5, %c0_6] : memref<2x8xf32, #tpu.memory_space<vmem>>, vector<2x8xf32>
    %c0_7 = arith.constant 0 : index
    %c0_8 = arith.constant 0 : index
    %4 = vector.load %arg5[%c0_7, %c0_8] : memref<32x96xf32, #tpu.memory_space<vmem>>, vector<32x96xf32>
    %cst = arith.constant dense<0.000000e+00> : vector<16x96xf32>
    %5 = tpu.matmul %1, %4, %cst {dimension_numbers = #tpu.dot_dimension_numbers<[1], [0], [0], [1], [0, 0, 1, 1], [], []>} : vector<16x32xf32>, vector<32x96xf32>, vector<16x96xf32> -> vector<16x96xf32>
    %c0_9 = arith.constant 0 : index
    %c0_10 = arith.constant 0 : index
    %6 = vector.load %arg6[%c0_9, %c0_10] : memref<1x96xf32, #tpu.memory_space<vmem>>, vector<1x96xf32>
    %7 = vector.broadcast %6 : vector<1x96xf32> to vector<16x96xf32>
    %8 = arith.addf %5, %7 : vector<16x96xf32>
    %cst_11 = arith.constant 0.000000e+00 : f32
    %9 = vector.broadcast %cst_11 : f32 to vector<16x96xf32>
    %10 = arith.maximumf %8, %9 : vector<16x96xf32>
    %11 = vector.shape_cast %2 : vector<2x4x32xf32> to vector<8x32xf32>
    %c0_12 = arith.constant 0 : index
    %c0_13 = arith.constant 0 : index
    %12 = vector.load %arg7[%c0_12, %c0_13] : memref<32x96xf32, #tpu.memory_space<vmem>>, vector<32x96xf32>
    %cst_14 = arith.constant dense<0.000000e+00> : vector<8x96xf32>
    %13 = tpu.matmul %11, %12, %cst_14 {dimension_numbers = #tpu.dot_dimension_numbers<[1], [0], [0], [1], [0, 0, 1, 1], [], []>} : vector<8x32xf32>, vector<32x96xf32>, vector<8x96xf32> -> vector<8x96xf32>
    %c0_15 = arith.constant 0 : index
    %c0_16 = arith.constant 0 : index
    %14 = vector.load %arg8[%c0_15, %c0_16] : memref<1x96xf32, #tpu.memory_space<vmem>>, vector<1x96xf32>
    %15 = vector.broadcast %14 : vector<1x96xf32> to vector<8x96xf32>
    %16 = arith.addf %13, %15 : vector<8x96xf32>
    %cst_17 = arith.constant 0.000000e+00 : f32
    %17 = vector.broadcast %cst_17 : f32 to vector<8x96xf32>
    %18 = arith.maximumf %16, %17 : vector<8x96xf32>
    %19 = vector.shape_cast %10 : vector<16x96xf32> to vector<2x8x96xf32>
    %20 = vector.shape_cast %18 : vector<8x96xf32> to vector<2x4x96xf32>
    %21 = tpu.concatenate %20, %20, %20, %20, %20, %20 in 1 : vector<2x4x96xf32>, vector<2x4x96xf32>, vector<2x4x96xf32>, vector<2x4x96xf32>, vector<2x4x96xf32>, vector<2x4x96xf32> -> vector<2x24x96xf32>
    %c0_18 = arith.constant 0 : index
    %c0_19 = arith.constant 0 : index
    %22 = vector.load %arg9[%c0_18, %c0_19] : memref<24x96xf32, #tpu.memory_space<vmem>>, vector<24x96xf32>
    %23 = vector.shape_cast %22 : vector<24x96xf32> to vector<1x24x96xf32>
    %24 = vector.broadcast %23 : vector<1x24x96xf32> to vector<2x24x96xf32>
    %25 = arith.mulf %21, %24 : vector<2x24x96xf32>
    "tpu.trace_start"() <{level = 10 : i32, message = "bkc,boc->bko"}> : () -> ()
    %cst_20 = arith.constant dense<0.000000e+00> : vector<2x24x8xf32>
    %26 = tpu.matmul %25, %19, %cst_20 {dimension_numbers = #tpu.dot_dimension_numbers<[2], [2], [1], [1], [0, 0, 0, 1, 1, 1], [0], [0]>} : vector<2x24x96xf32>, vector<2x8x96xf32>, vector<2x24x8xf32> -> vector<2x24x8xf32>
    "tpu.trace_stop"() : () -> ()
    %c0_21 = arith.constant 0 : index
    %c0_22 = arith.constant 0 : index
    %27 = vector.load %arg10[%c0_21, %c0_22] : memref<32x192xf32, #tpu.memory_space<vmem>>, vector<32x192xf32>
    %cst_23 = arith.constant dense<0.000000e+00> : vector<16x192xf32>
    %28 = tpu.matmul %1, %27, %cst_23 {dimension_numbers = #tpu.dot_dimension_numbers<[1], [0], [0], [1], [0, 0, 1, 1], [], []>} : vector<16x32xf32>, vector<32x192xf32>, vector<16x192xf32> -> vector<16x192xf32>
    %c0_24 = arith.constant 0 : index
    %c0_25 = arith.constant 0 : index
    %29 = vector.load %arg11[%c0_24, %c0_25] : memref<1x192xf32, #tpu.memory_space<vmem>>, vector<1x192xf32>
    %30 = vector.broadcast %29 : vector<1x192xf32> to vector<16x192xf32>
    %31 = arith.addf %28, %30 : vector<16x192xf32>
    %cst_26 = arith.constant 0.000000e+00 : f32
    %32 = vector.broadcast %cst_26 : f32 to vector<16x192xf32>
    %33 = arith.maximumf %31, %32 : vector<16x192xf32>
    %34 = vector.extract_strided_slice %26 {offsets = [0, 0, 0], sizes = [2, 4, 8], strides = [1, 1, 1]} : vector<2x24x8xf32> to vector<2x4x8xf32>
    %c0_27 = arith.constant 0 : index
    %35 = memref.load %arg4[%c0_27] : memref<6xf32, #tpu.memory_space<smem>>
    %36 = vector.broadcast %35 : f32 to vector<2x4x8xf32>
    %37 = arith.addf %34, %36 : vector<2x4x8xf32>
    %cst_28 = arith.constant dense<0.000000e+00> : vector<2x8xf32>
    %38 = vector.multi_reduction <add>, %37, %cst_28 [1] : vector<2x4x8xf32> to vector<2x8xf32>
    %39 = vector.shape_cast %38 : vector<2x8xf32> to vector<2x1x8xf32>
    %40 = vector.shape_cast %3 : vector<2x8xf32> to vector<2x1x8xf32>
    %cst_29 = arith.constant 0.000000e+00 : f32
    %41 = vector.broadcast %cst_29 : f32 to vector<2x1x8xf32>
    %42 = arith.cmpf oeq, %40, %41 : vector<2x1x8xf32>
    %cst_30 = arith.constant -1.000000e+30 : f32
    %43 = vector.shape_cast %42 : vector<2x1x8xi1> to vector<2x1x8xi1>
    %44 = vector.broadcast %43 : vector<2x1x8xi1> to vector<2x4x8xi1>
    %45 = vector.broadcast %cst_30 : f32 to vector<2x4x8xf32>
    %46 = arith.select %44, %45, %37 : vector<2x4x8xi1>, vector<2x4x8xf32>
    %cst_31 = arith.constant dense<0xFF800000> : vector<2x4xf32>
    %47 = vector.multi_reduction <maximumf>, %46, %cst_31 [2] : vector<2x4x8xf32> to vector<2x4xf32>
    %48 = vector.shape_cast %47 : vector<2x4xf32> to vector<2x4x1xf32>
    %cst_32 = arith.constant dense<0xFF800000> : vector<2x1xf32>
    %49 = vector.multi_reduction <maximumf>, %48, %cst_32 [1] : vector<2x4x1xf32> to vector<2x1xf32>
    %50 = vector.shape_cast %49 : vector<2x1xf32> to vector<2x1x1xf32>
    %51 = vector.broadcast %50 : vector<2x1x1xf32> to vector<2x4x8xf32>
    %52 = arith.subf %46, %51 : vector<2x4x8xf32>
    %53 = math.exp %52 : vector<2x4x8xf32>
    %cst_33 = arith.constant dense<0.000000e+00> : vector<2x4xf32>
    %54 = vector.multi_reduction <add>, %53, %cst_33 [2] : vector<2x4x8xf32> to vector<2x4xf32>
    %55 = vector.shape_cast %54 : vector<2x4xf32> to vector<2x4x1xf32>
    %cst_34 = arith.constant dense<0.000000e+00> : vector<2x1xf32>
    %56 = vector.multi_reduction <add>, %55, %cst_34 [1] : vector<2x4x1xf32> to vector<2x1xf32>
    %57 = vector.shape_cast %56 : vector<2x1xf32> to vector<2x1x1xf32>
    %58 = tpu.reciprocal %57 {approx = true} : vector<2x1x1xf32> -> vector<2x1x1xf32>
    %59 = vector.broadcast %58 : vector<2x1x1xf32> to vector<2x4x8xf32>
    %60 = arith.mulf %53, %59 : vector<2x4x8xf32>
    %61 = vector.extract_strided_slice %33 {offsets = [0, 0], sizes = [16, 32], strides = [1, 1]} : vector<16x192xf32> to vector<16x32xf32>
    %62 = vector.shape_cast %61 : vector<16x32xf32> to vector<2x8x32xf32>
    "tpu.trace_start"() <{level = 10 : i32, message = "blo,bom->blm"}> : () -> ()
    %cst_35 = arith.constant dense<0.000000e+00> : vector<2x4x32xf32>
    %63 = tpu.matmul %60, %62, %cst_35 {dimension_numbers = #tpu.dot_dimension_numbers<[2], [1], [1], [2], [0, 0, 0, 1, 1, 2], [0], [0]>} : vector<2x4x8xf32>, vector<2x8x32xf32>, vector<2x4x32xf32> -> vector<2x4x32xf32>
    "tpu.trace_stop"() : () -> ()
    %64 = vector.extract_strided_slice %26 {offsets = [0, 4, 0], sizes = [2, 4, 8], strides = [1, 1, 1]} : vector<2x24x8xf32> to vector<2x4x8xf32>
    %c1 = arith.constant 1 : index
    %65 = memref.load %arg4[%c1] : memref<6xf32, #tpu.memory_space<smem>>
    %66 = vector.broadcast %65 : f32 to vector<2x4x8xf32>
    %67 = arith.addf %64, %66 : vector<2x4x8xf32>
    %cst_36 = arith.constant dense<0.000000e+00> : vector<2x8xf32>
    %68 = vector.multi_reduction <add>, %67, %cst_36 [1] : vector<2x4x8xf32> to vector<2x8xf32>
    %69 = vector.shape_cast %68 : vector<2x8xf32> to vector<2x1x8xf32>
    %70 = vector.shape_cast %3 : vector<2x8xf32> to vector<2x1x8xf32>
    %cst_37 = arith.constant 0.000000e+00 : f32
    %71 = vector.broadcast %cst_37 : f32 to vector<2x1x8xf32>
    %72 = arith.cmpf oeq, %70, %71 : vector<2x1x8xf32>
    %cst_38 = arith.constant -1.000000e+30 : f32
    %73 = vector.shape_cast %72 : vector<2x1x8xi1> to vector<2x1x8xi1>
    %74 = vector.broadcast %73 : vector<2x1x8xi1> to vector<2x4x8xi1>
    %75 = vector.broadcast %cst_38 : f32 to vector<2x4x8xf32>
    %76 = arith.select %74, %75, %67 : vector<2x4x8xi1>, vector<2x4x8xf32>
    %cst_39 = arith.constant dense<0xFF800000> : vector<2x4xf32>
    %77 = vector.multi_reduction <maximumf>, %76, %cst_39 [2] : vector<2x4x8xf32> to vector<2x4xf32>
    %78 = vector.shape_cast %77 : vector<2x4xf32> to vector<2x4x1xf32>
    %cst_40 = arith.constant dense<0xFF800000> : vector<2x1xf32>
    %79 = vector.multi_reduction <maximumf>, %78, %cst_40 [1] : vector<2x4x1xf32> to vector<2x1xf32>
    %80 = vector.shape_cast %79 : vector<2x1xf32> to vector<2x1x1xf32>
    %81 = vector.broadcast %80 : vector<2x1x1xf32> to vector<2x4x8xf32>
    %82 = arith.subf %76, %81 : vector<2x4x8xf32>
    %83 = math.exp %82 : vector<2x4x8xf32>
    %cst_41 = arith.constant dense<0.000000e+00> : vector<2x4xf32>
    %84 = vector.multi_reduction <add>, %83, %cst_41 [2] : vector<2x4x8xf32> to vector<2x4xf32>
    %85 = vector.shape_cast %84 : vector<2x4xf32> to vector<2x4x1xf32>
    %cst_42 = arith.constant dense<0.000000e+00> : vector<2x1xf32>
    %86 = vector.multi_reduction <add>, %85, %cst_42 [1] : vector<2x4x1xf32> to vector<2x1xf32>
    %87 = vector.shape_cast %86 : vector<2x1xf32> to vector<2x1x1xf32>
    %88 = tpu.reciprocal %87 {approx = true} : vector<2x1x1xf32> -> vector<2x1x1xf32>
    %89 = vector.broadcast %88 : vector<2x1x1xf32> to vector<2x4x8xf32>
    %90 = arith.mulf %83, %89 : vector<2x4x8xf32>
    %91 = vector.extract_strided_slice %33 {offsets = [0, 32], sizes = [16, 32], strides = [1, 1]} : vector<16x192xf32> to vector<16x32xf32>
    %92 = vector.shape_cast %91 : vector<16x32xf32> to vector<2x8x32xf32>
    "tpu.trace_start"() <{level = 10 : i32, message = "blo,bom->blm"}> : () -> ()
    %cst_43 = arith.constant dense<0.000000e+00> : vector<2x4x32xf32>
    %93 = tpu.matmul %90, %92, %cst_43 {dimension_numbers = #tpu.dot_dimension_numbers<[2], [1], [1], [2], [0, 0, 0, 1, 1, 2], [0], [0]>} : vector<2x4x8xf32>, vector<2x8x32xf32>, vector<2x4x32xf32> -> vector<2x4x32xf32>
    "tpu.trace_stop"() : () -> ()
    %94 = vector.extract_strided_slice %26 {offsets = [0, 8, 0], sizes = [2, 4, 8], strides = [1, 1, 1]} : vector<2x24x8xf32> to vector<2x4x8xf32>
    %c2 = arith.constant 2 : index
    %95 = memref.load %arg4[%c2] : memref<6xf32, #tpu.memory_space<smem>>
    %96 = vector.broadcast %95 : f32 to vector<2x4x8xf32>
    %97 = arith.addf %94, %96 : vector<2x4x8xf32>
    %cst_44 = arith.constant dense<0.000000e+00> : vector<2x8xf32>
    %98 = vector.multi_reduction <add>, %97, %cst_44 [1] : vector<2x4x8xf32> to vector<2x8xf32>
    %99 = vector.shape_cast %98 : vector<2x8xf32> to vector<2x1x8xf32>
    %100 = vector.shape_cast %3 : vector<2x8xf32> to vector<2x1x8xf32>
    %cst_45 = arith.constant 0.000000e+00 : f32
    %101 = vector.broadcast %cst_45 : f32 to vector<2x1x8xf32>
    %102 = arith.cmpf oeq, %100, %101 : vector<2x1x8xf32>
    %cst_46 = arith.constant -1.000000e+30 : f32
    %103 = vector.shape_cast %102 : vector<2x1x8xi1> to vector<2x1x8xi1>
    %104 = vector.broadcast %103 : vector<2x1x8xi1> to vector<2x4x8xi1>
    %105 = vector.broadcast %cst_46 : f32 to vector<2x4x8xf32>
    %106 = arith.select %104, %105, %97 : vector<2x4x8xi1>, vector<2x4x8xf32>
    %cst_47 = arith.constant dense<0xFF800000> : vector<2x4xf32>
    %107 = vector.multi_reduction <maximumf>, %106, %cst_47 [2] : vector<2x4x8xf32> to vector<2x4xf32>
    %108 = vector.shape_cast %107 : vector<2x4xf32> to vector<2x4x1xf32>
    %cst_48 = arith.constant dense<0xFF800000> : vector<2x1xf32>
    %109 = vector.multi_reduction <maximumf>, %108, %cst_48 [1] : vector<2x4x1xf32> to vector<2x1xf32>
    %110 = vector.shape_cast %109 : vector<2x1xf32> to vector<2x1x1xf32>
    %111 = vector.broadcast %110 : vector<2x1x1xf32> to vector<2x4x8xf32>
    %112 = arith.subf %106, %111 : vector<2x4x8xf32>
    %113 = math.exp %112 : vector<2x4x8xf32>
    %cst_49 = arith.constant dense<0.000000e+00> : vector<2x4xf32>
    %114 = vector.multi_reduction <add>, %113, %cst_49 [2] : vector<2x4x8xf32> to vector<2x4xf32>
    %115 = vector.shape_cast %114 : vector<2x4xf32> to vector<2x4x1xf32>
    %cst_50 = arith.constant dense<0.000000e+00> : vector<2x1xf32>
    %116 = vector.multi_reduction <add>, %115, %cst_50 [1] : vector<2x4x1xf32> to vector<2x1xf32>
    %117 = vector.shape_cast %116 : vector<2x1xf32> to vector<2x1x1xf32>
    %118 = tpu.reciprocal %117 {approx = true} : vector<2x1x1xf32> -> vector<2x1x1xf32>
    %119 = vector.broadcast %118 : vector<2x1x1xf32> to vector<2x4x8xf32>
    %120 = arith.mulf %113, %119 : vector<2x4x8xf32>
    %121 = vector.extract_strided_slice %33 {offsets = [0, 64], sizes = [16, 32], strides = [1, 1]} : vector<16x192xf32> to vector<16x32xf32>
    %122 = vector.shape_cast %121 : vector<16x32xf32> to vector<2x8x32xf32>
    "tpu.trace_start"() <{level = 10 : i32, message = "blo,bom->blm"}> : () -> ()
    %cst_51 = arith.constant dense<0.000000e+00> : vector<2x4x32xf32>
    %123 = tpu.matmul %120, %122, %cst_51 {dimension_numbers = #tpu.dot_dimension_numbers<[2], [1], [1], [2], [0, 0, 0, 1, 1, 2], [0], [0]>} : vector<2x4x8xf32>, vector<2x8x32xf32>, vector<2x4x32xf32> -> vector<2x4x32xf32>
    "tpu.trace_stop"() : () -> ()
    %124 = vector.extract_strided_slice %26 {offsets = [0, 12, 0], sizes = [2, 4, 8], strides = [1, 1, 1]} : vector<2x24x8xf32> to vector<2x4x8xf32>
    %c3 = arith.constant 3 : index
    %125 = memref.load %arg4[%c3] : memref<6xf32, #tpu.memory_space<smem>>
    %126 = vector.broadcast %125 : f32 to vector<2x4x8xf32>
    %127 = arith.addf %124, %126 : vector<2x4x8xf32>
    %128 = vector.shape_cast %3 : vector<2x8xf32> to vector<2x1x8xf32>
    %cst_52 = arith.constant 0.000000e+00 : f32
    %129 = vector.broadcast %cst_52 : f32 to vector<2x1x8xf32>
    %130 = arith.cmpf oeq, %128, %129 : vector<2x1x8xf32>
    %cst_53 = arith.constant -1.000000e+30 : f32
    %131 = vector.shape_cast %130 : vector<2x1x8xi1> to vector<2x1x8xi1>
    %132 = vector.broadcast %131 : vector<2x1x8xi1> to vector<2x4x8xi1>
    %133 = vector.broadcast %cst_53 : f32 to vector<2x4x8xf32>
    %134 = arith.select %132, %133, %127 : vector<2x4x8xi1>, vector<2x4x8xf32>
    %cst_54 = arith.constant dense<0xFF800000> : vector<2x4xf32>
    %135 = vector.multi_reduction <maximumf>, %134, %cst_54 [2] : vector<2x4x8xf32> to vector<2x4xf32>
    %136 = vector.shape_cast %135 : vector<2x4xf32> to vector<2x4x1xf32>
    %cst_55 = arith.constant dense<0xFF800000> : vector<2x1xf32>
    %137 = vector.multi_reduction <maximumf>, %136, %cst_55 [1] : vector<2x4x1xf32> to vector<2x1xf32>
    %138 = vector.shape_cast %137 : vector<2x1xf32> to vector<2x1x1xf32>
    %139 = vector.broadcast %138 : vector<2x1x1xf32> to vector<2x4x8xf32>
    %140 = arith.subf %134, %139 : vector<2x4x8xf32>
    %141 = math.exp %140 : vector<2x4x8xf32>
    %cst_56 = arith.constant dense<0.000000e+00> : vector<2x4xf32>
    %142 = vector.multi_reduction <add>, %141, %cst_56 [2] : vector<2x4x8xf32> to vector<2x4xf32>
    %143 = vector.shape_cast %142 : vector<2x4xf32> to vector<2x4x1xf32>
    %cst_57 = arith.constant dense<0.000000e+00> : vector<2x1xf32>
    %144 = vector.multi_reduction <add>, %143, %cst_57 [1] : vector<2x4x1xf32> to vector<2x1xf32>
    %145 = vector.shape_cast %144 : vector<2x1xf32> to vector<2x1x1xf32>
    %146 = tpu.reciprocal %145 {approx = true} : vector<2x1x1xf32> -> vector<2x1x1xf32>
    %147 = vector.broadcast %146 : vector<2x1x1xf32> to vector<2x4x8xf32>
    %148 = arith.mulf %141, %147 : vector<2x4x8xf32>
    %149 = vector.extract_strided_slice %33 {offsets = [0, 96], sizes = [16, 32], strides = [1, 1]} : vector<16x192xf32> to vector<16x32xf32>
    %150 = vector.shape_cast %149 : vector<16x32xf32> to vector<2x8x32xf32>
    "tpu.trace_start"() <{level = 10 : i32, message = "blo,bom->blm"}> : () -> ()
    %cst_58 = arith.constant dense<0.000000e+00> : vector<2x4x32xf32>
    %151 = tpu.matmul %148, %150, %cst_58 {dimension_numbers = #tpu.dot_dimension_numbers<[2], [1], [1], [2], [0, 0, 0, 1, 1, 2], [0], [0]>} : vector<2x4x8xf32>, vector<2x8x32xf32>, vector<2x4x32xf32> -> vector<2x4x32xf32>
    "tpu.trace_stop"() : () -> ()
    %152 = vector.extract_strided_slice %26 {offsets = [0, 16, 0], sizes = [2, 4, 8], strides = [1, 1, 1]} : vector<2x24x8xf32> to vector<2x4x8xf32>
    %c4 = arith.constant 4 : index
    %153 = memref.load %arg4[%c4] : memref<6xf32, #tpu.memory_space<smem>>
    %154 = vector.broadcast %153 : f32 to vector<2x4x8xf32>
    %155 = arith.addf %152, %154 : vector<2x4x8xf32>
    %156 = vector.shape_cast %3 : vector<2x8xf32> to vector<2x1x8xf32>
    %cst_59 = arith.constant 0.000000e+00 : f32
    %157 = vector.broadcast %cst_59 : f32 to vector<2x1x8xf32>
    %158 = arith.cmpf oeq, %156, %157 : vector<2x1x8xf32>
    %cst_60 = arith.constant -1.000000e+30 : f32
    %159 = vector.shape_cast %158 : vector<2x1x8xi1> to vector<2x1x8xi1>
    %160 = vector.broadcast %159 : vector<2x1x8xi1> to vector<2x4x8xi1>
    %161 = vector.broadcast %cst_60 : f32 to vector<2x4x8xf32>
    %162 = arith.select %160, %161, %155 : vector<2x4x8xi1>, vector<2x4x8xf32>
    %cst_61 = arith.constant dense<0xFF800000> : vector<2x4xf32>
    %163 = vector.multi_reduction <maximumf>, %162, %cst_61 [2] : vector<2x4x8xf32> to vector<2x4xf32>
    %164 = vector.shape_cast %163 : vector<2x4xf32> to vector<2x4x1xf32>
    %cst_62 = arith.constant dense<0xFF800000> : vector<2x1xf32>
    %165 = vector.multi_reduction <maximumf>, %164, %cst_62 [1] : vector<2x4x1xf32> to vector<2x1xf32>
    %166 = vector.shape_cast %165 : vector<2x1xf32> to vector<2x1x1xf32>
    %167 = vector.broadcast %166 : vector<2x1x1xf32> to vector<2x4x8xf32>
    %168 = arith.subf %162, %167 : vector<2x4x8xf32>
    %169 = math.exp %168 : vector<2x4x8xf32>
    %cst_63 = arith.constant dense<0.000000e+00> : vector<2x4xf32>
    %170 = vector.multi_reduction <add>, %169, %cst_63 [2] : vector<2x4x8xf32> to vector<2x4xf32>
    %171 = vector.shape_cast %170 : vector<2x4xf32> to vector<2x4x1xf32>
    %cst_64 = arith.constant dense<0.000000e+00> : vector<2x1xf32>
    %172 = vector.multi_reduction <add>, %171, %cst_64 [1] : vector<2x4x1xf32> to vector<2x1xf32>
    %173 = vector.shape_cast %172 : vector<2x1xf32> to vector<2x1x1xf32>
    %174 = tpu.reciprocal %173 {approx = true} : vector<2x1x1xf32> -> vector<2x1x1xf32>
    %175 = vector.broadcast %174 : vector<2x1x1xf32> to vector<2x4x8xf32>
    %176 = arith.mulf %169, %175 : vector<2x4x8xf32>
    %177 = vector.extract_strided_slice %33 {offsets = [0, 128], sizes = [16, 32], strides = [1, 1]} : vector<16x192xf32> to vector<16x32xf32>
    %178 = vector.shape_cast %177 : vector<16x32xf32> to vector<2x8x32xf32>
    "tpu.trace_start"() <{level = 10 : i32, message = "blo,bom->blm"}> : () -> ()
    %cst_65 = arith.constant dense<0.000000e+00> : vector<2x4x32xf32>
    %179 = tpu.matmul %176, %178, %cst_65 {dimension_numbers = #tpu.dot_dimension_numbers<[2], [1], [1], [2], [0, 0, 0, 1, 1, 2], [0], [0]>} : vector<2x4x8xf32>, vector<2x8x32xf32>, vector<2x4x32xf32> -> vector<2x4x32xf32>
    "tpu.trace_stop"() : () -> ()
    %180 = vector.extract_strided_slice %26 {offsets = [0, 20, 0], sizes = [2, 4, 8], strides = [1, 1, 1]} : vector<2x24x8xf32> to vector<2x4x8xf32>
    %c5 = arith.constant 5 : index
    %181 = memref.load %arg4[%c5] : memref<6xf32, #tpu.memory_space<smem>>
    %182 = vector.broadcast %181 : f32 to vector<2x4x8xf32>
    %183 = arith.addf %180, %182 : vector<2x4x8xf32>
    %184 = vector.shape_cast %3 : vector<2x8xf32> to vector<2x1x8xf32>
    %cst_66 = arith.constant 0.000000e+00 : f32
    %185 = vector.broadcast %cst_66 : f32 to vector<2x1x8xf32>
    %186 = arith.cmpf oeq, %184, %185 : vector<2x1x8xf32>
    %cst_67 = arith.constant -1.000000e+30 : f32
    %187 = vector.shape_cast %186 : vector<2x1x8xi1> to vector<2x1x8xi1>
    %188 = vector.broadcast %187 : vector<2x1x8xi1> to vector<2x4x8xi1>
    %189 = vector.broadcast %cst_67 : f32 to vector<2x4x8xf32>
    %190 = arith.select %188, %189, %183 : vector<2x4x8xi1>, vector<2x4x8xf32>
    %cst_68 = arith.constant dense<0xFF800000> : vector<2x4xf32>
    %191 = vector.multi_reduction <maximumf>, %190, %cst_68 [2] : vector<2x4x8xf32> to vector<2x4xf32>
    %192 = vector.shape_cast %191 : vector<2x4xf32> to vector<2x4x1xf32>
    %cst_69 = arith.constant dense<0xFF800000> : vector<2x1xf32>
    %193 = vector.multi_reduction <maximumf>, %192, %cst_69 [1] : vector<2x4x1xf32> to vector<2x1xf32>
    %194 = vector.shape_cast %193 : vector<2x1xf32> to vector<2x1x1xf32>
    %195 = vector.broadcast %194 : vector<2x1x1xf32> to vector<2x4x8xf32>
    %196 = arith.subf %190, %195 : vector<2x4x8xf32>
    %197 = math.exp %196 : vector<2x4x8xf32>
    %cst_70 = arith.constant dense<0.000000e+00> : vector<2x4xf32>
    %198 = vector.multi_reduction <add>, %197, %cst_70 [2] : vector<2x4x8xf32> to vector<2x4xf32>
    %199 = vector.shape_cast %198 : vector<2x4xf32> to vector<2x4x1xf32>
    %cst_71 = arith.constant dense<0.000000e+00> : vector<2x1xf32>
    %200 = vector.multi_reduction <add>, %199, %cst_71 [1] : vector<2x4x1xf32> to vector<2x1xf32>
    %201 = vector.shape_cast %200 : vector<2x1xf32> to vector<2x1x1xf32>
    %202 = tpu.reciprocal %201 {approx = true} : vector<2x1x1xf32> -> vector<2x1x1xf32>
    %203 = vector.broadcast %202 : vector<2x1x1xf32> to vector<2x4x8xf32>
    %204 = arith.mulf %197, %203 : vector<2x4x8xf32>
    %205 = vector.extract_strided_slice %33 {offsets = [0, 160], sizes = [16, 32], strides = [1, 1]} : vector<16x192xf32> to vector<16x32xf32>
    %206 = vector.shape_cast %205 : vector<16x32xf32> to vector<2x8x32xf32>
    "tpu.trace_start"() <{level = 10 : i32, message = "blo,bom->blm"}> : () -> ()
    %cst_72 = arith.constant dense<0.000000e+00> : vector<2x4x32xf32>
    %207 = tpu.matmul %204, %206, %cst_72 {dimension_numbers = #tpu.dot_dimension_numbers<[2], [1], [1], [2], [0, 0, 0, 1, 1, 2], [0], [0]>} : vector<2x4x8xf32>, vector<2x8x32xf32>, vector<2x4x32xf32> -> vector<2x4x32xf32>
    "tpu.trace_stop"() : () -> ()
    %208 = tpu.concatenate %39, %69, %99 in 1 : vector<2x1x8xf32>, vector<2x1x8xf32>, vector<2x1x8xf32> -> vector<2x3x8xf32>
    %c0_73 = arith.constant 0 : index
    %c0_74 = arith.constant 0 : index
    %c0_75 = arith.constant 0 : index
    %209 = vector.load %arg21[%c0_73, %c0_74, %c0_75] : memref<2x3x8xf32, #tpu.memory_space<vmem>>, vector<2x3x8xf32>
    tpu.vector_store %arg21[%c0_73, %c0_74, %c0_75], %208 {strides = array<i32>} : memref<2x3x8xf32, #tpu.memory_space<vmem>>, vector<2x3x8xf32>,
    %210 = vector.shape_cast %2 : vector<2x4x32xf32> to vector<8x32xf32>
    %c0_76 = arith.constant 0 : index
    %c0_77 = arith.constant 0 : index
    %c0_78 = arith.constant 0 : index
    %211 = vector.load %arg12[%c0_76, %c0_77, %c0_78] : memref<6x32x32xf32, #tpu.memory_space<vmem>>, vector<1x32x32xf32>
    %212 = vector.shape_cast %211 : vector<1x32x32xf32> to vector<32x32xf32>
    %cst_79 = arith.constant dense<0.000000e+00> : vector<8x32xf32>
    %213 = tpu.matmul %210, %212, %cst_79 {dimension_numbers = #tpu.dot_dimension_numbers<[1], [0], [0], [1], [0, 0, 1, 1], [], []>} : vector<8x32xf32>, vector<32x32xf32>, vector<8x32xf32> -> vector<8x32xf32>
    %c0_80 = arith.constant 0 : index
    %c0_81 = arith.constant 0 : index
    %214 = vector.load %arg13[%c0_80, %c0_81] : memref<6x32xf32, #tpu.memory_space<vmem>>, vector<1x32xf32>
    %215 = vector.broadcast %214 : vector<1x32xf32> to vector<8x32xf32>
    %216 = arith.addf %213, %215 : vector<8x32xf32>
    %cst_82 = arith.constant 0.000000e+00 : f32
    %217 = vector.broadcast %cst_82 : f32 to vector<8x32xf32>
    %218 = arith.maximumf %216, %217 : vector<8x32xf32>
    %219 = vector.shape_cast %218 : vector<8x32xf32> to vector<2x4x32xf32>
    %220 = arith.mulf %63, %219 : vector<2x4x32xf32>
    %cst_83 = arith.constant dense<0.000000e+00> : vector<2x32xf32>
    %221 = vector.multi_reduction <add>, %220, %cst_83 [1] : vector<2x4x32xf32> to vector<2x32xf32>
    %c0_84 = arith.constant 0 : index
    %c0_85 = arith.constant 0 : index
    %c0_86 = arith.constant 0 : index
    %222 = vector.load %arg14[%c0_84, %c0_85, %c0_86] : memref<6x32x32xf32, #tpu.memory_space<vmem>>, vector<1x32x32xf32>
    %223 = vector.shape_cast %222 : vector<1x32x32xf32> to vector<32x32xf32>
    %cst_87 = arith.constant dense<0.000000e+00> : vector<2x32xf32>
    %224 = tpu.matmul %221, %223, %cst_87 {dimension_numbers = #tpu.dot_dimension_numbers<[1], [0], [0], [1], [0, 0, 1, 1], [], []>} : vector<2x32xf32>, vector<32x32xf32>, vector<2x32xf32> -> vector<2x32xf32>
    %c0_88 = arith.constant 0 : index
    %c0_89 = arith.constant 0 : index
    %225 = vector.load %arg15[%c0_88, %c0_89] : memref<6x32xf32, #tpu.memory_space<vmem>>, vector<1x32xf32>
    %226 = vector.broadcast %225 : vector<1x32xf32> to vector<2x32xf32>
    %227 = arith.addf %224, %226 : vector<2x32xf32>
    %228 = vector.shape_cast %227 : vector<2x32xf32> to vector<2x1x32xf32>
    %229 = vector.broadcast %228 : vector<2x1x32xf32> to vector<2x4x32xf32>
    %230 = arith.addf %2, %229 : vector<2x4x32xf32>
    %231 = vector.shape_cast %230 : vector<2x4x32xf32> to vector<8x32xf32>
    %c1_90 = arith.constant 1 : index
    %c0_91 = arith.constant 0 : index
    %c0_92 = arith.constant 0 : index
    %232 = vector.load %arg12[%c1_90, %c0_91, %c0_92] : memref<6x32x32xf32, #tpu.memory_space<vmem>>, vector<1x32x32xf32>
    %233 = vector.shape_cast %232 : vector<1x32x32xf32> to vector<32x32xf32>
    %cst_93 = arith.constant dense<0.000000e+00> : vector<8x32xf32>
    %234 = tpu.matmul %231, %233, %cst_93 {dimension_numbers = #tpu.dot_dimension_numbers<[1], [0], [0], [1], [0, 0, 1, 1], [], []>} : vector<8x32xf32>, vector<32x32xf32>, vector<8x32xf32> -> vector<8x32xf32>
    %c1_94 = arith.constant 1 : index
    %c0_95 = arith.constant 0 : index
    %235 = vector.load %arg13[%c1_94, %c0_95] : memref<6x32xf32, #tpu.memory_space<vmem>>, vector<1x32xf32>
    %236 = vector.broadcast %235 : vector<1x32xf32> to vector<8x32xf32>
    %237 = arith.addf %234, %236 : vector<8x32xf32>
    %cst_96 = arith.constant 0.000000e+00 : f32
    %238 = vector.broadcast %cst_96 : f32 to vector<8x32xf32>
    %239 = arith.maximumf %237, %238 : vector<8x32xf32>
    %240 = vector.shape_cast %239 : vector<8x32xf32> to vector<2x4x32xf32>
    %241 = arith.mulf %93, %240 : vector<2x4x32xf32>
    %cst_97 = arith.constant dense<0.000000e+00> : vector<2x32xf32>
    %242 = vector.multi_reduction <add>, %241, %cst_97 [1] : vector<2x4x32xf32> to vector<2x32xf32>
    %c1_98 = arith.constant 1 : index
    %c0_99 = arith.constant 0 : index
    %c0_100 = arith.constant 0 : index
    %243 = vector.load %arg14[%c1_98, %c0_99, %c0_100] : memref<6x32x32xf32, #tpu.memory_space<vmem>>, vector<1x32x32xf32>
    %244 = vector.shape_cast %243 : vector<1x32x32xf32> to vector<32x32xf32>
    %cst_101 = arith.constant dense<0.000000e+00> : vector<2x32xf32>
    %245 = tpu.matmul %242, %244, %cst_101 {dimension_numbers = #tpu.dot_dimension_numbers<[1], [0], [0], [1], [0, 0, 1, 1], [], []>} : vector<2x32xf32>, vector<32x32xf32>, vector<2x32xf32> -> vector<2x32xf32>
    %c1_102 = arith.constant 1 : index
    %c0_103 = arith.constant 0 : index
    %246 = vector.load %arg15[%c1_102, %c0_103] : memref<6x32xf32, #tpu.memory_space<vmem>>, vector<1x32xf32>
    %247 = vector.broadcast %246 : vector<1x32xf32> to vector<2x32xf32>
    %248 = arith.addf %245, %247 : vector<2x32xf32>
    %249 = vector.shape_cast %248 : vector<2x32xf32> to vector<2x1x32xf32>
    %250 = vector.broadcast %249 : vector<2x1x32xf32> to vector<2x4x32xf32>
    %251 = arith.addf %230, %250 : vector<2x4x32xf32>
    %252 = vector.shape_cast %251 : vector<2x4x32xf32> to vector<8x32xf32>
    %c2_104 = arith.constant 2 : index
    %c0_105 = arith.constant 0 : index
    %c0_106 = arith.constant 0 : index
    %253 = vector.load %arg12[%c2_104, %c0_105, %c0_106] : memref<6x32x32xf32, #tpu.memory_space<vmem>>, vector<1x32x32xf32>
    %254 = vector.shape_cast %253 : vector<1x32x32xf32> to vector<32x32xf32>
    %cst_107 = arith.constant dense<0.000000e+00> : vector<8x32xf32>
    %255 = tpu.matmul %252, %254, %cst_107 {dimension_numbers = #tpu.dot_dimension_numbers<[1], [0], [0], [1], [0, 0, 1, 1], [], []>} : vector<8x32xf32>, vector<32x32xf32>, vector<8x32xf32> -> vector<8x32xf32>
    %c2_108 = arith.constant 2 : index
    %c0_109 = arith.constant 0 : index
    %256 = vector.load %arg13[%c2_108, %c0_109] : memref<6x32xf32, #tpu.memory_space<vmem>>, vector<1x32xf32>
    %257 = vector.broadcast %256 : vector<1x32xf32> to vector<8x32xf32>
    %258 = arith.addf %255, %257 : vector<8x32xf32>
    %cst_110 = arith.constant 0.000000e+00 : f32
    %259 = vector.broadcast %cst_110 : f32 to vector<8x32xf32>
    %260 = arith.maximumf %258, %259 : vector<8x32xf32>
    %261 = vector.shape_cast %260 : vector<8x32xf32> to vector<2x4x32xf32>
    %262 = arith.mulf %123, %261 : vector<2x4x32xf32>
    %cst_111 = arith.constant dense<0.000000e+00> : vector<2x32xf32>
    %263 = vector.multi_reduction <add>, %262, %cst_111 [1] : vector<2x4x32xf32> to vector<2x32xf32>
    %c2_112 = arith.constant 2 : index
    %c0_113 = arith.constant 0 : index
    %c0_114 = arith.constant 0 : index
    %264 = vector.load %arg14[%c2_112, %c0_113, %c0_114] : memref<6x32x32xf32, #tpu.memory_space<vmem>>, vector<1x32x32xf32>
    %265 = vector.shape_cast %264 : vector<1x32x32xf32> to vector<32x32xf32>
    %cst_115 = arith.constant dense<0.000000e+00> : vector<2x32xf32>
    %266 = tpu.matmul %263, %265, %cst_115 {dimension_numbers = #tpu.dot_dimension_numbers<[1], [0], [0], [1], [0, 0, 1, 1], [], []>} : vector<2x32xf32>, vector<32x32xf32>, vector<2x32xf32> -> vector<2x32xf32>
    %c2_116 = arith.constant 2 : index
    %c0_117 = arith.constant 0 : index
    %267 = vector.load %arg15[%c2_116, %c0_117] : memref<6x32xf32, #tpu.memory_space<vmem>>, vector<1x32xf32>
    %268 = vector.broadcast %267 : vector<1x32xf32> to vector<2x32xf32>
    %269 = arith.addf %266, %268 : vector<2x32xf32>
    %270 = vector.shape_cast %269 : vector<2x32xf32> to vector<2x1x32xf32>
    %271 = vector.broadcast %270 : vector<2x1x32xf32> to vector<2x4x32xf32>
    %272 = arith.addf %251, %271 : vector<2x4x32xf32>
    %273 = vector.shape_cast %272 : vector<2x4x32xf32> to vector<8x32xf32>
    %c3_118 = arith.constant 3 : index
    %c0_119 = arith.constant 0 : index
    %c0_120 = arith.constant 0 : index
    %274 = vector.load %arg12[%c3_118, %c0_119, %c0_120] : memref<6x32x32xf32, #tpu.memory_space<vmem>>, vector<1x32x32xf32>
    %275 = vector.shape_cast %274 : vector<1x32x32xf32> to vector<32x32xf32>
    %cst_121 = arith.constant dense<0.000000e+00> : vector<8x32xf32>
    %276 = tpu.matmul %273, %275, %cst_121 {dimension_numbers = #tpu.dot_dimension_numbers<[1], [0], [0], [1], [0, 0, 1, 1], [], []>} : vector<8x32xf32>, vector<32x32xf32>, vector<8x32xf32> -> vector<8x32xf32>
    %c3_122 = arith.constant 3 : index
    %c0_123 = arith.constant 0 : index
    %277 = vector.load %arg13[%c3_122, %c0_123] : memref<6x32xf32, #tpu.memory_space<vmem>>, vector<1x32xf32>
    %278 = vector.broadcast %277 : vector<1x32xf32> to vector<8x32xf32>
    %279 = arith.addf %276, %278 : vector<8x32xf32>
    %cst_124 = arith.constant 0.000000e+00 : f32
    %280 = vector.broadcast %cst_124 : f32 to vector<8x32xf32>
    %281 = arith.maximumf %279, %280 : vector<8x32xf32>
    %282 = vector.shape_cast %281 : vector<8x32xf32> to vector<2x4x32xf32>
    %283 = arith.mulf %151, %282 : vector<2x4x32xf32>
    %cst_125 = arith.constant dense<0.000000e+00> : vector<2x32xf32>
    %284 = vector.multi_reduction <add>, %283, %cst_125 [1] : vector<2x4x32xf32> to vector<2x32xf32>
    %c3_126 = arith.constant 3 : index
    %c0_127 = arith.constant 0 : index
    %c0_128 = arith.constant 0 : index
    %285 = vector.load %arg14[%c3_126, %c0_127, %c0_128] : memref<6x32x32xf32, #tpu.memory_space<vmem>>, vector<1x32x32xf32>
    %286 = vector.shape_cast %285 : vector<1x32x32xf32> to vector<32x32xf32>
    %cst_129 = arith.constant dense<0.000000e+00> : vector<2x32xf32>
    %287 = tpu.matmul %284, %286, %cst_129 {dimension_numbers = #tpu.dot_dimension_numbers<[1], [0], [0], [1], [0, 0, 1, 1], [], []>} : vector<2x32xf32>, vector<32x32xf32>, vector<2x32xf32> -> vector<2x32xf32>
    %c3_130 = arith.constant 3 : index
    %c0_131 = arith.constant 0 : index
    %288 = vector.load %arg15[%c3_130, %c0_131] : memref<6x32xf32, #tpu.memory_space<vmem>>, vector<1x32xf32>
    %289 = vector.broadcast %288 : vector<1x32xf32> to vector<2x32xf32>
    %290 = arith.addf %287, %289 : vector<2x32xf32>
    %291 = vector.shape_cast %290 : vector<2x32xf32> to vector<2x1x32xf32>
    %292 = vector.broadcast %291 : vector<2x1x32xf32> to vector<2x4x32xf32>
    %293 = arith.addf %272, %292 : vector<2x4x32xf32>
    %294 = vector.shape_cast %293 : vector<2x4x32xf32> to vector<8x32xf32>
    %c4_132 = arith.constant 4 : index
    %c0_133 = arith.constant 0 : index
    %c0_134 = arith.constant 0 : index
    %295 = vector.load %arg12[%c4_132, %c0_133, %c0_134] : memref<6x32x32xf32, #tpu.memory_space<vmem>>, vector<1x32x32xf32>
    %296 = vector.shape_cast %295 : vector<1x32x32xf32> to vector<32x32xf32>
    %cst_135 = arith.constant dense<0.000000e+00> : vector<8x32xf32>
    %297 = tpu.matmul %294, %296, %cst_135 {dimension_numbers = #tpu.dot_dimension_numbers<[1], [0], [0], [1], [0, 0, 1, 1], [], []>} : vector<8x32xf32>, vector<32x32xf32>, vector<8x32xf32> -> vector<8x32xf32>
    %c4_136 = arith.constant 4 : index
    %c0_137 = arith.constant 0 : index
    %298 = vector.load %arg13[%c4_136, %c0_137] : memref<6x32xf32, #tpu.memory_space<vmem>>, vector<1x32xf32>
    %299 = vector.broadcast %298 : vector<1x32xf32> to vector<8x32xf32>
    %300 = arith.addf %297, %299 : vector<8x32xf32>
    %cst_138 = arith.constant 0.000000e+00 : f32
    %301 = vector.broadcast %cst_138 : f32 to vector<8x32xf32>
    %302 = arith.maximumf %300, %301 : vector<8x32xf32>
    %303 = vector.shape_cast %302 : vector<8x32xf32> to vector<2x4x32xf32>
    %304 = arith.mulf %179, %303 : vector<2x4x32xf32>
    %cst_139 = arith.constant dense<0.000000e+00> : vector<2x32xf32>
    %305 = vector.multi_reduction <add>, %304, %cst_139 [1] : vector<2x4x32xf32> to vector<2x32xf32>
    %c4_140 = arith.constant 4 : index
    %c0_141 = arith.constant 0 : index
    %c0_142 = arith.constant 0 : index
    %306 = vector.load %arg14[%c4_140, %c0_141, %c0_142] : memref<6x32x32xf32, #tpu.memory_space<vmem>>, vector<1x32x32xf32>
    %307 = vector.shape_cast %306 : vector<1x32x32xf32> to vector<32x32xf32>
    %cst_143 = arith.constant dense<0.000000e+00> : vector<2x32xf32>
    %308 = tpu.matmul %305, %307, %cst_143 {dimension_numbers = #tpu.dot_dimension_numbers<[1], [0], [0], [1], [0, 0, 1, 1], [], []>} : vector<2x32xf32>, vector<32x32xf32>, vector<2x32xf32> -> vector<2x32xf32>
    %c4_144 = arith.constant 4 : index
    %c0_145 = arith.constant 0 : index
    %309 = vector.load %arg15[%c4_144, %c0_145] : memref<6x32xf32, #tpu.memory_space<vmem>>, vector<1x32xf32>
    %310 = vector.broadcast %309 : vector<1x32xf32> to vector<2x32xf32>
    %311 = arith.addf %308, %310 : vector<2x32xf32>
    %312 = vector.shape_cast %311 : vector<2x32xf32> to vector<2x1x32xf32>
    %313 = vector.broadcast %312 : vector<2x1x32xf32> to vector<2x4x32xf32>
    %314 = arith.addf %293, %313 : vector<2x4x32xf32>
    %315 = vector.shape_cast %314 : vector<2x4x32xf32> to vector<8x32xf32>
    %c5_146 = arith.constant 5 : index
    %c0_147 = arith.constant 0 : index
    %c0_148 = arith.constant 0 : index
    %316 = vector.load %arg12[%c5_146, %c0_147, %c0_148] : memref<6x32x32xf32, #tpu.memory_space<vmem>>, vector<1x32x32xf32>
    %317 = vector.shape_cast %316 : vector<1x32x32xf32> to vector<32x32xf32>
    %cst_149 = arith.constant dense<0.000000e+00> : vector<8x32xf32>
    %318 = tpu.matmul %315, %317, %cst_149 {dimension_numbers = #tpu.dot_dimension_numbers<[1], [0], [0], [1], [0, 0, 1, 1], [], []>} : vector<8x32xf32>, vector<32x32xf32>, vector<8x32xf32> -> vector<8x32xf32>
    %c5_150 = arith.constant 5 : index
    %c0_151 = arith.constant 0 : index
    %319 = vector.load %arg13[%c5_150, %c0_151] : memref<6x32xf32, #tpu.memory_space<vmem>>, vector<1x32xf32>
    %320 = vector.broadcast %319 : vector<1x32xf32> to vector<8x32xf32>
    %321 = arith.addf %318, %320 : vector<8x32xf32>
    %cst_152 = arith.constant 0.000000e+00 : f32
    %322 = vector.broadcast %cst_152 : f32 to vector<8x32xf32>
    %323 = arith.maximumf %321, %322 : vector<8x32xf32>
    %324 = vector.shape_cast %323 : vector<8x32xf32> to vector<2x4x32xf32>
    %325 = arith.mulf %207, %324 : vector<2x4x32xf32>
    %cst_153 = arith.constant dense<0.000000e+00> : vector<2x32xf32>
    %326 = vector.multi_reduction <add>, %325, %cst_153 [1] : vector<2x4x32xf32> to vector<2x32xf32>
    %c5_154 = arith.constant 5 : index
    %c0_155 = arith.constant 0 : index
    %c0_156 = arith.constant 0 : index
    %327 = vector.load %arg14[%c5_154, %c0_155, %c0_156] : memref<6x32x32xf32, #tpu.memory_space<vmem>>, vector<1x32x32xf32>
    %328 = vector.shape_cast %327 : vector<1x32x32xf32> to vector<32x32xf32>
    %cst_157 = arith.constant dense<0.000000e+00> : vector<2x32xf32>
    %329 = tpu.matmul %326, %328, %cst_157 {dimension_numbers = #tpu.dot_dimension_numbers<[1], [0], [0], [1], [0, 0, 1, 1], [], []>} : vector<2x32xf32>, vector<32x32xf32>, vector<2x32xf32> -> vector<2x32xf32>
    %c5_158 = arith.constant 5 : index
    %c0_159 = arith.constant 0 : index
    %330 = vector.load %arg15[%c5_158, %c0_159] : memref<6x32xf32, #tpu.memory_space<vmem>>, vector<1x32xf32>
    %331 = vector.broadcast %330 : vector<1x32xf32> to vector<2x32xf32>
    %332 = arith.addf %329, %331 : vector<2x32xf32>
    %333 = vector.shape_cast %332 : vector<2x32xf32> to vector<2x1x32xf32>
    %334 = vector.broadcast %333 : vector<2x1x32xf32> to vector<2x4x32xf32>
    %335 = arith.addf %314, %334 : vector<2x4x32xf32>
    %cst_160 = arith.constant dense<0.000000e+00> : vector<2x32xf32>
    %336 = vector.multi_reduction <add>, %335, %cst_160 [1] : vector<2x4x32xf32> to vector<2x32xf32>
    %c0_161 = arith.constant 0 : index
    %c0_162 = arith.constant 0 : index
    %337 = vector.load %arg16[%c0_161, %c0_162] : memref<32x64xf32, #tpu.memory_space<vmem>>, vector<32x64xf32>
    %cst_163 = arith.constant dense<0.000000e+00> : vector<2x64xf32>
    %338 = tpu.matmul %336, %337, %cst_163 {dimension_numbers = #tpu.dot_dimension_numbers<[1], [0], [0], [1], [0, 0, 1, 1], [], []>} : vector<2x32xf32>, vector<32x64xf32>, vector<2x64xf32> -> vector<2x64xf32>
    %c0_164 = arith.constant 0 : index
    %c0_165 = arith.constant 0 : index
    %339 = vector.load %arg17[%c0_164, %c0_165] : memref<1x64xf32, #tpu.memory_space<vmem>>, vector<1x64xf32>
    %340 = vector.broadcast %339 : vector<1x64xf32> to vector<2x64xf32>
    %341 = arith.addf %338, %340 : vector<2x64xf32>
    %cst_166 = arith.constant 0.000000e+00 : f32
    %342 = vector.broadcast %cst_166 : f32 to vector<2x64xf32>
    %343 = arith.maximumf %341, %342 : vector<2x64xf32>
    %c0_167 = arith.constant 0 : index
    %c0_168 = arith.constant 0 : index
    %344 = vector.load %arg18[%c0_167, %c0_168] : memref<64x128xf32, #tpu.memory_space<vmem>>, vector<64x128xf32>
    %cst_169 = arith.constant dense<0.000000e+00> : vector<2x128xf32>
    %345 = tpu.matmul %343, %344, %cst_169 {dimension_numbers = #tpu.dot_dimension_numbers<[1], [0], [0], [1], [0, 0, 1, 1], [], []>} : vector<2x64xf32>, vector<64x128xf32>, vector<2x128xf32> -> vector<2x128xf32>
    %c0_170 = arith.constant 0 : index
    %c0_171 = arith.constant 0 : index
    %346 = vector.load %arg19[%c0_170, %c0_171] : memref<1x128xf32, #tpu.memory_space<vmem>>, vector<1x128xf32>
    %347 = vector.broadcast %346 : vector<1x128xf32> to vector<2x128xf32>
    %348 = arith.addf %345, %347 : vector<2x128xf32>
    %c0_172 = arith.constant 0 : index
    %c0_173 = arith.constant 0 : index
    %349 = vector.load %arg20[%c0_172, %c0_173] : memref<2x128xf32, #tpu.memory_space<vmem>>, vector<2x128xf32>
    tpu.vector_store %arg20[%c0_172, %c0_173], %348 {strides = array<i32>} : memref<2x128xf32, #tpu.memory_space<vmem>>, vector<2x128xf32>,
    return
  }
  func.func @transform_0(%arg0: i32) -> (i32, i32, i32) {
    %c0_i32 = arith.constant 0 : i32
    %c0_i32_0 = arith.constant 0 : i32
    %c0_i32_1 = arith.constant 0 : i32
    %c0_i32_2 = arith.constant 0 : i32
    return %c0_i32, %c0_i32_0, %c0_i32_1 : i32, i32, i32
  }
  func.func @transform_1(%arg0: i32) -> (i32, i32, i32) {
    %c0_i32 = arith.constant 0 : i32
    %c0_i32_0 = arith.constant 0 : i32
    %c0_i32_1 = arith.constant 0 : i32
    %c0_i32_2 = arith.constant 0 : i32
    return %c0_i32, %c0_i32_0, %c0_i32_1 : i32, i32, i32
  }
  func.func @transform_2(%arg0: i32) -> (i32, i32) {
    %c0_i32 = arith.constant 0 : i32
    %c0_i32_0 = arith.constant 0 : i32
    %c0_i32_1 = arith.constant 0 : i32
    return %c0_i32, %c0_i32_0 : i32, i32
  }
  func.func @transform_3(%arg0: i32) -> i32 {
    %c0_i32 = arith.constant 0 : i32
    %c0_i32_0 = arith.constant 0 : i32
    return %c0_i32 : i32
  }
  func.func @transform_4(%arg0: i32) -> (i32, i32) {
    %c0_i32 = arith.constant 0 : i32
    %c0_i32_0 = arith.constant 0 : i32
    %c0_i32_1 = arith.constant 0 : i32
    return %c0_i32, %c0_i32_0 : i32, i32
  }
  func.func @transform_5(%arg0: i32) -> (i32, i32) {
    %c0_i32 = arith.constant 0 : i32
    %c0_i32_0 = arith.constant 0 : i32
    %c0_i32_1 = arith.constant 0 : i32
    return %c0_i32, %c0_i32_0 : i32, i32
  }
  func.func @transform_6(%arg0: i32) -> (i32, i32) {
    %c0_i32 = arith.constant 0 : i32
    %c0_i32_0 = arith.constant 0 : i32
    %c0_i32_1 = arith.constant 0 : i32
    return %c0_i32, %c0_i32_0 : i32, i32
  }
  func.func @transform_7(%arg0: i32) -> (i32, i32) {
    %c0_i32 = arith.constant 0 : i32
    %c0_i32_0 = arith.constant 0 : i32
    %c0_i32_1 = arith.constant 0 : i32
    return %c0_i32, %c0_i32_0 : i32, i32
  }
  func.func @transform_8(%arg0: i32) -> (i32, i32) {
    %c0_i32 = arith.constant 0 : i32
    %c0_i32_0 = arith.constant 0 : i32
    %c0_i32_1 = arith.constant 0 : i32
    return %c0_i32, %c0_i32_0 : i32, i32
  }
  func.func @transform_9(%arg0: i32) -> (i32, i32) {
    %c0_i32 = arith.constant 0 : i32
    %c0_i32_0 = arith.constant 0 : i32
    %c0_i32_1 = arith.constant 0 : i32
    return %c0_i32, %c0_i32_0 : i32, i32
  }
  func.func @transform_10(%arg0: i32) -> (i32, i32) {
    %c0_i32 = arith.constant 0 : i32
    %c0_i32_0 = arith.constant 0 : i32
    %c0_i32_1 = arith.constant 0 : i32
    return %c0_i32, %c0_i32_0 : i32, i32
  }
  func.func @transform_11(%arg0: i32) -> (i32, i32, i32) {
    %c0_i32 = arith.constant 0 : i32
    %c0_i32_0 = arith.constant 0 : i32
    %c0_i32_1 = arith.constant 0 : i32
    %c0_i32_2 = arith.constant 0 : i32
    return %c0_i32, %c0_i32_0, %c0_i32_1 : i32, i32, i32
  }
  func.func @transform_12(%arg0: i32) -> (i32, i32) {
    %c0_i32 = arith.constant 0 : i32
    %c0_i32_0 = arith.constant 0 : i32
    %c0_i32_1 = arith.constant 0 : i32
    return %c0_i32, %c0_i32_0 : i32, i32
  }
  func.func @transform_13(%arg0: i32) -> (i32, i32, i32) {
    %c0_i32 = arith.constant 0 : i32
    %c0_i32_0 = arith.constant 0 : i32
    %c0_i32_1 = arith.constant 0 : i32
    %c0_i32_2 = arith.constant 0 : i32
    return %c0_i32, %c0_i32_0, %c0_i32_1 : i32, i32, i32
  }
  func.func @transform_14(%arg0: i32) -> (i32, i32) {
    %c0_i32 = arith.constant 0 : i32
    %c0_i32_0 = arith.constant 0 : i32
    %c0_i32_1 = arith.constant 0 : i32
    return %c0_i32, %c0_i32_0 : i32, i32
  }
  func.func @transform_15(%arg0: i32) -> (i32, i32) {
    %c0_i32 = arith.constant 0 : i32
    %c0_i32_0 = arith.constant 0 : i32
    %c0_i32_1 = arith.constant 0 : i32
    return %c0_i32, %c0_i32_0 : i32, i32
  }
  func.func @transform_16(%arg0: i32) -> (i32, i32) {
    %c0_i32 = arith.constant 0 : i32
    %c0_i32_0 = arith.constant 0 : i32
    %c0_i32_1 = arith.constant 0 : i32
    return %c0_i32, %c0_i32_0 : i32, i32
  }
  func.func @transform_17(%arg0: i32) -> (i32, i32) {
    %c0_i32 = arith.constant 0 : i32
    %c0_i32_0 = arith.constant 0 : i32
    %c0_i32_1 = arith.constant 0 : i32
    return %c0_i32, %c0_i32_0 : i32, i32
  }
  func.func @transform_18(%arg0: i32) -> (i32, i32) {
    %c0_i32 = arith.constant 0 : i32
    %c0_i32_0 = arith.constant 0 : i32
    %c0_i32_1 = arith.constant 0 : i32
    return %c0_i32, %c0_i32_0 : i32, i32
  }
  func.func @transform_19(%arg0: i32) -> (i32, i32) {
    %c0_i32 = arith.constant 0 : i32
    %c0_i32_0 = arith.constant 0 : i32
    %c0_i32_1 = arith.constant 0 : i32
    return %c0_i32, %c0_i32_0 : i32, i32
  }
  func.func @transform_20(%arg0: i32) -> (i32, i32, i32) {
    %c0_i32 = arith.constant 0 : i32
    %c0_i32_0 = arith.constant 0 : i32
    %c0_i32_1 = arith.constant 0 : i32
    %c0_i32_2 = arith.constant 0 : i32
    return %c0_i32, %c0_i32_0, %c0_i32_1 : i32, i32, i32
  }
}

</mosaic_0001>

<bundles_post_ra>
// kernel: net_forward.2
= control target key start
LH: loop header
LB: loop body
LE: loop exit
PB: predicated region body
PF: predicated region fallthrough
CT: control target
= control target key end

     0   :  { %10 = vsyncpa [#allocation3], 0  ;;  %s2034_s0 = inlined_call_operand.vmem [shape: f32[8,2,192], index: 0, kind: input, shape index: {}]   ;;  %s2035_s1 = inlined_call_operand.vmem [shape: f32[32,64], index: 1, kind: input, shape index: {}]   ;;  %s2036_s2 = inlined_call_operand.vmem [shape: f32[32,32], index: 2, kind: input, shape index: {}]   ;;  %s2037_s3 = inlined_call_operand.hbm [shape: f32[32,64], index: 3, kind: input, shape index: {}]   ;;  %s2038_s4 = inlined_call_operand.hbm [shape: f32[32,32], index: 4, kind: input, shape index: {}]   ;;  %s2039_s5 = inlined_call_operand.vmem [shape: f32[8,2,32], index: 5, kind: output, shape index: {}]  }
   0x1   :  { %s22_s20 = sshll.u32 %s2037_s3, 4  ;;  %s23_s20 = int_to_ptr.hbm [resolvable:$true] %s22_s20 }
   0x2   :  { %11 = vsyncpa [#allocation5], 0  ;;  %s1509_s21 = smov [#allocation2]   ;;  %s35_s25 = sshll.u32 %s2038_s4, 4  ;;  %s36_s25 = int_to_ptr.hbm [resolvable:$true] %s35_s25 }
   0x3   :  { %s24_s22 = sshll.u32 %s1509_s21, 4  ;;  %s1510_s26 = smov 128   ;;  %s25_s22 = int_to_ptr.vmem [resolvable:$true] %s24_s22 }
   0x4   :  { %s1511_s27 = smov 8   ;;  %s1512_s28 = smov [#allocation4]  }
   0x5   :  { %30 = dma.hbm_to_vmem [thread:$0]  %s23_s20, 512, %s25_s22, [#allocation3], %s1510_s26, %s1510_s26, %s1511_s27  }
   0x6   :  { %s37_s29 = sshll.u32 %s1512_s28, 4  ;;  %s38_s29 = int_to_ptr.vmem [resolvable:$true] %s37_s29 }
   0x7   :  { %43 = dma.hbm_to_vmem [thread:$0]  %s36_s25, 512, %s38_s29, [#allocation5], %s1510_s26, %s1510_s26, %s1511_s27  }
   0x8   :  { %1505 = dma.done.wait [#allocation3], 512  }
   0x9   :  { %1506 = vsyncadd [#allocation3], 4294966784 }
   0xa   :  { %1507 = dma.done.wait [#allocation5], 512  }
   0xb   :  { %1508 = vsyncadd [#allocation5], 4294966784  ;;  %v1556_v0 = vld [vmem:[%s2035_s1 + $0x18] sm:$0xff]  ;;  %v1561_v1 = vld [vmem:[%s2035_s1 + $0x10] sm:$0xff]  ;;  %v1513_v8 = vmov 0.0   ;;  %vm57_vm0 = vcmask 261120  }
   0xc   :  { %73 = vmatpush.msra.mxu0 %v1556_v0  ;;  %v1564_v2 = vld [vmem:[#allocation2 + $0x18] sm:$0xff]  ;;  %v1566_v3 = vld [vmem:[#allocation2 + $0x10] sm:$0xff]  ;;  %v1571_v4 = vld [vmem:[%s2035_s1 + $0x8] sm:$0xff]  ;;  %vm161_vm1 = vcmask 785408   ;;  %s1515_s22 = smov 64   ;;  %s1516_s23 = smov 32  }
   0xd   :  { %149 = vmatpush.msra.mxu2 %v1564_v2  ;;  %v1575_v5 = vld [vmem:[#allocation2 + $0x8] sm:$0xff]  ;;  %v1580_v6 = vld [vmem:[%s2035_s1] sm:$0xff]  ;;  %v1584_v7 = vld [vmem:[#allocation2] sm:$0xff]  ;;  %vm1331_vm2 = vcmask 254976  }
   0xe   :  { %74 = vmatpush.msra.mxu0 %v1561_v1  ;;  %v1608_v9 = vld [vmem:[%s2034_s0] sm:$0xf]  ;;  %v1614_v12 = vld [vmem:[%s2036_s2 + $0x18] sm:$0xff]  ;;  %v1619_v13 = vld [vmem:[%s2036_s2 + $0x10] sm:$0xff] }
   0xf   :  { %150 = vmatpush.msra.mxu2 %v1566_v3  ;;  %110 = vmatpush.msra.mxu1 %v1614_v12  ;;  %v1625_v15 = vld [vmem:[%s2036_s2 + $0x8] sm:$0xff]  ;;  %v1631_v16 = vld [vmem:[%s2036_s2] sm:$0xff]  ;;  %s1514_s2 = smov 96   ;;  %v1347_v23 = vld [vmem:[%s2034_s0 + $0x1c] sm:$0xf] }
  0x10   :  { %75 = vmatpush.msra.mxu0 %v1571_v4  ;;  %201 = vrot.lane.b32.xlu2 %v1347_v23, %s1514_s2  ;;  %v1651_v24 = vld [vmem:[#allocation4 + $0x18] sm:$0xff]  ;;  %v1654_v25 = vld [vmem:[#allocation4 + $0x10] sm:$0xff]  ;;  %v1656_v26 = vld [vmem:[#allocation4 + $0x8] sm:$0xff] }
  0x11   :  { %151 = vmatpush.msra.mxu2 %v1575_v5  ;;  %111 = vmatpush.msra.mxu1 %v1619_v13  ;;  %v1659_v27 = vld [vmem:[#allocation4] sm:$0xff]  ;;  %v1697_v52 = vld [vmem:[%s2034_s0 + $0x4] sm:$0xf] }
  0x12   :  { %76 = vmatpush.msra.mxu0 %v1580_v6  ;;  %192 = vmatpush.msra.mxu3 %v1651_v24 }
  0x13   :  { %77 = vmatmul.f32.vlgmr.msra.gmra.mxu0 %v1513_v8  ;;  %152 = vmatpush.msra.mxu2 %v1584_v7 }
  0x14   :  { %153 = vmatmul.f32.vlgmr.msra.gmra.mxu2 %v1513_v8  ;;  %232 = vmatpush.msrb.mxu0 %v1556_v0 }
  0x15   :  { %311 = vmatpush.msrb.mxu2 %v1564_v2  ;;  %112 = vmatpush.msra.mxu1 %v1625_v15 }
  0x16   :  { %233 = vmatpush.msrb.mxu0 %v1561_v1  ;;  %193 = vmatpush.msra.mxu3 %v1654_v25 }
  0x17   :  { %312 = vmatpush.msrb.mxu2 %v1566_v3  ;;  %113 = vmatpush.msra.mxu1 %v1631_v16 }
  0x18   :  { %234 = vmatpush.msrb.mxu0 %v1571_v4  ;;  %194 = vmatpush.msra.mxu3 %v1656_v26 }
  0x19   :  { %313 = vmatpush.msrb.mxu2 %v1575_v5  ;;  %268 = vmatpush.msrb.mxu1 %v1614_v12 }
  0x1a   :  { %235 = vmatpush.msrb.mxu0 %v1580_v6  ;;  %195 = vmatpush.msra.mxu3 %v1659_v27 }
  0x1b   :  { %314 = vmatpush.msrb.mxu2 %v1584_v7  ;;  %269 = vmatpush.msrb.mxu1 %v1619_v13 }
  0x1c   :  { %392 = vmatpush.msra.mxu0 %v1556_v0  ;;  %352 = vmatpush.msrb.mxu3 %v1651_v24 }
  0x1d   :  { %471 = vmatpush.msra.mxu2 %v1564_v2  ;;  %270 = vmatpush.msrb.mxu1 %v1625_v15 }
  0x1e   :  { %393 = vmatpush.msra.mxu0 %v1561_v1  ;;  %353 = vmatpush.msrb.mxu3 %v1654_v25 }
  0x1f   :  { %472 = vmatpush.msra.mxu2 %v1566_v3  ;;  %271 = vmatpush.msrb.mxu1 %v1631_v16 }
  0x20   :  { %394 = vmatpush.msra.mxu0 %v1571_v4  ;;  %354 = vmatpush.msrb.mxu3 %v1656_v26 }
  0x21   :  { %473 = vmatpush.msra.mxu2 %v1575_v5 }
  0x22   :  { %395 = vmatpush.msra.mxu0 %v1580_v6  ;;  %355 = vmatpush.msrb.mxu3 %v1659_v27 }
  0x23   :  { %474 = vmatpush.msra.mxu2 %v1584_v7 }
  0x6a   :  { %v202_v40 = vpop.permute.xlu2 %201 }
  0x6b   :  { %v203_v41 = vrot.slane %v202_v40, 2 }
  0x90   :  { %v78_v10 = vpop.f32.mrf.mxu0 }
  0x91   :  { %v81_v11 = vadd.f32 %v78_v10, %v1608_v9 }
  0x93   :  { %v82_v14 = vmul.f32 0.5, %v81_v11 }
  0x95   :  { %1391 = vtanh.f32 %v82_v14 }
  0x97   :  { %v154_v22 = vpop.f32.mrf.mxu2 }
  0x9b   :  { %v1392_v17 = vpop.eup %1391 }
  0x9c   :  { %v84_v18 = vmul.f32 0.5, %v1392_v17 }
  0x9e   :  { %v1637_v19 = vadd.f32 0.5, %v84_v18 }
  0xa0   :  { %v1641_v20 = vmul.f32 0.0, %v1637_v19  ;;  %v124_v48 = vsub.f32 1.0, %v1637_v19 }
  0xa2   :  { %92 = vst [vmem:[#allocation1] ss:$4 sm:$0xff] %v1641_v20 }
  0xa9   :  { %v93_v21 = vld.sshfl [vmem:[#allocation1] sm:$0xff pattern:$0x73625140] }
  0xaa   :  { %94 = vrot.lane.b32.xlu0 %v93_v21, %s1514_s2 }
  0xb2   :  { %158 = vrot.lane.b32.xlu0 %v154_v22, %s1514_s2 }
 0x11c   :  { %v95_v28 = vpop.permute.xlu0 %94 }
 0x11d   :  { %1346 = vmatmul.msk.f32.vlgmr.msra.gmra.mxu1 %vm57_vm0, %v95_v28 }
 0x11e   :  { %428 = vmatpush.msra.mxu1 %v1614_v12 }
 0x120   :  { %429 = vmatpush.msra.mxu1 %v1619_v13 }
 0x122   :  { %430 = vmatpush.msra.mxu1 %v1625_v15 }
 0x124   :  { %v159_v29 = vpop.permute.xlu0 %158  ;;  %431 = vmatpush.msra.mxu1 %v1631_v16 }
 0x125   :  { %v160_v30 = vrot.slane %v159_v29, 6 }
 0x127   :  { %v162_v31 = vsel %vm161_vm1, %v160_v30, %v159_v29 }
 0x128   :  { %v164_v32 = vadd.f32 %v1347_v23, %v162_v31 }
 0x12a   :  { %v165_v33 = vmul.f32 0.5, %v164_v32 }
 0x12c   :  { %1393 = vtanh.f32 %v165_v33 }
 0x132   :  { %v1394_v34 = vpop.eup %1393 }
 0x133   :  { %v167_v35 = vmul.f32 0.5, %v1394_v34 }
 0x135   :  { %v168_v36 = vadd.f32 0.5, %v167_v35 }
 0x137   :  { %v170_v37 = vrot.slane %v168_v36, 2  ;;  %v207_v62 = vsub.f32 1.0, %v168_v36  ;;  %v213_v8 = vmul.f32 0.0, %v168_v36 }
 0x139   :  { %v172_v38 = vmul.f32 0.0, %v170_v37 }
 0x13b   :  { %1348 = vmatmul.msk.f32.vlgmr.msra.gmra.mxu3 %vm57_vm0, %v172_v38 }
 0x13c   :  { %512 = vmatpush.msra.mxu3 %v1651_v24 }
 0x13e   :  { %513 = vmatpush.msra.mxu3 %v1654_v25 }
 0x140   :  { %514 = vmatpush.msra.mxu3 %v1656_v26 }
 0x142   :  { %515 = vmatpush.msra.mxu3 %v1659_v27 }
 0x19a   :  { %v115_v39 = vpop.f32.mrf.mxu1 }
 0x19b   :  { %119 = vrot.lane.b32.xlu1 %v115_v39, %s1515_s22 }
 0x1be   :  { %v197_v42 = vpop.f32.mrf.mxu3 }
 0x1bf   :  { %v205_v43 = vadd.f32 %v203_v41, %v197_v42 }
 0x1c1   :  { %1395 = vtanh.f32 %v205_v43 }
 0x1c7   :  { %v1396_v44 = vpop.eup %1395 }
 0x1c8   :  { %209 = vrot.lane.b32.xlu0 %v1396_v44, %s1514_s2 }
 0x20d   :  { %v120_v45 = vpop.permute.xlu1 %119 }
 0x20e   :  { %v122_v46 = vadd.f32 %v120_v45, %v1608_v9 }
 0x210   :  { %1397 = vtanh.f32 %v122_v46 }
 0x216   :  { %v1398_v47 = vpop.eup %1397 }
 0x217   :  { %126 = vrot.lane.b32.xlu1 %v1398_v47, %s1515_s22 }
 0x23a   :  { %v210_v61 = vpop.permute.xlu0 %209 }
 0x23b   :  { %v212_v63 = vmul.f32 %v210_v61, %v207_v62 }
 0x23d   :  { %v1700_v9 = vadd.f32 %v213_v8, %v212_v63 }
 0x289   :  { %v127_v49 = vpop.permute.xlu1 %126 }
 0x28a   :  { %v129_v50 = vmul.f32 %v127_v49, %v124_v48  ;;  %v1753_v49 = vld [vmem:[%s2034_s0 + $0x8] sm:$0xf] }
 0x28c   :  { %v1684_v51 = vadd.f32 %v129_v50, %v1641_v20  ;;  %v1722_v20 = vld [vmem:[%s2034_s0 + $0x18] sm:$0xf] }
 0x28e   :  { %245 = vrot.lane.b32.xlu2 %v1684_v51, %s1516_s23  ;;  %1350 = vmatmul.msk.f32.vlgmr.msrb.gmra.mxu0 %vm57_vm0, %v1684_v51 }
 0x28f   :  { %552 = vmatpush.msrb.mxu0 %v1556_v0 }
 0x291   :  { %553 = vmatpush.msrb.mxu0 %v1561_v1 }
 0x293   :  { %554 = vmatpush.msrb.mxu0 %v1571_v4 }
 0x295   :  { %555 = vmatpush.msrb.mxu0 %v1580_v6 }
 0x2e8   :  { %v246_v59 = vpop.permute.xlu2 %245 }
 0x30b   :  { %v237_v53 = vpop.f32.mrf.mxu0 }
 0x30c   :  { %v240_v54 = vadd.f32 %v1697_v52, %v237_v53 }
 0x30e   :  { %v241_v55 = vmul.f32 0.5, %v240_v54 }
 0x310   :  { %1399 = vtanh.f32 %v241_v55 }
 0x316   :  { %v1400_v56 = vpop.eup %1399 }
 0x317   :  { %v243_v57 = vmul.f32 0.5, %v1400_v56 }
 0x319   :  { %v244_v58 = vadd.f32 0.5, %v243_v57 }
 0x31b   :  { %v248_v60 = vmul.f32 %v246_v59, %v244_v58  ;;  %v282_v39 = vsub.f32 1.0, %v244_v58  ;;  %v288_v41 = vmul.f32 %v244_v58, %v1684_v51 }
 0x31d   :  { %250 = vst [vmem:[#allocation1] ss:$4 sm:$0xff] %v248_v60 }
 0x324   :  { %v251_v10 = vld.sshfl [vmem:[#allocation1] sm:$0xff pattern:$0x73625140] }
 0x325   :  { %293 = vst [vmem:[#allocation1] ss:$4 sm:$0xff] %v1700_v9  ;;  %252 = vrot.lane.b32.xlu2 %v251_v10, %s1514_s2 }
 0x32c   :  { %v294_v11 = vld.sshfl [vmem:[#allocation1] sm:$0xff pattern:$0x73625140] }
 0x32d   :  { %333 = vrot.lane.b32.xlu2 %v1700_v9, %s1516_s23  ;;  %295 = vrot.lane.b32.xlu1 %v294_v11, %s1516_s23 }
 0x37f   :  { %v253_v14 = vpop.permute.xlu2 %252 }
 0x380   :  { %1351 = vmatmul.msk.f32.vlgmr.msrb.gmra.mxu1 %vm57_vm0, %v253_v14 }
 0x381   :  { %588 = vmatpush.msrb.mxu1 %v1614_v12 }
 0x383   :  { %589 = vmatpush.msrb.mxu1 %v1619_v13 }
 0x385   :  { %590 = vmatpush.msrb.mxu1 %v1625_v15 }
 0x387   :  { %591 = vmatpush.msrb.mxu1 %v1631_v16  ;;  %v1730_v37 = vpop.permute.xlu2 %333 }
 0x39f   :  { %v296_v17 = vpop.permute.xlu1 %295 }
 0x3a0   :  { %1353 = vmatmul.msk.f32.vlgmr.msrb.gmra.mxu2 %vm57_vm0, %v296_v17 }
 0x3a1   :  { %631 = vmatpush.msrb.mxu2 %v1564_v2 }
 0x3a3   :  { %632 = vmatpush.msrb.mxu2 %v1566_v3 }
 0x3a5   :  { %633 = vmatpush.msrb.mxu2 %v1575_v5 }
 0x3a7   :  { %634 = vmatpush.msrb.mxu2 %v1584_v7 }
 0x3fd   :  { %v273_v18 = vpop.f32.mrf.mxu1 }
 0x3fe   :  { %277 = vrot.lane.b32.xlu1 %v273_v18, %s1515_s22 }
 0x406   :  { %361 = vrot.lane.b32.xlu1 %v1722_v20, %s1514_s2 }
 0x423   :  { %v316_v19 = vpop.f32.mrf.mxu2 }
 0x424   :  { %320 = vrot.lane.b32.xlu0 %v316_v19, %s1514_s2  ;;  %v1779_v19 = vld [vmem:[%s2034_s0 + $0x14] sm:$0xf] }
 0x470   :  { %v278_v21 = vpop.permute.xlu1 %277 }
 0x471   :  { %v280_v22 = vadd.f32 %v1697_v52, %v278_v21 }
 0x473   :  { %1401 = vtanh.f32 %v280_v22 }
 0x478   :  { %v362_v44 = vpop.permute.xlu1 %361 }
 0x479   :  { %v1402_v23 = vpop.eup %1401  ;;  %v363_v45 = vrot.slane %v362_v44, 2 }
 0x47a   :  { %284 = vrot.lane.b32.xlu0 %v1402_v23, %s1515_s22 }
 0x496   :  { %v321_v28 = vpop.permute.xlu0 %320 }
 0x497   :  { %v322_v29 = vrot.slane %v321_v28, 6 }
 0x499   :  { %v323_v30 = vsel %vm161_vm1, %v322_v29, %v321_v28 }
 0x49a   :  { %v325_v31 = vadd.f32 %v1722_v20, %v323_v30 }
 0x49c   :  { %v326_v32 = vmul.f32 0.5, %v325_v31 }
 0x49e   :  { %1403 = vtanh.f32 %v326_v32 }
 0x4a4   :  { %v1404_v33 = vpop.eup %1403 }
 0x4a5   :  { %v328_v34 = vmul.f32 0.5, %v1404_v33 }
 0x4a7   :  { %v329_v35 = vadd.f32 0.5, %v328_v34 }
 0x4a9   :  { %v331_v36 = vrot.slane %v329_v35, 2  ;;  %v367_v61 = vsub.f32 1.0, %v329_v35  ;;  %v373_v63 = vmul.f32 %v329_v35, %v1700_v9 }
 0x4ab   :  { %v336_v38 = vmul.f32 %v1730_v37, %v331_v36 }
 0x4ad   :  { %1354 = vmatmul.msk.f32.vlgmr.msrb.gmra.mxu3 %vm57_vm0, %v336_v38 }
 0x4ae   :  { %672 = vmatpush.msrb.mxu3 %v1651_v24 }
 0x4b0   :  { %673 = vmatpush.msrb.mxu3 %v1654_v25 }
 0x4b2   :  { %674 = vmatpush.msrb.mxu3 %v1656_v26 }
 0x4b4   :  { %675 = vmatpush.msrb.mxu3 %v1659_v27 }
 0x4ec   :  { %v285_v40 = vpop.permute.xlu0 %284 }
 0x4ed   :  { %v287_v42 = vmul.f32 %v285_v40, %v282_v39 }
 0x4ef   :  { %v1739_v43 = vadd.f32 %v288_v41, %v287_v42 }
 0x4f1   :  { %405 = vrot.lane.b32.xlu2 %v1739_v43, %s1516_s23  ;;  %1356 = vmatmul.msk.f32.vlgmr.msra.gmra.mxu0 %vm57_vm0, %v1739_v43 }
 0x4f2   :  { %710 = vmatpush.msra.mxu0 %v1556_v0 }
 0x4f4   :  { %711 = vmatpush.msra.mxu0 %v1561_v1 }
 0x4f6   :  { %712 = vmatpush.msra.mxu0 %v1571_v4 }
 0x4f8   :  { %713 = vmatpush.msra.mxu0 %v1580_v6 }
 0x530   :  { %v357_v46 = vpop.f32.mrf.mxu3 }
 0x531   :  { %v365_v47 = vadd.f32 %v363_v45, %v357_v46 }
 0x533   :  { %1405 = vtanh.f32 %v365_v47 }
 0x539   :  { %v1406_v48 = vpop.eup %1405 }
 0x53a   :  { %369 = vrot.lane.b32.xlu0 %v1406_v48, %s1514_s2 }
 0x54b   :  { %v406_v58 = vpop.permute.xlu2 %405 }
 0x56e   :  { %v397_v50 = vpop.f32.mrf.mxu0 }
 0x56f   :  { %v400_v53 = vadd.f32 %v1753_v49, %v397_v50 }
 0x571   :  { %v401_v54 = vmul.f32 0.5, %v400_v53 }
 0x573   :  { %1407 = vtanh.f32 %v401_v54  ;;  %v1810_v54 = vld [vmem:[%s2034_s0 + $0xc] sm:$0xf] }
 0x579   :  { %v1408_v55 = vpop.eup %1407 }
 0x57a   :  { %v403_v56 = vmul.f32 0.5, %v1408_v55 }
 0x57c   :  { %v404_v57 = vadd.f32 0.5, %v403_v56 }
 0x57e   :  { %v408_v59 = vmul.f32 %v406_v58, %v404_v57  ;;  %v442_v40 = vsub.f32 1.0, %v404_v57  ;;  %v448_v42 = vmul.f32 %v404_v57, %v1739_v43 }
 0x580   :  { %410 = vst [vmem:[#allocation1] ss:$4 sm:$0xff] %v408_v59 }
 0x587   :  { %v411_v60 = vld.sshfl [vmem:[#allocation1] sm:$0xff pattern:$0x73625140] }
 0x588   :  { %412 = vrot.lane.b32.xlu2 %v411_v60, %s1514_s2 }
 0x5ac   :  { %v370_v62 = vpop.permute.xlu0 %369 }
 0x5ad   :  { %v372_v8 = vmul.f32 %v370_v62, %v367_v61 }
 0x5af   :  { %v1758_v10 = vadd.f32 %v373_v63, %v372_v8 }
 0x5b1   :  { %453 = vst [vmem:[#allocation1] ss:$4 sm:$0xff] %v1758_v10  ;;  %493 = vrot.lane.b32.xlu2 %v1758_v10, %s1516_s23 }
 0x5b8   :  { %v454_v11 = vld.sshfl [vmem:[#allocation1] sm:$0xff pattern:$0x73625140] }
 0x5b9   :  { %455 = vrot.lane.b32.xlu1 %v454_v11, %s1516_s23 }
 0x5e2   :  { %v413_v14 = vpop.permute.xlu2 %412 }
 0x5e3   :  { %1357 = vmatmul.msk.f32.vlgmr.msra.gmra.mxu1 %vm57_vm0, %v413_v14 }
 0x5e4   :  { %746 = vmatpush.msra.mxu1 %v1614_v12 }
 0x5e6   :  { %747 = vmatpush.msra.mxu1 %v1619_v13 }
 0x5e8   :  { %748 = vmatpush.msra.mxu1 %v1625_v15 }
 0x5ea   :  { %749 = vmatpush.msra.mxu1 %v1631_v16 }
 0x60b   :  { %v1787_v38 = vpop.permute.xlu2 %493 }
 0x62b   :  { %v456_v9 = vpop.permute.xlu1 %455 }
 0x62c   :  { %1359 = vmatmul.msk.f32.vlgmr.msra.gmra.mxu2 %vm57_vm0, %v456_v9 }
 0x62d   :  { %787 = vmatpush.msra.mxu2 %v1564_v2 }
 0x62f   :  { %788 = vmatpush.msra.mxu2 %v1566_v3 }
 0x631   :  { %789 = vmatpush.msra.mxu2 %v1575_v5 }
 0x633   :  { %790 = vmatpush.msra.mxu2 %v1584_v7 }
 0x660   :  { %v433_v17 = vpop.f32.mrf.mxu1 }
 0x661   :  { %437 = vrot.lane.b32.xlu1 %v433_v17, %s1515_s22 }
 0x669   :  { %521 = vrot.lane.b32.xlu1 %v1779_v19, %s1514_s2 }
 0x6af   :  { %v476_v18 = vpop.f32.mrf.mxu2 }
 0x6b0   :  { %480 = vrot.lane.b32.xlu0 %v476_v18, %s1514_s2 }
 0x6d3   :  { %v438_v21 = vpop.permute.xlu1 %437 }
 0x6d4   :  { %v440_v22 = vadd.f32 %v1753_v49, %v438_v21 }
 0x6d6   :  { %1409 = vtanh.f32 %v440_v22 }
 0x6db   :  { %v522_v46 = vpop.permute.xlu1 %521 }
 0x6dc   :  { %v1410_v23 = vpop.eup %1409  ;;  %v523_v47 = vrot.slane %v522_v46, 2 }
 0x6dd   :  { %444 = vrot.lane.b32.xlu0 %v1410_v23, %s1515_s22  ;;  %v1835_v23 = vld [vmem:[%s2034_s0 + $0x10] sm:$0xf] }
 0x722   :  { %v481_v28 = vpop.permute.xlu0 %480 }
 0x723   :  { %v482_v29 = vrot.slane %v481_v28, 6 }
 0x725   :  { %v483_v30 = vsel %vm161_vm1, %v482_v29, %v481_v28 }
 0x726   :  { %v485_v31 = vadd.f32 %v1779_v19, %v483_v30 }
 0x728   :  { %v486_v32 = vmul.f32 0.5, %v485_v31 }
 0x72a   :  { %1411 = vtanh.f32 %v486_v32 }
 0x730   :  { %v1412_v33 = vpop.eup %1411 }
 0x731   :  { %v488_v34 = vmul.f32 0.5, %v1412_v33 }
 0x733   :  { %v489_v35 = vadd.f32 0.5, %v488_v34 }
 0x735   :  { %v491_v36 = vrot.slane %v489_v35, 2  ;;  %v527_v8 = vsub.f32 1.0, %v489_v35  ;;  %v533_v14 = vmul.f32 %v489_v35, %v1758_v10 }
 0x737   :  { %v496_v39 = vmul.f32 %v1787_v38, %v491_v36 }
 0x739   :  { %1360 = vmatmul.msk.f32.vlgmr.msra.gmra.mxu3 %vm57_vm0, %v496_v39 }
 0x73a   :  { %828 = vmatpush.msra.mxu3 %v1651_v24 }
 0x73c   :  { %829 = vmatpush.msra.mxu3 %v1654_v25 }
 0x73e   :  { %830 = vmatpush.msra.mxu3 %v1656_v26 }
 0x740   :  { %831 = vmatpush.msra.mxu3 %v1659_v27 }
 0x74f   :  { %v445_v41 = vpop.permute.xlu0 %444 }
 0x750   :  { %v447_v44 = vmul.f32 %v445_v41, %v442_v40 }
 0x752   :  { %v1796_v45 = vadd.f32 %v448_v42, %v447_v44 }
 0x754   :  { %565 = vrot.lane.b32.xlu2 %v1796_v45, %s1516_s23  ;;  %1362 = vmatmul.msk.f32.vlgmr.msrb.gmra.mxu0 %vm57_vm0, %v1796_v45 }
 0x755   :  { %866 = vmatpush.msrb.mxu0 %v1556_v0 }
 0x757   :  { %867 = vmatpush.msrb.mxu0 %v1561_v1 }
 0x759   :  { %868 = vmatpush.msrb.mxu0 %v1571_v4 }
 0x75b   :  { %869 = vmatpush.msrb.mxu0 %v1580_v6 }
 0x7ae   :  { %v566_v61 = vpop.permute.xlu2 %565 }
 0x7bc   :  { %v517_v48 = vpop.f32.mrf.mxu3 }
 0x7bd   :  { %v525_v50 = vadd.f32 %v523_v47, %v517_v48 }
 0x7bf   :  { %1413 = vtanh.f32 %v525_v50 }
 0x7c5   :  { %v1414_v53 = vpop.eup %1413 }
 0x7c6   :  { %529 = vrot.lane.b32.xlu0 %v1414_v53, %s1514_s2 }
 0x7d1   :  { %v557_v55 = vpop.f32.mrf.mxu0 }
 0x7d2   :  { %v560_v56 = vadd.f32 %v1810_v54, %v557_v55 }
 0x7d4   :  { %v561_v57 = vmul.f32 0.5, %v560_v56 }
 0x7d6   :  { %1415 = vtanh.f32 %v561_v57 }
 0x7dc   :  { %v1416_v58 = vpop.eup %1415 }
 0x7dd   :  { %v563_v59 = vmul.f32 0.5, %v1416_v58 }
 0x7df   :  { %v564_v60 = vadd.f32 0.5, %v563_v59 }
 0x7e1   :  { %v568_v62 = vmul.f32 %v566_v61, %v564_v60  ;;  %v602_v39 = vsub.f32 1.0, %v564_v60  ;;  %v608_v41 = vmul.f32 %v564_v60, %v1796_v45 }
 0x7e3   :  { %570 = vst [vmem:[#allocation1] ss:$4 sm:$0xff] %v568_v62 }
 0x7ea   :  { %v571_v63 = vld.sshfl [vmem:[#allocation1] sm:$0xff pattern:$0x73625140] }
 0x7eb   :  { %572 = vrot.lane.b32.xlu2 %v571_v63, %s1514_s2 }
 0x838   :  { %v530_v11 = vpop.permute.xlu0 %529 }
 0x839   :  { %v532_v9 = vmul.f32 %v530_v11, %v527_v8 }
 0x83b   :  { %v1815_v17 = vadd.f32 %v533_v14, %v532_v9 }
 0x83d   :  { %613 = vst [vmem:[#allocation1] ss:$4 sm:$0xff] %v1815_v17  ;;  %653 = vrot.lane.b32.xlu2 %v1815_v17, %s1516_s23 }
 0x844   :  { %v614_v18 = vld.sshfl [vmem:[#allocation1] sm:$0xff pattern:$0x73625140] }
 0x845   :  { %v573_v21 = vpop.permute.xlu2 %572  ;;  %615 = vrot.lane.b32.xlu1 %v614_v18, %s1516_s23 }
 0x846   :  { %1363 = vmatmul.msk.f32.vlgmr.msrb.gmra.mxu1 %vm57_vm0, %v573_v21 }
 0x847   :  { %902 = vmatpush.msrb.mxu1 %v1614_v12 }
 0x849   :  { %903 = vmatpush.msrb.mxu1 %v1619_v13 }
 0x84b   :  { %904 = vmatpush.msrb.mxu1 %v1625_v15 }
 0x84d   :  { %905 = vmatpush.msrb.mxu1 %v1631_v16 }
 0x897   :  { %v1854_v53 = vpop.permute.xlu2 %653 }
 0x8b7   :  { %v616_v10 = vpop.permute.xlu1 %615 }
 0x8b8   :  { %1365 = vmatmul.msk.f32.vlgmr.msrb.gmra.mxu2 %vm57_vm0, %v616_v10 }
 0x8b9   :  { %943 = vmatpush.msrb.mxu2 %v1564_v2 }
 0x8bb   :  { %944 = vmatpush.msrb.mxu2 %v1566_v3 }
 0x8bd   :  { %945 = vmatpush.msrb.mxu2 %v1575_v5 }
 0x8bf   :  { %946 = vmatpush.msrb.mxu2 %v1584_v7 }
 0x8c3   :  { %v593_v22 = vpop.f32.mrf.mxu1 }
 0x8c4   :  { %597 = vrot.lane.b32.xlu1 %v593_v22, %s1515_s22 }
 0x8cc   :  { %681 = vrot.lane.b32.xlu1 %v1835_v23, %s1514_s2 }
 0x936   :  { %v598_v28 = vpop.permute.xlu1 %597 }
 0x937   :  { %v600_v29 = vadd.f32 %v1810_v54, %v598_v28 }
 0x939   :  { %1417 = vtanh.f32 %v600_v29 }
 0x93b   :  { %v636_v30 = vpop.f32.mrf.mxu2 }
 0x93c   :  { %640 = vrot.lane.b32.xlu0 %v636_v30, %s1514_s2 }
 0x93e   :  { %v682_v59 = vpop.permute.xlu1 %681 }
 0x93f   :  { %v1418_v31 = vpop.eup %1417  ;;  %v683_v62 = vrot.slane %v682_v59, 2 }
 0x944   :  { %604 = vrot.lane.b32.xlu0 %v1418_v31, %s1515_s22 }
 0x9ae   :  { %v641_v32 = vpop.permute.xlu0 %640 }
 0x9af   :  { %v642_v33 = vrot.slane %v641_v32, 6 }
 0x9b1   :  { %v643_v34 = vsel %vm161_vm1, %v642_v33, %v641_v32 }
 0x9b2   :  { %v645_v35 = vadd.f32 %v1835_v23, %v643_v34 }
 0x9b4   :  { %v646_v36 = vmul.f32 0.5, %v645_v35 }
 0x9b6   :  { %1419 = vtanh.f32 %v646_v36  ;;  %v605_v40 = vpop.permute.xlu0 %604 }
 0x9b7   :  { %v607_v42 = vmul.f32 %v605_v40, %v602_v39 }
 0x9b9   :  { %v1845_v44 = vadd.f32 %v608_v41, %v607_v42 }
 0x9bb   :  { %723 = vrot.lane.b32.xlu2 %v1845_v44, %s1516_s23  ;;  %1367 = vmatmul.msk.f32.vlgmr.msra.gmra.mxu0 %vm57_vm0, %v1845_v44 }
 0x9bc   :  { %v1420_v46 = vpop.eup %1419  ;;  %1022 = vmatpush.msra.mxu0 %v1556_v0 }
 0x9bd   :  { %v648_v47 = vmul.f32 0.5, %v1420_v46 }
 0x9be   :  { %1023 = vmatpush.msra.mxu0 %v1561_v1 }
 0x9bf   :  { %v649_v48 = vadd.f32 0.5, %v648_v47 }
 0x9c0   :  { %1024 = vmatpush.msra.mxu0 %v1571_v4 }
 0x9c1   :  { %v651_v50 = vrot.slane %v649_v48, 2  ;;  %v687_v22 = vsub.f32 1.0, %v649_v48  ;;  %v693_v29 = vmul.f32 %v649_v48, %v1815_v17 }
 0x9c2   :  { %1025 = vmatpush.msra.mxu0 %v1580_v6 }
 0x9c3   :  { %v656_v55 = vmul.f32 %v1854_v53, %v651_v50 }
 0x9c5   :  { %1366 = vmatmul.msk.f32.vlgmr.msrb.gmra.mxu3 %vm57_vm0, %v656_v55 }
 0x9c6   :  { %984 = vmatpush.msrb.mxu3 %v1651_v24 }
 0x9c8   :  { %985 = vmatpush.msrb.mxu3 %v1654_v25 }
 0x9ca   :  { %986 = vmatpush.msrb.mxu3 %v1656_v26 }
 0x9cc   :  { %987 = vmatpush.msrb.mxu3 %v1659_v27 }
 0xa15   :  { %v724_v8 = vpop.permute.xlu2 %723 }
 0xa38   :  { %v715_v56 = vpop.f32.mrf.mxu0 }
 0xa39   :  { %v718_v57 = vadd.f32 %v1835_v23, %v715_v56 }
 0xa3b   :  { %v719_v58 = vmul.f32 0.5, %v718_v57 }
 0xa3d   :  { %1421 = vtanh.f32 %v719_v58 }
 0xa43   :  { %v1422_v60 = vpop.eup %1421 }
 0xa44   :  { %v721_v61 = vmul.f32 0.5, %v1422_v60 }
 0xa46   :  { %v722_v63 = vadd.f32 0.5, %v721_v61 }
 0xa48   :  { %v726_v11 = vmul.f32 %v724_v8, %v722_v63  ;;  %v677_v14 = vpop.f32.mrf.mxu3  ;;  %v760_v48 = vsub.f32 1.0, %v722_v63  ;;  %v766_v55 = vmul.f32 %v722_v63, %v1845_v44 }
 0xa49   :  { %v685_v9 = vadd.f32 %v683_v62, %v677_v14 }
 0xa4a   :  { %728 = vst [vmem:[#allocation1] ss:$4 sm:$0xff] %v726_v11 }
 0xa4b   :  { %1423 = vtanh.f32 %v685_v9 }
 0xa51   :  { %v1424_v18 = vpop.eup %1423  ;;  %v729_v21 = vld.sshfl [vmem:[#allocation1] sm:$0xff pattern:$0x73625140] }
 0xa52   :  { %730 = vrot.lane.b32.xlu2 %v729_v21, %s1514_s2  ;;  %689 = vrot.lane.b32.xlu0 %v1424_v18, %s1514_s2 }
 0xaac   :  { %v731_v10 = vpop.permute.xlu2 %730 }
 0xaad   :  { %1368 = vmatmul.msk.f32.vlgmr.msra.gmra.mxu1 %vm57_vm0, %v731_v10 }
 0xaae   :  { %1058 = vmatpush.msra.mxu1 %v1614_v12 }
 0xab0   :  { %1059 = vmatpush.msra.mxu1 %v1619_v13 }
 0xab2   :  { %1060 = vmatpush.msra.mxu1 %v1625_v15 }
 0xab4   :  { %1061 = vmatpush.msra.mxu1 %v1631_v16 }
 0xac4   :  { %v690_v28 = vpop.permute.xlu0 %689 }
 0xac5   :  { %v692_v30 = vmul.f32 %v690_v28, %v687_v22 }
 0xac7   :  { %v1872_v31 = vadd.f32 %v693_v29, %v692_v30 }
 0xac9   :  { %769 = vst [vmem:[#allocation1] ss:$4 sm:$0xff] %v1872_v31  ;;  %809 = vrot.lane.b32.xlu2 %v1872_v31, %s1516_s23 }
 0xad0   :  { %v770_v32 = vld.sshfl [vmem:[#allocation1] sm:$0xff pattern:$0x73625140] }
 0xad1   :  { %771 = vrot.lane.b32.xlu1 %v770_v32, %s1516_s23 }
 0xb23   :  { %v810_v57 = vpop.permute.xlu2 %809 }
 0xb2a   :  { %v751_v33 = vpop.f32.mrf.mxu1 }
 0xb2b   :  { %755 = vrot.lane.b32.xlu1 %v751_v33, %s1515_s22 }
 0xb33   :  { %837 = vrot.lane.b32.xlu1 %v1810_v54, %s1514_s2 }
 0xb43   :  { %v772_v34 = vpop.permute.xlu1 %771 }
 0xb44   :  { %1369 = vmatmul.msk.f32.vlgmr.msra.gmra.mxu2 %vm57_vm0, %v772_v34 }
 0xb45   :  { %1099 = vmatpush.msra.mxu2 %v1564_v2 }
 0xb47   :  { %1100 = vmatpush.msra.mxu2 %v1566_v3 }
 0xb49   :  { %1101 = vmatpush.msra.mxu2 %v1575_v5 }
 0xb4b   :  { %1102 = vmatpush.msra.mxu2 %v1584_v7 }
 0xb9d   :  { %v756_v17 = vpop.permute.xlu1 %755 }
 0xb9e   :  { %v758_v35 = vadd.f32 %v1835_v23, %v756_v17 }
 0xba0   :  { %1425 = vtanh.f32 %v758_v35 }
 0xba6   :  { %v1426_v39 = vpop.eup %1425 }
 0xbc7   :  { %v792_v36 = vpop.f32.mrf.mxu2 }
 0xbc8   :  { %796 = vrot.lane.b32.xlu0 %v792_v36, %s1514_s2 }
 0xbd0   :  { %762 = vrot.lane.b32.xlu0 %v1426_v39, %s1515_s22 }
 0xc3a   :  { %v797_v40 = vpop.permute.xlu0 %796 }
 0xc3b   :  { %v798_v41 = vrot.slane %v797_v40, 6 }
 0xc3d   :  { %v799_v42 = vsel %vm161_vm1, %v798_v41, %v797_v40 }
 0xc3e   :  { %v801_v46 = vadd.f32 %v1810_v54, %v799_v42 }
 0xc40   :  { %v802_v47 = vmul.f32 0.5, %v801_v46 }
 0xc42   :  { %1427 = vtanh.f32 %v802_v47  ;;  %v763_v50 = vpop.permute.xlu0 %762 }
 0xc43   :  { %v765_v23 = vmul.f32 %v763_v50, %v760_v48 }
 0xc45   :  { %v1892_v56 = vadd.f32 %v766_v55, %v765_v23 }
 0xc47   :  { %v1327_v58 = vadd.f32 %v810_v57, %v1892_v56  ;;  %879 = vrot.lane.b32.xlu2 %v1892_v56, %s1516_s23  ;;  %1371 = vmatmul.msk.f32.vlgmr.msrb.gmra.mxu0 %vm57_vm0, %v1892_v56 }
 0xc48   :  { %v1428_v54 = vpop.eup %1427  ;;  %1178 = vmatpush.msrb.mxu0 %v1556_v0 }
 0xc49   :  { %v804_v59 = vmul.f32 0.5, %v1428_v54  ;;  %1336 = vst.msk [vmem:[%s2039_s5 + $0x8] sm:$0x3] %vm1331_vm2, %v1327_v58 }
 0xc4a   :  { %1179 = vmatpush.msrb.mxu0 %v1561_v1 }
 0xc4b   :  { %v805_v60 = vadd.f32 0.5, %v804_v59 }
 0xc4c   :  { %1180 = vmatpush.msrb.mxu0 %v1571_v4  ;;  %v838_v4 = vpop.permute.xlu1 %837 }
 0xc4d   :  { %v807_v61 = vrot.slane %v805_v60, 2  ;;  %v843_v30 = vsub.f32 1.0, %v805_v60  ;;  %v849_v33 = vmul.f32 %v805_v60, %v1872_v31 }
 0xc4e   :  { %1181 = vmatpush.msrb.mxu0 %v1580_v6  ;;  %v839_v6 = vrot.slane %v838_v4, 2 }
 0xc4f   :  { %v812_v62 = vmul.f32 %v810_v57, %v807_v61 }
 0xc51   :  { %1370 = vmatmul.msk.f32.vlgmr.msra.gmra.mxu3 %vm57_vm0, %v812_v62 }
 0xc52   :  { %1140 = vmatpush.msra.mxu3 %v1651_v24 }
 0xc54   :  { %1141 = vmatpush.msra.mxu3 %v1654_v25 }
 0xc56   :  { %1142 = vmatpush.msra.mxu3 %v1656_v26 }
 0xc58   :  { %1143 = vmatpush.msra.mxu3 %v1659_v27 }
 0xca1   :  { %v880_v9 = vpop.permute.xlu2 %879 }
 0xcc4   :  { %v871_v0 = vpop.f32.mrf.mxu0 }
 0xcc5   :  { %v874_v1 = vadd.f32 %v1779_v19, %v871_v0 }
 0xcc7   :  { %v875_v63 = vmul.f32 0.5, %v874_v1 }
 0xcc9   :  { %1429 = vtanh.f32 %v875_v63 }
 0xccf   :  { %v1430_v8 = vpop.eup %1429 }
 0xcd0   :  { %v877_v11 = vmul.f32 0.5, %v1430_v8 }
 0xcd2   :  { %v878_v14 = vadd.f32 0.5, %v877_v11 }
 0xcd4   :  { %v882_v18 = vmul.f32 %v880_v9, %v878_v14  ;;  %v833_v21 = vpop.f32.mrf.mxu3  ;;  %v922_v46 = vmul.f32 %v878_v14, %v1892_v56 }
 0xcd5   :  { %v841_v10 = vadd.f32 %v839_v6, %v833_v21 }
 0xcd6   :  { %884 = vst [vmem:[#allocation1] ss:$4 sm:$0xff] %v882_v18 }
 0xcd7   :  { %1431 = vtanh.f32 %v841_v10 }
 0xcdd   :  { %v1432_v22 = vpop.eup %1431  ;;  %v885_v28 = vld.sshfl [vmem:[#allocation1] sm:$0xff pattern:$0x73625140] }
 0xcde   :  { %886 = vrot.lane.b32.xlu2 %v885_v28, %s1514_s2  ;;  %845 = vrot.lane.b32.xlu0 %v1432_v22, %s1514_s2 }
 0xd38   :  { %v887_v29 = vpop.permute.xlu2 %886 }
 0xd39   :  { %1372 = vmatmul.msk.f32.vlgmr.msrb.gmra.mxu1 %vm57_vm0, %v887_v29 }
 0xd3a   :  { %1214 = vmatpush.msrb.mxu1 %v1614_v12 }
 0xd3c   :  { %1215 = vmatpush.msrb.mxu1 %v1619_v13 }
 0xd3e   :  { %1216 = vmatpush.msrb.mxu1 %v1625_v15 }
 0xd40   :  { %1217 = vmatpush.msrb.mxu1 %v1631_v16 }
 0xd50   :  { %v846_v32 = vpop.permute.xlu0 %845 }
 0xd51   :  { %v848_v34 = vmul.f32 %v846_v32, %v843_v30 }
 0xd53   :  { %v1921_v17 = vadd.f32 %v849_v33, %v848_v34 }
 0xd55   :  { %925 = vst [vmem:[#allocation1] ss:$4 sm:$0xff] %v1921_v17  ;;  %965 = vrot.lane.b32.xlu2 %v1921_v17, %s1516_s23 }
 0xd5c   :  { %v926_v35 = vld.sshfl [vmem:[#allocation1] sm:$0xff pattern:$0x73625140] }
 0xd5d   :  { %927 = vrot.lane.b32.xlu1 %v926_v35, %s1516_s23 }
 0xdaf   :  { %v966_v12 = vpop.permute.xlu2 %965 }
 0xdb0   :  { %v1326_v13 = vadd.f32 %v966_v12, %v1845_v44 }
 0xdb2   :  { %1335 = vst.msk [vmem:[%s2039_s5 + $0x6] sm:$0x3] %vm1331_vm2, %v1326_v13 }
 0xdb6   :  { %v907_v15 = vpop.f32.mrf.mxu1 }
 0xdb7   :  { %911 = vrot.lane.b32.xlu1 %v907_v15, %s1515_s22 }
 0xdbf   :  { %993 = vrot.lane.b32.xlu1 %v1753_v49, %s1514_s2 }
 0xdcf   :  { %v928_v16 = vpop.permute.xlu1 %927 }
 0xdd0   :  { %1373 = vmatmul.msk.f32.vlgmr.msrb.gmra.mxu2 %vm57_vm0, %v928_v16 }
 0xdd1   :  { %1255 = vmatpush.msrb.mxu2 %v1564_v2 }
 0xdd3   :  { %1256 = vmatpush.msrb.mxu2 %v1566_v3 }
 0xdd5   :  { %1257 = vmatpush.msrb.mxu2 %v1575_v5  ;;  %v916_v5 = vsub.f32 1.0, %v878_v14 }
 0xdd7   :  { %1258 = vmatpush.msrb.mxu2 %v1584_v7 }
 0xe29   :  { %v912_v44 = vpop.permute.xlu1 %911 }
 0xe2a   :  { %v914_v31 = vadd.f32 %v1779_v19, %v912_v44 }
 0xe2c   :  { %1433 = vtanh.f32 %v914_v31 }
 0xe31   :  { %v994_v54 = vpop.permute.xlu1 %993 }
 0xe32   :  { %v1434_v39 = vpop.eup %1433  ;;  %v995_v61 = vrot.slane %v994_v54, 2 }
 0xe53   :  { %v948_v36 = vpop.f32.mrf.mxu2 }
 0xe54   :  { %952 = vrot.lane.b32.xlu0 %v948_v36, %s1514_s2 }
 0xe5c   :  { %918 = vrot.lane.b32.xlu0 %v1434_v39, %s1515_s22 }
 0xec6   :  { %v953_v40 = vpop.permute.xlu0 %952 }
 0xec7   :  { %v954_v41 = vrot.slane %v953_v40, 6 }
 0xec9   :  { %v955_v2 = vsel %vm161_vm1, %v954_v41, %v953_v40 }
 0xeca   :  { %v957_v3 = vadd.f32 %v1753_v49, %v955_v2 }
 0xecc   :  { %v958_v42 = vmul.f32 0.5, %v957_v3 }
 0xece   :  { %1435 = vtanh.f32 %v958_v42  ;;  %v919_v7 = vpop.permute.xlu0 %918 }
 0xecf   :  { %v921_v19 = vmul.f32 %v919_v7, %v916_v5 }
 0xed1   :  { %v1946_v47 = vadd.f32 %v922_v46, %v921_v19 }
 0xed3   :  { %v1328_v48 = vadd.f32 %v1946_v47, %v1854_v53  ;;  %1035 = vrot.lane.b32.xlu2 %v1946_v47, %s1516_s23  ;;  %1375 = vmatmul.msk.f32.vlgmr.msra.gmra.mxu0 %vm57_vm0, %v1946_v47 }
 0xed4   :  { %v1436_v50 = vpop.eup %1435 }
 0xed5   :  { %v960_v49 = vmul.f32 0.5, %v1436_v50  ;;  %1337 = vst.msk [vmem:[%s2039_s5 + $0xa] sm:$0x3] %vm1331_vm2, %v1328_v48 }
 0xed7   :  { %v961_v55 = vadd.f32 0.5, %v960_v49 }
 0xed9   :  { %v963_v23 = vrot.slane %v961_v55, 2  ;;  %v999_v4 = vsub.f32 1.0, %v961_v55  ;;  %v1005_v11 = vmul.f32 %v961_v55, %v1921_v17 }
 0xedb   :  { %v968_v56 = vmul.f32 %v966_v12, %v963_v23 }
 0xedd   :  { %1374 = vmatmul.msk.f32.vlgmr.msrb.gmra.mxu3 %vm57_vm0, %v968_v56 }
 0xede   :  { %1296 = vmatpush.msrb.mxu3 %v1651_v24 }
 0xee0   :  { %1297 = vmatpush.msrb.mxu3 %v1654_v25 }
 0xee2   :  { %1298 = vmatpush.msrb.mxu3 %v1656_v26 }
 0xee4   :  { %1299 = vmatpush.msrb.mxu3 %v1659_v27 }
 0xf2d   :  { %v1036_v0 = vpop.permute.xlu2 %1035 }
 0xf50   :  { %v1027_v53 = vpop.f32.mrf.mxu0 }
 0xf51   :  { %v1030_v57 = vadd.f32 %v1722_v20, %v1027_v53 }
 0xf53   :  { %v1031_v58 = vmul.f32 0.5, %v1030_v57 }
 0xf55   :  { %1437 = vtanh.f32 %v1031_v58 }
 0xf5b   :  { %v1438_v59 = vpop.eup %1437 }
 0xf5c   :  { %v1033_v60 = vmul.f32 0.5, %v1438_v59 }
 0xf5e   :  { %v1034_v62 = vadd.f32 0.5, %v1033_v60 }
 0xf60   :  { %v1038_v1 = vmul.f32 %v1036_v0, %v1034_v62  ;;  %v989_v63 = vpop.f32.mrf.mxu3  ;;  %v1072_v12 = vsub.f32 1.0, %v1034_v62  ;;  %v1078_v15 = vmul.f32 %v1034_v62, %v1946_v47 }
 0xf61   :  { %v997_v24 = vadd.f32 %v995_v61, %v989_v63 }
 0xf62   :  { %1040 = vst [vmem:[#allocation1] ss:$4 sm:$0xff] %v1038_v1 }
 0xf63   :  { %1439 = vtanh.f32 %v997_v24 }
 0xf69   :  { %v1440_v25 = vpop.eup %1439  ;;  %v1041_v26 = vld.sshfl [vmem:[#allocation1] sm:$0xff pattern:$0x73625140] }
 0xf6a   :  { %1042 = vrot.lane.b32.xlu2 %v1041_v26, %s1514_s2  ;;  %1001 = vrot.lane.b32.xlu0 %v1440_v25, %s1514_s2 }
 0xfc4   :  { %v1043_v27 = vpop.permute.xlu2 %1042 }
 0xfc5   :  { %1376 = vmatmul.msk.f32.vlgmr.msra.gmra.mxu1 %vm57_vm0, %v1043_v27 }
 0xfdc   :  { %v1002_v8 = vpop.permute.xlu0 %1001 }
 0xfdd   :  { %v1004_v6 = vmul.f32 %v1002_v8, %v999_v4 }
 0xfdf   :  { %v1006_v14 = vadd.f32 %v1005_v11, %v1004_v6 }
 0xfe1   :  { %1081 = vst [vmem:[#allocation1] ss:$4 sm:$0xff] %v1006_v14  ;;  %1121 = vrot.lane.b32.xlu2 %v1006_v14, %s1516_s23 }
 0xfe8   :  { %v1082_v9 = vld.sshfl [vmem:[#allocation1] sm:$0xff pattern:$0x73625140] }
 0xfe9   :  { %1083 = vrot.lane.b32.xlu1 %v1082_v9, %s1516_s23 }
0x103b   :  { %v1122_v18 = vpop.permute.xlu2 %1121 }
0x103c   :  { %v1325_v21 = vadd.f32 %v1122_v18, %v1796_v45 }
0x103e   :  { %1334 = vst.msk [vmem:[%s2039_s5 + $0x4] sm:$0x3] %vm1331_vm2, %v1325_v21 }
0x1042   :  { %v1063_v10 = vpop.f32.mrf.mxu1 }
0x1043   :  { %1067 = vrot.lane.b32.xlu1 %v1063_v10, %s1515_s22 }
0x104b   :  { %1149 = vrot.lane.b32.xlu1 %v1697_v52, %s1514_s2 }
0x105b   :  { %v1084_v22 = vpop.permute.xlu1 %1083 }
0x105c   :  { %1377 = vmatmul.msk.f32.vlgmr.msra.gmra.mxu2 %vm57_vm0, %v1084_v22 }
0x10b5   :  { %v1068_v28 = vpop.permute.xlu1 %1067 }
0x10b6   :  { %v1070_v29 = vadd.f32 %v1722_v20, %v1068_v28 }
0x10b8   :  { %1441 = vtanh.f32 %v1070_v29 }
0x10bd   :  { %v1150_v42 = vpop.permute.xlu1 %1149 }
0x10be   :  { %v1442_v45 = vpop.eup %1441  ;;  %v1151_v46 = vrot.slane %v1150_v42, 2 }
0x10df   :  { %v1104_v30 = vpop.f32.mrf.mxu2 }
0x10e0   :  { %1108 = vrot.lane.b32.xlu0 %v1104_v30, %s1514_s2 }
0x10e8   :  { %1074 = vrot.lane.b32.xlu0 %v1442_v45, %s1515_s22 }
0x1152   :  { %v1109_v32 = vpop.permute.xlu0 %1108 }
0x1153   :  { %v1110_v33 = vrot.slane %v1109_v32, 6 }
0x1155   :  { %v1111_v34 = vsel %vm161_vm1, %v1110_v33, %v1109_v32 }
0x1156   :  { %v1113_v17 = vadd.f32 %v1697_v52, %v1111_v34 }
0x1158   :  { %v1114_v35 = vmul.f32 0.5, %v1113_v17 }
0x115a   :  { %1443 = vtanh.f32 %v1114_v35  ;;  %v1075_v13 = vpop.permute.xlu0 %1074 }
0x115b   :  { %v1077_v20 = vmul.f32 %v1075_v13, %v1072_v12 }
0x115d   :  { %v1985_v16 = vadd.f32 %v1078_v15, %v1077_v20 }
0x115f   :  { %v1329_v44 = vadd.f32 %v1985_v16, %v1787_v38  ;;  %1191 = vrot.lane.b32.xlu2 %v1985_v16, %s1516_s23  ;;  %1379 = vmatmul.msk.f32.vlgmr.msrb.gmra.mxu0 %vm57_vm0, %v1985_v16  ;;  %v1455_v38 = vld [vmem:[%s2034_s0 + $0x1c] sm:$0xf] }
0x1160   :  { %v1444_v31 = vpop.eup %1443 }
0x1161   :  { %v1116_v52 = vmul.f32 0.5, %v1444_v31  ;;  %1338 = vst.msk [vmem:[%s2039_s5 + $0xc] sm:$0x3] %vm1331_vm2, %v1329_v44 }
0x1163   :  { %v1117_v36 = vadd.f32 0.5, %v1116_v52 }
0x1165   :  { %v1119_v39 = vrot.slane %v1117_v36, 2  ;;  %v1155_v23 = vsub.f32 1.0, %v1117_v36  ;;  %v1161_v53 = vmul.f32 %v1117_v36, %v1006_v14 }
0x1167   :  { %v1124_v40 = vmul.f32 %v1122_v18, %v1119_v39 }
0x1169   :  { %1378 = vmatmul.msk.f32.vlgmr.msra.gmra.mxu3 %vm57_vm0, %v1124_v40 }
0x11b9   :  { %v1192_v47 = vpop.permute.xlu2 %1191 }
0x11dc   :  { %v1183_v41 = vpop.f32.mrf.mxu0 }
0x11dd   :  { %v1186_v2 = vadd.f32 %v1455_v38, %v1183_v41 }
0x11df   :  { %v1187_v3 = vmul.f32 0.5, %v1186_v2 }
0x11e1   :  { %1445 = vtanh.f32 %v1187_v3 }
0x11e7   :  { %v1446_v5 = vpop.eup %1445 }
0x11e8   :  { %v1189_v7 = vmul.f32 0.5, %v1446_v5 }
0x11ea   :  { %v1190_v19 = vadd.f32 0.5, %v1189_v7 }
0x11ec   :  { %v1194_v48 = vmul.f32 %v1192_v47, %v1190_v19  ;;  %v1145_v50 = vpop.f32.mrf.mxu3  ;;  %v1228_v28 = vsub.f32 1.0, %v1190_v19  ;;  %v1234_v30 = vmul.f32 %v1190_v19, %v1985_v16 }
0x11ed   :  { %v1153_v49 = vadd.f32 %v1151_v46, %v1145_v50 }
0x11ee   :  { %1196 = vst [vmem:[#allocation1] ss:$4 sm:$0xff] %v1194_v48 }
0x11ef   :  { %1447 = vtanh.f32 %v1153_v49 }
0x11f5   :  { %v1448_v55 = vpop.eup %1447  ;;  %v1197_v54 = vld.sshfl [vmem:[#allocation1] sm:$0xff pattern:$0x73625140] }
0x11f6   :  { %1157 = vrot.lane.b32.xlu0 %v1448_v55, %s1514_s2 }
0x1268   :  { %v1158_v56 = vpop.permute.xlu0 %1157 }
0x1269   :  { %v1160_v57 = vmul.f32 %v1158_v56, %v1155_v23 }
0x126b   :  { %v1162_v58 = vadd.f32 %v1161_v53, %v1160_v57 }
0x126d   :  { %1277 = vrot.lane.b32.xlu0 %v1162_v58, %s1516_s23  ;;  %1237 = vst [vmem:[#allocation1] ss:$4 sm:$0xff] %v1162_v58 }
0x1274   :  { %v1238_v59 = vld.sshfl [vmem:[#allocation1] sm:$0xff pattern:$0x73625140] }
0x1275   :  { %1239 = vrot.lane.b32.xlu1 %v1238_v59, %s1516_s23 }
0x127d   :  { %1198 = vrot.lane.b32.xlu1 %v1197_v54, %s1514_s2 }
0x12df   :  { %v1278_v60 = vpop.permute.xlu0 %1277 }
0x12e0   :  { %v1324_v61 = vadd.f32 %v1278_v60, %v1739_v43  ;;  %v1456_v43 = vld [vmem:[%s2034_s0] sm:$0xf] }
0x12e2   :  { %1333 = vst.msk [vmem:[%s2039_s5 + $0x2] sm:$0x3] %vm1331_vm2, %v1324_v61 }
0x12e7   :  { %v1240_v62 = vpop.permute.xlu1 %1239 }
0x12e8   :  { %1381 = vmatmul.msk.f32.vlgmr.msrb.gmra.mxu2 %vm57_vm0, %v1240_v62 }
0x12ef   :  { %v1199_v0 = vpop.permute.xlu1 %1198 }
0x12f0   :  { %1380 = vmatmul.msk.f32.vlgmr.msrb.gmra.mxu1 %vm57_vm0, %v1199_v0 }
0x136b   :  { %v1260_v1 = vpop.f32.mrf.mxu2 }
0x136c   :  { %1264 = vrot.lane.b32.xlu2 %v1260_v1, %s1514_s2 }
0x136d   :  { %v1219_v63 = vpop.f32.mrf.mxu1 }
0x136e   :  { %1223 = vrot.lane.b32.xlu0 %v1219_v63, %s1515_s22 }
0x1374   :  { %1305 = vrot.lane.b32.xlu2 %v1456_v43, %s1514_s2 }
0x13c6   :  { %v1265_v24 = vpop.permute.xlu2 %1264 }
0x13c7   :  { %v1266_v25 = vrot.slane %v1265_v24, 6 }
0x13c9   :  { %v1267_v26 = vsel %vm161_vm1, %v1266_v25, %v1265_v24 }
0x13ca   :  { %v1269_v27 = vadd.f32 %v1456_v43, %v1267_v26 }
0x13cc   :  { %v1270_v4 = vmul.f32 0.5, %v1269_v27 }
0x13ce   :  { %1449 = vtanh.f32 %v1270_v4  ;;  %v1306_v22 = vpop.permute.xlu2 %1305 }
0x13cf   :  { %v1307_v34 = vrot.slane %v1306_v22, 2 }
0x13d4   :  { %v1450_v8 = vpop.eup %1449 }
0x13d5   :  { %v1272_v11 = vmul.f32 0.5, %v1450_v8 }
0x13d7   :  { %v1273_v6 = vadd.f32 0.5, %v1272_v11 }
0x13d9   :  { %v1275_v14 = vrot.slane %v1273_v6, 2  ;;  %v1311_v13 = vsub.f32 1.0, %v1273_v6  ;;  %v1317_v20 = vmul.f32 %v1273_v6, %v1162_v58 }
0x13db   :  { %v1280_v9 = vmul.f32 %v1278_v60, %v1275_v14 }
0x13dd   :  { %1382 = vmatmul.msk.f32.vlgmr.msrb.gmra.mxu3 %vm57_vm0, %v1280_v9 }
0x13e0   :  { %v1224_v18 = vpop.permute.xlu0 %1223 }
0x13e1   :  { %v1226_v21 = vadd.f32 %v1455_v38, %v1224_v18 }
0x13e3   :  { %1451 = vtanh.f32 %v1226_v21 }
0x13e9   :  { %v1452_v10 = vpop.eup %1451 }
0x13ea   :  { %1230 = vrot.lane.b32.xlu2 %v1452_v10, %s1515_s22 }
0x1444   :  { %v1231_v29 = vpop.permute.xlu2 %1230 }
0x1445   :  { %v1233_v45 = vmul.f32 %v1231_v29, %v1228_v28 }
0x1447   :  { %v1235_v32 = vadd.f32 %v1234_v30, %v1233_v45 }
0x1449   :  { %v1330_v33 = vadd.f32 %v1235_v32, %v1730_v37 }
0x144b   :  { %1339 = vst.msk [vmem:[%s2039_s5 + $0xe] sm:$0x3] %vm1331_vm2, %v1330_v33 }
0x1460   :  { %v1301_v17 = vpop.f32.mrf.mxu3 }
0x1461   :  { %v1309_v35 = vadd.f32 %v1307_v34, %v1301_v17 }
0x1463   :  { %1453 = vtanh.f32 %v1309_v35 }
0x1469   :  { %v1454_v12 = vpop.eup %1453 }
0x146a   :  { %1313 = vrot.lane.b32.xlu1 %v1454_v12, %s1514_s2 }
0x14dc   :  { %v1314_v15 = vpop.permute.xlu1 %1313 }
0x14dd   :  { %v1316_v16 = vmul.f32 %v1314_v15, %v1311_v13 }
0x14df   :  { %v1318_v44 = vadd.f32 %v1317_v20, %v1316_v16 }
0x14e1   :  { %1320 = vrot.lane.b32.xlu0 %v1318_v44, %s1516_s23 }
0x1553   :  { %v1321_v37 = vpop.permute.xlu0 %1320 }
0x1554   :  { %v1323_v31 = vadd.f32 %v1321_v37, %v1684_v51 }
0x1556   :  { %1332 = vst.msk [vmem:[%s2039_s5] sm:$0x3] %vm1331_vm2, %v1323_v31 }
0x1557   :  { %1344 = vsyncpa [#allocation3], 1 }
0x1558   :  { %1345 = vsyncpa [#allocation5], 1 }

// kernel: net_forward.3
= control target key start
LH: loop header
LB: loop body
LE: loop exit
PB: predicated region body
PF: predicated region fallthrough
CT: control target
= control target key end

     0   :  { %s2842_s0 = inlined_call_operand.vmem [shape: f32[2,8,32], index: 0, kind: input, shape index: {}]   ;;  %s2843_s1 = inlined_call_operand.vmem [shape: f32[2,4,32], index: 1, kind: input, shape index: {}]   ;;  %s2844_s2 = inlined_call_operand.vmem [shape: f32[2,8], index: 2, kind: input, shape index: {}]   ;;  %s2845_s3 = inlined_call_operand.vmem [shape: f32[6], index: 3, kind: input, shape index: {}]   ;;  %s2846_s4 = inlined_call_operand.vmem [shape: f32[32,96], index: 4, kind: input, shape index: {}]   ;;  %s2847_s5 = inlined_call_operand.vmem [shape: f32[1,96], index: 5, kind: input, shape index: {}]   ;;  %s2848_s6 = inlined_call_operand.hbm [shape: f32[32,96], index: 6, kind: input, shape index: {}]   ;;  %s2849_s7 = inlined_call_operand.vmem [shape: f32[1,96], index: 7, kind: input, shape index: {}]   ;;  %s2850_s8 = inlined_call_operand.hbm [shape: f32[24,96], index: 8, kind: input, shape index: {}]   ;;  %s2851_s9 = inlined_call_operand.vmem [shape: f32[32,192], index: 9, kind: input, shape index: {}]   ;;  %s2852_s10 = inlined_call_operand.vmem [shape: f32[1,192], index: 10, kind: input, shape index: {}]   ;;  %s2853_s11 = inlined_call_operand.vmem [shape: f32[6,32,32], index: 11, kind: input, shape index: {}]   ;;  %s2854_s12 = inlined_call_operand.vmem [shape: f32[6,32], index: 12, kind: input, shape index: {}]   ;;  %s2855_s13 = inlined_call_operand.hbm [shape: f32[6,32,32], index: 13, kind: input, shape index: {}]   ;;  %s2856_s14 = inlined_call_operand.vmem [shape: f32[6,32], index: 14, kind: input, shape index: {}]   ;;  %s2857_s15 = inlined_call_operand.hbm [shape: f32[32,64], index: 15, kind: input, shape index: {}]   ;;  %s2858_s16 = inlined_call_operand.vmem [shape: f32[1,64], index: 16, kind: input, shape index: {}]   ;;  %s2859_s17 = inlined_call_operand.hbm [shape: f32[64,128], index: 17, kind: input, shape index: {}]   ;;  %s2860_s18 = inlined_call_operand.vmem [shape: f32[1,128], index: 18, kind: input, shape index: {}]   ;;  %s2861_s19 = inlined_call_operand.hbm [shape: f32[2,128], index: 19, kind: output, shape index: {0}]   ;;  %s2862_s20 = inlined_call_operand.vmem [shape: f32[2,3,8], index: 20, kind: output, shape index: {1}]  }
   0x1   :  { %2866 = sst [smem:[#allocation19_spill]] %s2842_s0 }
   0x2   :  { %2867 = sst [smem:[#allocation20_spill]] %s2843_s1 }
   0x3   :  { %2868 = sst [smem:[#allocation21_spill]] %s2844_s2 }
   0x4   :  { %2869 = sst [smem:[#allocation22_spill]] %s2845_s3 }
   0x5   :  { %2870 = sst [smem:[#allocation23_spill]] %s2846_s4 }
   0x6   :  { %26 = vsyncpa [#allocation5], 0 }
   0x7   :  { %27 = vsyncpa [#allocation3], 0 }
   0x8   :  { %28 = vsyncpa [#allocation8], 0 }
   0x9   :  { %29 = vsyncpa [#allocation11], 0 }
   0xa   :  { %30 = vsyncpa [#allocation4], 0  ;;  %s69_s23 = sshll.u32 %s2850_s8, 4  ;;  %s2148_s24 = smov [#allocation7]   ;;  %s70_s23 = int_to_ptr.hbm [resolvable:$true] %s69_s23 }
   0xb   :  { %s71_s2 = sshll.u32 %s2148_s24, 4  ;;  %s105_s26 = sshll.u32 %s2857_s15, 4  ;;  %s72_s2 = int_to_ptr.vmem [resolvable:$true] %s71_s2  ;;  %s106_s26 = int_to_ptr.hbm [resolvable:$true] %s105_s26 }
   0xc   :  { %s2149_s27 = smov 128   ;;  %s2150_s28 = smov 8  }
   0xd   :  { %77 = dma.hbm_to_vmem [thread:$0]  %s70_s23, 384, %s72_s2, [#allocation8], %s2149_s27, %s2149_s27, %s2150_s28  }
   0xe   :  { %s2151_s4 = smov [#allocation10]   ;;  %s2871_s8 = sld [smem:[#allocation22_spill]] }
   0xf   :  { %s107_s29 = sshll.u32 %s2151_s4, 4  ;;  %s54_s22 = sshll.u32 %s2848_s6, 4  ;;  %s108_s29 = int_to_ptr.vmem [resolvable:$true] %s107_s29  ;;  %s55_s22 = int_to_ptr.hbm [resolvable:$true] %s54_s22 }
  0x10   :  { %113 = dma.hbm_to_vmem [thread:$0]  %s106_s26, 512, %s108_s29, [#allocation11], %s2149_s27, %s2149_s27, %s2150_s28  }
  0x11   :  { %s2152_s24 = smov [#allocation2]   ;;  %s2153_s23 = smov [#allocation6]  }
  0x12   :  { %s56_s2 = sshll.u32 %s2153_s23, 4  ;;  %s90_s4 = sshll.u32 %s2855_s13, 4  ;;  %s57_s2 = int_to_ptr.vmem [resolvable:$true] %s56_s2  ;;  %s91_s4 = int_to_ptr.hbm [resolvable:$true] %s90_s4 }
  0x13   :  { %62 = dma.hbm_to_vmem [thread:$0]  %s55_s22, 512, %s57_s2, [#allocation3], %s2149_s27, %s2149_s27, %s2150_s28  }
  0x14   :  { %s42_s21 = sshll.u32 %s2871_s8, 4  ;;  %s120_s30 = sshll.u32 %s2859_s17, 4  ;;  %s43_s21 = int_to_ptr.vmem [resolvable:$true] %s42_s21  ;;  %s121_s30 = int_to_ptr.hbm [resolvable:$true] %s120_s30 }
  0x15   :  { %45 = dma.vmem_to_smem %s43_s21, 16, %s2152_s24, [#allocation5]  }
  0x16   :  { %s2154_s6 = smov [#allocation9]   ;;  %s2155_s8 = smov [#allocation12]  }
  0x17   :  { %s92_s0 = sshll.u32 %s2154_s6, 4  ;;  %s122_s13 = sshll.u32 %s2155_s8, 4  ;;  %s93_s0 = int_to_ptr.vmem [resolvable:$true] %s92_s0  ;;  %s123_s13 = int_to_ptr.vmem [resolvable:$true] %s122_s13 }
  0x18   :  { %98 = dma.hbm_to_vmem [thread:$0]  %s91_s4, 3072, %s93_s0, [#allocation8], %s2149_s27, %s2149_s27, %s2150_s28  }
  0x19   :  { %128 = dma.hbm_to_vmem [thread:$0]  %s121_s30, 1024, %s123_s13, [#allocation11], %s2149_s27, %s2149_s27, %s2150_s28  }
  0x1a   :  { %2138 = dma.done.wait [#allocation5], 16  }
  0x1b   :  { %2139 = vsyncadd [#allocation5], 4294967280 }
  0x1c   :  { %2140 = dma.done.wait [#allocation3], 512  }
  0x1d   :  { %2141 = vsyncadd [#allocation3], 4294966784 }
  0x1e   :  { %2142 = dma.done.wait [#allocation8], 3456  }
  0x1f   :  { %2143 = vsyncadd [#allocation8], 4294963840 }
  0x20   :  { %2144 = dma.done.wait [#allocation11], 1536  }
  0x21   :  { %2145 = vsyncadd [#allocation11], 4294965760 }
  0x22   :  { %155 = sfence }
  0x23   :  { %s2872_s15 = sld [smem:[#allocation23_spill]]  ;;  %vm169_vm0 = vcmask 261120   ;;  %v204_v7 = vld [vmem:[#allocation6 + $0x18] sm:$0xff]  ;;  %v203_v9 = vld [vmem:[#allocation6 + $0x10] sm:$0xff]  ;;  %v202_v10 = vld [vmem:[#allocation6 + $0x8] sm:$0xff]  ;;  %vm281_vm1 = vcmask 785408  }
  0x24   :  { %s2873_s3 = sld [smem:[#allocation19_spill]]  ;;  %v201_v11 = vld [vmem:[#allocation6] sm:$0xff]  ;;  %v1918_v13 = vld [vmem:[%s2847_s5] ss:$0 sm:$0xff]  ;;  %vm265_vm2 = vcmask 1043456   ;;  %v273_v32 = vld [vmem:[#allocation7 + $0x8] sm:$0xff] }
  0x25   :  { %s2874_s29 = sld [smem:[#allocation20_spill]]  ;;  %v1919_v20 = vld [vmem:[%s2849_s7] ss:$0 sm:$0xff]  ;;  %v272_v25 = vld [vmem:[#allocation7] sm:$0xff]  ;;  %v274_v39 = vld [vmem:[#allocation7 + $0x10] sm:$0xff]  ;;  %v2156_v48 = vmov 0  }
  0x26   :  { %s2875_s1 = sld [smem:[#allocation21_spill]]  ;;  %v364_v55 = vld [vmem:[%s2851_s9 + $0x30] sm:$0xff]  ;;  %v362_v56 = vld [vmem:[%s2851_s9 + $0x20] sm:$0xff]  ;;  %vm426_vm5 = vcmask 60416   ;;  %vm1149_vm8 = vcmask 1040384   ;;  %vm1152_vm9 = vcmask 1041408  }
  0x27   :  { %s422_s22 = sld [smem:[#allocation2]]  ;;  %v360_v58 = vld [vmem:[%s2851_s9 + $0x10] sm:$0xff]  ;;  %vm1155_vm10 = vcmask 59392   ;;  %vm577_vm11 = vcmask 64516   ;;  %vm504_vm12 = vcmask 64512   ;;  %vm584_vm13 = vcmask 1047556  }
  0x28   :  { %s1852_s27 = sld [smem:[#allocation2 + $0x1]]  ;;  %v1160_v63 = vld [vmem:[%s2853_s11 + $0x10] sm:$0xff]  ;;  %vm1196_vm14 = vcmask 257024   ;;  %vm1219_vm15 = vcmask 1041409   ;;  %s2159_s13 = smov 32  }
  0x29   :  { %v164_v0 = vld [vmem:[%s2872_s15 + $0x18] sm:$0xff]  ;;  %v163_v1 = vld [vmem:[%s2872_s15 + $0x10] sm:$0xff]  ;;  %v162_v2 = vld [vmem:[%s2872_s15 + $0x8] sm:$0xff]  ;;  %s2363_s28 = sld [smem:[#allocation2 + $0x2]]  ;;  %s1818_s4 = sshll.u32 %s2861_s19, 4  ;;  %s1819_s4 = int_to_ptr.hbm [resolvable:$true] %s1818_s4 }
  0x2a   :  { %1901 = vmatpush.msra.mxu1 %v164_v0  ;;  %188 = vmatpush.msra.mxu0 %v164_v0  ;;  %v161_v3 = vld [vmem:[%s2872_s15] sm:$0xff]  ;;  %v2314_v4 = vld [vmem:[%s2873_s3 + $0x8] sm:$0xff]  ;;  %s2404_s6 = sld [smem:[#allocation2 + $0x4]] }
  0x2b   :  { %v2319_v5 = vld [vmem:[%s2874_s29] sm:$0xf]  ;;  %v2324_v6 = vld [vmem:[%s2874_s29 + $0x4] sm:$0xf]  ;;  %s2535_s23 = sld [smem:[#allocation2 + $0x5]] }
  0x2c   :  { %1902 = vmatpush.msra.mxu1 %v163_v1  ;;  %189 = vmatpush.msra.mxu0 %v163_v1  ;;  %211 = vst [vmem:[#allocation1] ss:$2 sm:$0xff] %v2319_v5  ;;  %v2330_v8 = vld [vmem:[%s2873_s3] sm:$0xff]  ;;  %s2371_s3 = sld [smem:[#allocation2 + $0x3]] }
  0x2d   :  { %213 = vst [vmem:[#allocation1 + $0x1] ss:$2 sm:$0xff] %v2324_v6  ;;  %v160_v46 = vld [vmem:[%s2875_s1] sm:$0x3]  ;;  %v423_v52 = vstv %s422_s22 }
  0x2e   :  { %1903 = vmatpush.msra.mxu1 %v162_v2  ;;  %190 = vmatpush.msra.mxu0 %v162_v2  ;;  %v442_v47 = vrot.slane %v160_v46, 1  ;;  %vm444_vm3 = vcmp.eq.f32.partialorder %v160_v46, 0.0  ;;  %v552_v53 = vstv %s1852_s27  ;;  %v358_v0 = vld [vmem:[%s2851_s9] sm:$0xff] }
  0x2f   :  { %v446_v49 = vsel %vm444_vm3, 1, %v2156_v48 }
  0x30   :  { %1904 = vmatpush.msra.mxu1 %v161_v3  ;;  %191 = vmatpush.msra.mxu0 %v161_v3  ;;  %vm445_vm4 = vcmp.eq.f32.partialorder %v442_v47, 0.0  ;;  %v448_v51 = vperm.slane %v446_v49, 0  ;;  %v930_v46 = vstv %s2404_s6 }
  0x31   :  { %1836 = vmatmul.msk.f32.vlgmr.msra.gmra.mxu1 %vm169_vm0, %v2314_v4  ;;  %1835 = vmatmul.msk.f32.vlgmr.msra.gmra.mxu0 %vm169_vm0, %v2330_v8  ;;  %v447_v50 = vsel %vm445_vm4, 1, %v2156_v48 }
  0x32   :  { %229 = vmatpush.msrb.mxu1 %v204_v7  ;;  %v449_v54 = vperm.slane %v447_v50, 0  ;;  %vm2378_vm6 = vcmp.eq.s32.totalorder %v448_v51, 1 }
  0x34   :  { %230 = vmatpush.msrb.mxu1 %v203_v9  ;;  %v214_v12 = vld.sshfl [vmem:[#allocation1] sm:$0xff pattern:$0x75316420]  ;;  %vm2382_vm7 = vcmp.eq.s32.totalorder %v449_v54, 1 }
  0x36   :  { %231 = vmatpush.msrb.mxu1 %v202_v10  ;;  %v692_v10 = vstv %s2363_s28 }
  0x38   :  { %232 = vmatpush.msrb.mxu1 %v201_v11 }
  0x39   :  { %1837 = vmatmul.msk.f32.vlgmr.msrb.gmra.mxu1 %vm169_vm0, %v214_v12 }
  0x3a   :  { %384 = vmatpush.msra.mxu1 %v364_v55 }
  0x3c   :  { %385 = vmatpush.msra.mxu1 %v362_v56 }
  0x3e   :  { %386 = vmatpush.msra.mxu1 %v360_v58 }
  0x40   :  { %387 = vmatpush.msra.mxu1 %v358_v0 }
  0x41   :  { %1846 = vmatmul.msk.f32.vlgmr.msra.gmra.mxu1 %vm169_vm0, %v2330_v8 }
  0x49   :  { %1847 = vmatmul.msk.f32.gmra.mxu1 %vm169_vm0, %v2314_v4 }
  0xae   :  { %v196_v14 = vpop.f32.mrf.mxu1  ;;  %v193_v15 = vpop.f32.mrf.mxu0 }
  0xaf   :  { %v197_v16 = vadd.f32 %v1918_v13, %v196_v14  ;;  %v194_v17 = vadd.f32 %v1918_v13, %v193_v15 }
  0xb1   :  { %v200_v18 = vmax.f32 %v197_v16, 0.0  ;;  %v199_v19 = vmax.f32 %v194_v17, 0.0 }
  0xb3   :  { %1842 = vmatpush.xpose.msk.msra.mxu3 %vm281_vm1, %v200_v18  ;;  %1838 = vmatpush.xpose.msk.msra.mxu2 %vm281_vm1, %v199_v19 }
  0xb6   :  { %v234_v21 = vpop.f32.mrf.mxu1 }
  0xb7   :  { %v235_v22 = vadd.f32 %v1919_v20, %v234_v21  ;;  %v814_v21 = vstv %s2371_s3 }
  0xb9   :  { %v237_v23 = vmax.f32 %v235_v22, 0.0 }
  0xbb   :  { %242 = vst [vmem:[#allocation1 + $0x1] ss:$2 sm:$0xff] %v237_v23  ;;  %v239_v24 = vrot.slane %v237_v23, 4 }
  0xbd   :  { %245 = vst [vmem:[#allocation1 + $0x11] ss:$2 sm:$0xff] %v239_v24 }
  0xc2   :  { %v243_v26 = vld.sshfl [vmem:[#allocation1] sm:$0xff pattern:$0x75316420] }
  0xc3   :  { %250 = vst [vmem:[#allocation1 + $0x1] ss:$2 sm:$0xff] %v237_v23  ;;  %v266_v27 = vsel %vm265_vm2, %v237_v23, %v243_v26 }
  0xc4   :  { %v275_v28 = vmul.f32 %v272_v25, %v266_v27  ;;  %v246_v29 = vld.sshfl [vmem:[#allocation1 + $0x10] sm:$0xff pattern:$0x75316420] }
  0xc5   :  { %253 = vst [vmem:[#allocation1 + $0x11] ss:$2 sm:$0xff] %v239_v24  ;;  %v267_v30 = vsel %vm265_vm2, %v239_v24, %v246_v29 }
  0xc6   :  { %1839 = vmatmul.msk.f32.vlgmr.msra.gmra.mxu2 %vm281_vm1, %v275_v28  ;;  %v278_v31 = vmul.f32 %v272_v25, %v267_v30 }
  0xc8   :  { %1843 = vmatmul.msk.f32.vlgmr.msra.gmra.mxu3 %vm281_vm1, %v278_v31 }
  0xca   :  { %v251_v33 = vld.sshfl [vmem:[#allocation1] sm:$0xff pattern:$0x75316420] }
  0xcb   :  { %258 = vst [vmem:[#allocation1 + $0x1] ss:$2 sm:$0xff] %v237_v23  ;;  %v268_v34 = vsel %vm265_vm2, %v237_v23, %v251_v33 }
  0xcc   :  { %v276_v35 = vmul.f32 %v273_v32, %v268_v34  ;;  %v254_v36 = vld.sshfl [vmem:[#allocation1 + $0x10] sm:$0xff pattern:$0x75316420] }
  0xcd   :  { %261 = vst [vmem:[#allocation1 + $0x11] ss:$2 sm:$0xff] %v239_v24  ;;  %v269_v37 = vsel %vm265_vm2, %v239_v24, %v254_v36 }
  0xce   :  { %1840 = vmatmul.msk.f32.gmra.mxu2 %vm281_vm1, %v276_v35  ;;  %v279_v38 = vmul.f32 %v273_v32, %v269_v37 }
  0xd0   :  { %1844 = vmatmul.msk.f32.gmra.mxu3 %vm281_vm1, %v279_v38 }
  0xd2   :  { %v259_v40 = vld.sshfl [vmem:[#allocation1] sm:$0xff pattern:$0x75316420] }
  0xd3   :  { %1166 = vst [vmem:[#allocation1 + $0x1] ss:$2 sm:$0xff] %v2324_v6  ;;  %v270_v41 = vsel %vm265_vm2, %v237_v23, %v259_v40 }
  0xd4   :  { %1164 = vst [vmem:[#allocation1] ss:$2 sm:$0xff] %v2319_v5  ;;  %v277_v42 = vmul.f32 %v274_v39, %v270_v41  ;;  %v262_v43 = vld.sshfl [vmem:[#allocation1 + $0x10] sm:$0xff pattern:$0x75316420] }
  0xd5   :  { %v271_v44 = vsel %vm265_vm2, %v239_v24, %v262_v43 }
  0xd6   :  { %1841 = vmatmul.msk.f32.gmra.mxu2 %vm281_vm1, %v277_v42  ;;  %v280_v45 = vmul.f32 %v274_v39, %v271_v44 }
  0xd8   :  { %1845 = vmatmul.msk.f32.gmra.mxu3 %vm281_vm1, %v280_v45  ;;  %vm1786_vm1 = vcmask 523264  }
 0x149   :  { %v311_v57 = vpop.f32.mrf.mxu2 }
 0x14a   :  { %v2376_v59 = vadd.f32 %v423_v52, %v311_v57  ;;  %v553_v60 = vadd.f32 %v552_v53, %v311_v57 }
 0x14b   :  { %v349_v62 = vpop.f32.mrf.mxu3 }
 0x14c   :  { %v427_v1 = vsel %vm426_vm5, %v2376_v59, 0.0  ;;  %v557_v2 = vrot.slane %v553_v60, 4  ;;  %v425_v3 = vadd.f32 %v423_v52, %v349_v62  ;;  %v554_v7 = vadd.f32 %v552_v53, %v349_v62 }
 0x14d   :  { %v428_v9 = vrot.slane %v427_v1, 4  ;;  %v2394_v11 = vsel %vm2378_vm6, -1e+30, %v553_v60 }
 0x14e   :  { %v561_v12 = vsel %vm426_vm5, %v557_v2, 0.0  ;;  %v434_v13 = vsel %vm426_vm5, %v425_v3, 0.0  ;;  %v558_v14 = vrot.slane %v554_v7, 4  ;;  %v2400_v15 = vsel %vm2382_vm7, -1e+30, %v425_v3 }
 0x14f   :  { %v429_v16 = vadd.f32 %v428_v9, %v427_v1  ;;  %v562_v17 = vrot.slane %v561_v12, 4  ;;  %v435_v18 = vrot.slane %v434_v13, 4  ;;  %v457_v19 = vsel %vm426_vm5, %v2400_v15, -inf }
 0x150   :  { %v568_v20 = vsel %vm426_vm5, %v558_v14, 0.0  ;;  %458 = vmax.xlane.f32.xlu0 %v457_v19  ;;  %v2412_v22 = vsel %vm2382_vm7, -1e+30, %v554_v7 }
 0x151   :  { %v563_v23 = vadd.f32 %v562_v17, %v561_v12  ;;  %v436_v24 = vadd.f32 %v435_v18, %v434_v13  ;;  %v569_v25 = vrot.slane %v568_v20, 4  ;;  %v314_v26 = vpop.f32.mrf.mxu2  ;;  %v430_v28 = vrot.slane %v429_v16, 2 }
 0x152   :  { %v693_v27 = vadd.f32 %v692_v10, %v314_v26  ;;  %v815_v31 = vadd.f32 %v814_v21, %v314_v26 }
 0x153   :  { %v564_v29 = vrot.slane %v563_v23, 2  ;;  %v570_v30 = vadd.f32 %v569_v25, %v568_v20  ;;  %v352_v32 = vpop.f32.mrf.mxu3  ;;  %v437_v38 = vrot.slane %v436_v24, 2  ;;  %v431_v43 = vadd.f32 %v430_v28, %v429_v16 }
 0x154   :  { %v695_v33 = vsel %vm426_vm5, %v693_v27, 0.0  ;;  %v694_v34 = vadd.f32 %v692_v10, %v352_v32  ;;  %v816_v35 = vadd.f32 %v814_v21, %v352_v32  ;;  %v2417_v36 = vsel %vm2378_vm6, -1e+30, %v693_v27 }
 0x155   :  { %v565_v37 = vadd.f32 %v564_v29, %v563_v23  ;;  %v571_v39 = vrot.slane %v570_v30, 2  ;;  %v696_v40 = vrot.slane %v695_v33, 4  ;;  %v711_v45 = vsel %vm426_vm5, %v2417_v36, -inf }
 0x156   :  { %v702_v41 = vsel %vm426_vm5, %v694_v34, 0.0  ;;  %v2422_v42 = vsel %vm2382_vm7, -1e+30, %v694_v34  ;;  %v2431_v49 = vsel %vm2378_vm6, -1e+30, %v815_v31  ;;  %v438_v51 = vadd.f32 %v437_v38, %v436_v24 }
 0x157   :  { %v572_v44 = vadd.f32 %v571_v39, %v570_v30  ;;  %v697_v47 = vadd.f32 %v696_v40, %v695_v33  ;;  %v703_v48 = vrot.slane %v702_v41, 4  ;;  %v566_v50 = vrot.slane %v565_v37, 1  ;;  %v361_v40 = vld [vmem:[%s2851_s9 + $0x18] sm:$0xff] }
 0x158   :  { %712 = vmax.xlane.f32.xlu0 %v711_v45  ;;  %v432_v56 = vrot.slane %v431_v43, 1  ;;  %v2440_v60 = vsel %vm2382_vm7, -1e+30, %v816_v35  ;;  %v439_v3 = vrot.slane %v438_v51, 1  ;;  %v2461_v25 = vsel %vm2378_vm6, -1e+30, %v2376_v59 }
 0x159   :  { %v2433_v52 = vpop.f32.mrf.mxu2  ;;  %v698_v53 = vrot.slane %v697_v47, 2  ;;  %v704_v54 = vadd.f32 %v703_v48, %v702_v41  ;;  %v573_v57 = vrot.slane %v572_v44, 1  ;;  %v567_v2 = vadd.f32 %v566_v50, %v565_v37  ;;  %v365_v35 = vld [vmem:[%s2851_s9 + $0x38] sm:$0xff]  ;;  %v363_v37 = vld [vmem:[%s2851_s9 + $0x28] sm:$0xff] }
 0x15a   :  { %v931_v55 = vadd.f32 %v930_v46, %v2433_v52  ;;  %v433_v14 = vadd.f32 %v432_v56, %v431_v43  ;;  %v440_v20 = vadd.f32 %v439_v3, %v438_v51  ;;  %v454_v27 = vsel %vm426_vm5, %v2461_v25, -inf  ;;  %407 = vmatpush.msrb.mxu0 %v365_v35 }
 0x15b   :  { %v2436_v58 = vpop.f32.mrf.mxu3  ;;  %v699_v62 = vadd.f32 %v698_v53, %v697_v47  ;;  %v705_v0 = vrot.slane %v704_v54, 2  ;;  %v574_v16 = vadd.f32 %v573_v57, %v572_v44  ;;  %v359_v44 = vld [vmem:[%s2851_s9 + $0x8] sm:$0xff]  ;;  %s2157_s9 = smov 64  }
 0x15c   :  { %v932_v1 = vadd.f32 %v930_v46, %v2436_v58  ;;  %v2445_v7 = vsel %vm2378_vm6, -1e+30, %v931_v55  ;;  %v1150_v19 = vsel %vm1149_vm8, %v433_v14, %v567_v2  ;;  %408 = vmatpush.msrb.mxu0 %v363_v37  ;;  %v389_v55 = vpop.f32.mrf.mxu1 }
 0x15d   :  { %v700_v9 = vrot.slane %v699_v62, 1  ;;  %v706_v10 = vadd.f32 %v705_v0, %v704_v54  ;;  %v935_v12 = vsel %vm426_vm5, %v2445_v7, -inf  ;;  %v1151_v24 = vsel %vm1149_vm8, %v440_v20, %v574_v16  ;;  %v2489_v54 = vld [vmem:[%s2852_s10] sm:$0x3]  ;;  %s2158_s10 = smov 96  }
 0x15e   :  { %v2451_v13 = vsel %vm2382_vm7, -1e+30, %v932_v1  ;;  %936 = vmax.xlane.f32.xlu1 %v935_v12  ;;  %409 = vmatpush.msrb.mxu0 %v361_v40 }
 0x15f   :  { %v701_v17 = vadd.f32 %v700_v9, %v699_v62  ;;  %v707_v18 = vrot.slane %v706_v10, 1 }
 0x160   :  { %410 = vmatpush.msrb.mxu0 %v359_v44 }
 0x161   :  { %v1153_v21 = vsel %vm1152_vm9, %v1150_v19, %v701_v17  ;;  %v708_v23 = vadd.f32 %v707_v18, %v706_v10  ;;  %1848 = vmatmul.msk.f32.vlgmr.msrb.gmra.mxu0 %vm169_vm0, %v2330_v8 }
 0x162   :  { %1156 = vst.msk [vmem:[%s2862_s20] sm:$0x7] %vm1155_vm10, %v1153_v21 }
 0x163   :  { %v1154_v26 = vsel %vm1152_vm9, %v1151_v24, %v708_v23 }
 0x164   :  { %1157 = vst.msk [vmem:[%s2862_s20 + $0x4] sm:$0x7] %vm1155_vm10, %v1154_v26 }
 0x166   :  { %455 = vmax.xlane.f32.xlu1 %v454_v27 }
 0x169   :  { %1849 = vmatmul.msk.f32.gmra.mxu0 %vm169_vm0, %v2314_v4 }
 0x1c3   :  { %v459_v28 = vpop.xlane.xlu0 %458 }
 0x1c4   :  { %v467_v29 = vsel %vm265_vm2, %v459_v28, -inf }
 0x1c5   :  { %v468_v30 = vrot.slane %v467_v29, 4 }
 0x1c7   :  { %v469_v31 = vmax.f32 %v467_v29, %v468_v30 }
 0x1c9   :  { %v470_v32 = vrot.slane %v469_v31, 2 }
 0x1cb   :  { %v471_v33 = vmax.f32 %v469_v31, %v470_v32  ;;  %v713_v34 = vpop.xlane.xlu0 %712 }
 0x1cc   :  { %v717_v59 = vsel %vm265_vm2, %v713_v34, -inf }
 0x1cd   :  { %v472_v38 = vrot.slane %v471_v33, 1  ;;  %v718_v39 = vrot.slane %v717_v59, 4 }
 0x1cf   :  { %v473_v41 = vmax.f32 %v471_v33, %v472_v38  ;;  %v719_v43 = vmax.f32 %v717_v59, %v718_v39  ;;  %v714_v33 = vsel %vm426_vm5, %v2422_v42, -inf  ;;  %v392_v59 = vpop.f32.mrf.mxu1  ;;  %v819_v38 = vsel %vm577_vm11, %v2431_v49, -inf }
 0x1d1   :  { %v475_v45 = vsub.f32 %v2400_v15, %v473_v41  ;;  %v720_v46 = vrot.slane %v719_v43, 2  ;;  %v937_v47 = vpop.xlane.xlu1 %936  ;;  %v368_v15 = vperm.slane %v2489_v54, 0 }
 0x1d2   :  { %v941_v50 = vsel %vm265_vm2, %v937_v47, -inf }
 0x1d3   :  { %v721_v48 = vmax.f32 %v719_v43, %v720_v46  ;;  %v478_v51 = vmul.f32 1.442695, %v475_v45  ;;  %v942_v53 = vrot.slane %v941_v50, 4  ;;  %v390_v0 = vadd.f32 %v389_v55, %v368_v15 }
 0x1d4   :  { %v393_v35 = vadd.f32 %v392_v59, %v368_v15  ;;  %v369_v55 = vperm.slane %v2489_v54, 1 }
 0x1d5   :  { %v722_v56 = vrot.slane %v721_v48, 1  ;;  %1934 = vpow2.f32 %v478_v51  ;;  %v943_v57 = vmax.f32 %v941_v50, %v942_v53  ;;  %v2493_v3 = vmax.f32 %v390_v0, 0.0 }
 0x1d6   :  { %v2523_v37 = vmax.f32 %v393_v35, 0.0 }
 0x1d7   :  { %v723_v62 = vmax.f32 %v721_v48, %v722_v56  ;;  %v944_v1 = vrot.slane %v943_v57, 2  ;;  %523 = vmatpush.msrb.mxu2 %v2493_v3 }
 0x1d8   :  { %546 = vmatpush.msrb.mxu3 %v2523_v37 }
 0x1d9   :  { %v731_v2 = vsub.f32 %v2417_v36, %v723_v62  ;;  %v945_v9 = vmax.f32 %v943_v57, %v944_v1  ;;  %v456_v8 = vpop.xlane.xlu1 %455 }
 0x1da   :  { %v460_v12 = vsel %vm265_vm2, %v456_v8, -inf }
 0x1db   :  { %v2495_v10 = vpop.eup %1934  ;;  %v733_v14 = vmul.f32 1.442695, %v731_v2  ;;  %v946_v16 = vrot.slane %v945_v9, 1  ;;  %v461_v17 = vrot.slane %v460_v12, 4 }
 0x1dc   :  { %v483_v18 = vsel %vm426_vm5, %v2495_v10, 0.0 }
 0x1dd   :  { %484 = vadd.xlane.f32.xlu2 %v483_v18  ;;  %1936 = vpow2.f32 %v733_v14  ;;  %v947_v36 = vmax.f32 %v945_v9, %v946_v16  ;;  %v462_v19 = vmax.f32 %v460_v12, %v461_v17 }
 0x1de   :  { %v412_v56 = vpop.f32.mrf.mxu0 }
 0x1df   :  { %v955_v20 = vsub.f32 %v2445_v7, %v947_v36  ;;  %v463_v21 = vrot.slane %v462_v19, 2  ;;  %v2540_v2 = vadd.f32 %v412_v56, %v369_v55  ;;  %v1158_v56 = vld [vmem:[%s2853_s11] sm:$0xff] }
 0x1e1   :  { %v464_v23 = vmax.f32 %v462_v19, %v463_v21  ;;  %v957_v24 = vmul.f32 1.442695, %v955_v20  ;;  %v419_v17 = vmax.f32 %v2540_v2, 0.0  ;;  %v1032_v19 = vstv %s2535_s23  ;;  %s2160_s23 = smov [#allocation13]  }
 0x1e2   :  { %v1034_v20 = vadd.f32 %v1032_v19, %v2436_v58  ;;  %s1816_s2 = sshll.u32 %s2160_s23, 4  ;;  %s1817_s2 = int_to_ptr.vmem [resolvable:$true] %s1816_s2 }
 0x1e3   :  { %v2504_v26 = vpop.eup %1936  ;;  %v465_v27 = vrot.slane %v464_v23, 1  ;;  %1938 = vpow2.f32 %v957_v24 }
 0x1e4   :  { %v737_v28 = vsel %vm426_vm5, %v2504_v26, 0.0  ;;  %v2555_v58 = vsel %vm2382_vm7, -1e+30, %v1034_v20 }
 0x1e5   :  { %738 = vadd.xlane.f32.xlu2 %v737_v28  ;;  %v466_v29 = vmax.f32 %v464_v23, %v465_v27 }
 0x1e7   :  { %v474_v4 = vsub.f32 %v2461_v25, %v466_v29  ;;  %v938_v25 = vsel %vm426_vm5, %v2451_v13, -inf }
 0x1e9   :  { %v2509_v30 = vpop.eup %1938  ;;  %v476_v31 = vmul.f32 1.442695, %v474_v4 }
 0x1ea   :  { %v961_v7 = vsel %vm426_vm5, %v2509_v30, 0.0 }
 0x1eb   :  { %962 = vadd.xlane.f32.xlu0 %v961_v7  ;;  %1940 = vpow2.f32 %v476_v31 }
 0x1f1   :  { %v2513_v32 = vpop.eup %1940 }
 0x1f2   :  { %v480_v34 = vsel %vm426_vm5, %v2513_v32, 0.0 }
 0x1f3   :  { %715 = vmax.xlane.f32.xlu0 %v714_v33  ;;  %481 = vadd.xlane.f32.xlu1 %v480_v34 }
 0x1fb   :  { %939 = vmax.xlane.f32.xlu1 %v938_v25 }
 0x1fd   :  { %761 = vrot.lane.b32.xlu2 %v2493_v3, %s2157_s9 }
 0x226   :  { %820 = vmax.xlane.f32.xlu2 %v819_v38  ;;  %v1161_v38 = vld [vmem:[%s2853_s11 + $0x18] sm:$0xff] }
 0x23e   :  { %638 = vrot.lane.b32.xlu2 %v2493_v3, %s2158_s10 }
 0x246   :  { %666 = vrot.lane.b32.xlu2 %v2523_v37, %s2158_s10 }
 0x250   :  { %v485_v39 = vpop.xlane.xlu2 %484 }
 0x251   :  { %v493_v40 = vsel %vm265_vm2, %v485_v39, 0.0  ;;  %v1040_v39 = vsel %vm577_vm11, %v2555_v58, -inf }
 0x252   :  { %v494_v41 = vrot.slane %v493_v40, 4 }
 0x254   :  { %v495_v43 = vadd.f32 %v494_v41, %v493_v40 }
 0x256   :  { %v496_v44 = vrot.slane %v495_v43, 2 }
 0x258   :  { %v497_v45 = vadd.f32 %v496_v44, %v495_v43  ;;  %v739_v46 = vpop.xlane.xlu2 %738 }
 0x259   :  { %v743_v47 = vsel %vm265_vm2, %v739_v46, 0.0 }
 0x25a   :  { %v498_v48 = vrot.slane %v497_v45, 1  ;;  %v744_v50 = vrot.slane %v743_v47, 4 }
 0x25c   :  { %v499_v51 = vadd.f32 %v498_v48, %v497_v45  ;;  %v745_v53 = vadd.f32 %v744_v50, %v743_v47  ;;  %v1159_v47 = vld [vmem:[%s2853_s11 + $0x8] sm:$0xff] }
 0x25e   :  { %1942 = vrcp.f32 %v499_v51  ;;  %v746_v15 = vrot.slane %v745_v53, 2  ;;  %v963_v57 = vpop.xlane.xlu0 %962 }
 0x25f   :  { %v967_v0 = vsel %vm265_vm2, %v963_v57, 0.0 }
 0x260   :  { %v747_v62 = vadd.f32 %v746_v15, %v745_v53  ;;  %v762_v1 = vpop.permute.xlu2 %761  ;;  %v968_v9 = vrot.slane %v967_v0, 4 }
 0x261   :  { %782 = vmatpush.msra.mxu3 %v762_v1 }
 0x262   :  { %v748_v8 = vrot.slane %v747_v62, 1  ;;  %v969_v12 = vadd.f32 %v968_v9, %v967_v0 }
 0x264   :  { %v1943_v14 = vpop.eup %1942  ;;  %v749_v16 = vadd.f32 %v748_v8, %v747_v62  ;;  %v970_v18 = vrot.slane %v969_v12, 2 }
 0x265   :  { %v503_v36 = vmul.f32 %v1943_v14, %v2495_v10 }
 0x266   :  { %1944 = vrcp.f32 %v749_v16  ;;  %v971_v21 = vadd.f32 %v970_v18, %v969_v12  ;;  %v716_v23 = vpop.xlane.xlu0 %715  ;;  %v482_v24 = vpop.xlane.xlu1 %481  ;;  %v1167_v16 = vld.sshfl [vmem:[#allocation1] sm:$0xff pattern:$0x75316420] }
 0x267   :  { %1851 = vmatmul.msk.f32.vlgmr.msrb.gmra.mxu3 %vm504_vm12, %v503_v36  ;;  %v724_v27 = vsel %vm265_vm2, %v716_v23, -inf  ;;  %v486_v28 = vsel %vm265_vm2, %v482_v24, 0.0 }
 0x268   :  { %1003 = vmatpush.msrb.mxu3 %v419_v17  ;;  %v972_v29 = vrot.slane %v971_v21, 1  ;;  %v725_v4 = vrot.slane %v724_v27, 4  ;;  %v487_v10 = vrot.slane %v486_v28, 4 }
 0x26a   :  { %v973_v31 = vadd.f32 %v972_v29, %v971_v21  ;;  %v726_v7 = vmax.f32 %v724_v27, %v725_v4  ;;  %v488_v33 = vadd.f32 %v487_v10, %v486_v28  ;;  %v1033_v21 = vadd.f32 %v1032_v19, %v2433_v52 }
 0x26b   :  { %v581_v52 = vsel %vm577_vm11, %v2412_v22, -inf }
 0x26c   :  { %v1945_v34 = vpop.eup %1944  ;;  %1946 = vrcp.f32 %v973_v31  ;;  %v727_v25 = vrot.slane %v726_v7, 2  ;;  %v489_v59 = vrot.slane %v488_v33, 2  ;;  %v2598_v23 = vsel %vm2378_vm6, -1e+30, %v1033_v21 }
 0x26d   :  { %v759_v35 = vmul.f32 %v1945_v34, %v2504_v26  ;;  %v1037_v24 = vsel %vm577_vm11, %v2598_v23, -inf }
 0x26e   :  { %v728_v40 = vmax.f32 %v726_v7, %v727_v25  ;;  %v490_v41 = vadd.f32 %v489_v59, %v488_v33  ;;  %v940_v43 = vpop.xlane.xlu1 %939 }
 0x26f   :  { %1041 = vmax.xlane.f32.xlu2 %v1040_v39  ;;  %1856 = vmatmul.msk.f32.vlgmr.msra.gmra.mxu3 %vm504_vm12, %v759_v35  ;;  %v948_v44 = vsel %vm265_vm2, %v940_v43, -inf }
 0x270   :  { %1182 = vmatpush.msra.mxu3 %v1161_v38  ;;  %v729_v26 = vrot.slane %v728_v40, 1  ;;  %v491_v45 = vrot.slane %v490_v41, 1  ;;  %v949_v46 = vrot.slane %v948_v44, 4 }
 0x272   :  { %1183 = vmatpush.msra.mxu3 %v1160_v63  ;;  %v1947_v48 = vpop.eup %1946  ;;  %v730_v50 = vmax.f32 %v728_v40, %v729_v26  ;;  %v492_v51 = vadd.f32 %v491_v45, %v490_v41  ;;  %v950_v53 = vmax.f32 %v948_v44, %v949_v46 }
 0x273   :  { %v983_v62 = vmul.f32 %v1947_v48, %v2509_v30 }
 0x274   :  { %1184 = vmatpush.msra.mxu3 %v1159_v47  ;;  %v732_v15 = vsub.f32 %v2422_v42, %v730_v50  ;;  %1948 = vrcp.f32 %v492_v51  ;;  %v951_v57 = vrot.slane %v950_v53, 2 }
 0x276   :  { %1185 = vmatpush.msra.mxu3 %v1158_v56  ;;  %v952_v0 = vmax.f32 %v950_v53, %v951_v57  ;;  %v735_v1 = vmul.f32 1.442695, %v732_v15 }
 0x277   :  { %1862 = vmatmul.msk.f32.vlgmr.msrb.gmra.mxu3 %vm504_vm12, %v983_v62 }
 0x278   :  { %v953_v9 = vrot.slane %v952_v0, 1  ;;  %1950 = vpow2.f32 %v735_v1 }
 0x27a   :  { %v1949_v8 = vpop.eup %1948  ;;  %v954_v12 = vmax.f32 %v952_v0, %v953_v9 }
 0x27b   :  { %v502_v14 = vmul.f32 %v1949_v8, %v2513_v32 }
 0x27c   :  { %v956_v18 = vsub.f32 %v2451_v13, %v954_v12  ;;  %v578_v13 = vsel %vm577_vm11, %v2394_v11, -inf  ;;  %v415_v12 = vpop.f32.mrf.mxu0 }
 0x27d   :  { %1850 = vmatmul.msk.f32.vlgmr.msrb.gmra.mxu2 %vm504_vm12, %v502_v14  ;;  %v1920_v14 = vld [vmem:[%s2854_s12] ss:$0 sm:$0xff] }
 0x27e   :  { %v2580_v42 = vpop.eup %1950  ;;  %v959_v30 = vmul.f32 1.442695, %v956_v18 }
 0x27f   :  { %1867 = vmatmul.msk.f32.vlgmr.msra.gmra.mxu3 %vm169_vm0, %v1167_v16  ;;  %v740_v36 = vsel %vm426_vm5, %v2580_v42, 0.0 }
 0x280   :  { %741 = vadd.xlane.f32.xlu0 %v740_v36  ;;  %1952 = vpow2.f32 %v959_v30  ;;  %v416_v30 = vadd.f32 %v415_v12, %v369_v55 }
 0x286   :  { %v2585_v20 = vpop.eup %1952 }
 0x287   :  { %v964_v32 = vsel %vm426_vm5, %v2585_v20, 0.0 }
 0x288   :  { %965 = vadd.xlane.f32.xlu1 %v964_v32 }
 0x290   :  { %579 = vmax.xlane.f32.xlu1 %v578_v13 }
 0x294   :  { %787 = vrot.lane.b32.xlu0 %v2523_v37, %s2157_s9 }
 0x298   :  { %1038 = vmax.xlane.f32.xlu1 %v1037_v24 }
 0x299   :  { %v821_v27 = vpop.xlane.xlu2 %820 }
 0x29a   :  { %v825_v28 = vsel %vm584_vm13, %v821_v27, -inf }
 0x29b   :  { %v826_v29 = vrot.slane %v825_v28, 4 }
 0x29d   :  { %v827_v4 = vmax.f32 %v825_v28, %v826_v29  ;;  %v421_v29 = vmax.f32 %v416_v30, 0.0 }
 0x29f   :  { %v828_v10 = vrot.slane %v827_v4, 2 }
 0x2a0   :  { %582 = vmax.xlane.f32.xlu1 %v581_v52 }
 0x2a1   :  { %v829_v19 = vmax.f32 %v827_v4, %v828_v10  ;;  %v639_v31 = vpop.permute.xlu2 %638 }
 0x2a2   :  { %658 = vmatpush.msrb.mxu1 %v639_v31 }
 0x2a3   :  { %v830_v61 = vrot.slane %v829_v19, 1 }
 0x2a5   :  { %v831_v7 = vmax.f32 %v829_v19, %v830_v61 }
 0x2a7   :  { %v839_v33 = vsub.f32 %v2431_v49, %v831_v7 }
 0x2a9   :  { %v841_v34 = vmul.f32 1.442695, %v839_v33  ;;  %v667_v25 = vpop.permute.xlu2 %666 }
 0x2aa   :  { %686 = vmatpush.msra.mxu2 %v667_v25 }
 0x2ab   :  { %1954 = vpow2.f32 %v841_v34 }
 0x2b1   :  { %v2606_v59 = vpop.eup %1954 }
 0x2b2   :  { %v845_v35 = vsel %vm577_vm11, %v2606_v59, 0.0 }
 0x2b3   :  { %846 = vadd.xlane.f32.xlu1 %v845_v35  ;;  %v1214_v35 = vld [vmem:[#allocation9 + $0x18] sm:$0xff] }
 0x2e2   :  { %v1042_v38 = vpop.xlane.xlu2 %1041 }
 0x2e3   :  { %v1050_v39 = vsel %vm584_vm13, %v1042_v38, -inf }
 0x2e4   :  { %v1051_v40 = vrot.slane %v1050_v39, 4 }
 0x2e6   :  { %v1052_v41 = vmax.f32 %v1050_v39, %v1051_v40 }
 0x2e8   :  { %v1053_v43 = vrot.slane %v1052_v41, 2 }
 0x2ea   :  { %v1054_v63 = vmax.f32 %v1052_v41, %v1053_v43  ;;  %v548_v44 = vpop.f32.mrf.mxu3  ;;  %v1213_v41 = vld [vmem:[#allocation9 + $0x10] sm:$0xff] }
 0x2ec   :  { %v1055_v26 = vrot.slane %v1054_v63, 1 }
 0x2ee   :  { %v1056_v49 = vmax.f32 %v1054_v63, %v1055_v26 }
 0x2f0   :  { %v1058_v45 = vsub.f32 %v2555_v58, %v1056_v49 }
 0x2f2   :  { %v2612_v46 = vpop.f32.mrf.mxu3  ;;  %v1061_v47 = vmul.f32 1.442695, %v1058_v45  ;;  %v1212_v45 = vld [vmem:[#allocation9 + $0x8] sm:$0xff] }
 0x2f3   :  { %v742_v48 = vpop.xlane.xlu0 %741 }
 0x2f4   :  { %1956 = vpow2.f32 %v1061_v47  ;;  %v750_v50 = vsel %vm265_vm2, %v742_v48, 0.0 }
 0x2f5   :  { %v751_v51 = vrot.slane %v750_v50, 4 }
 0x2f7   :  { %v752_v53 = vadd.f32 %v751_v51, %v750_v50  ;;  %v1211_v51 = vld [vmem:[#allocation9] sm:$0xff] }
 0x2f9   :  { %v753_v15 = vrot.slane %v752_v53, 2 }
 0x2fa   :  { %v2615_v56 = vpop.eup %1956  ;;  %v2617_v57 = vpop.f32.mrf.mxu3 }
 0x2fb   :  { %v1066_v62 = vsel %vm577_vm11, %v2615_v56, 0.0  ;;  %v754_v0 = vadd.f32 %v753_v15, %v752_v53  ;;  %v966_v1 = vpop.xlane.xlu1 %965 }
 0x2fc   :  { %1067 = vadd.xlane.f32.xlu2 %v1066_v62  ;;  %v974_v58 = vsel %vm265_vm2, %v966_v1, 0.0 }
 0x2fd   :  { %v755_v9 = vrot.slane %v754_v0, 1  ;;  %v975_v8 = vrot.slane %v974_v58, 4 }
 0x2ff   :  { %v756_v16 = vadd.f32 %v755_v9, %v754_v0  ;;  %v976_v18 = vadd.f32 %v975_v8, %v974_v58 }
 0x300   :  { %v525_v10 = vpop.f32.mrf.mxu2 }
 0x301   :  { %1958 = vrcp.f32 %v756_v16  ;;  %v977_v36 = vrot.slane %v976_v18, 2 }
 0x302   :  { %v1187_v32 = vpop.f32.mrf.mxu3 }
 0x303   :  { %v1188_v13 = vadd.f32 %v1920_v14, %v1187_v32  ;;  %v978_v21 = vadd.f32 %v977_v36, %v976_v18  ;;  %v580_v24 = vpop.xlane.xlu1 %579 }
 0x304   :  { %v585_v28 = vsel %vm584_vm13, %v580_v24, -inf }
 0x305   :  { %v1190_v27 = vmax.f32 %v1188_v13, 0.0  ;;  %v979_v4 = vrot.slane %v978_v21, 1  ;;  %v586_v52 = vrot.slane %v585_v28, 4 }
 0x306   :  { %v788_v61 = vpop.permute.xlu0 %787 }
 0x307   :  { %v1192_v19 = vrot.slane %v1190_v27, 4  ;;  %v1194_v31 = vmul.f32 %v1190_v27, %v525_v10  ;;  %v1959_v7 = vpop.eup %1958  ;;  %v980_v54 = vadd.f32 %v979_v4, %v978_v21  ;;  %v587_v55 = vmax.f32 %v585_v28, %v586_v52  ;;  %808 = vmatpush.msra.mxu0 %v788_v61 }
 0x308   :  { %v760_v25 = vmul.f32 %v1959_v7, %v2580_v42 }
 0x309   :  { %v1195_v33 = vmul.f32 %v1192_v19, %v548_v44  ;;  %v1197_v34 = vsel %vm1196_vm14, %v1194_v31, 0.0  ;;  %1026 = vmatpush.msrb.mxu0 %v421_v29  ;;  %1960 = vrcp.f32 %v980_v54  ;;  %v588_v39 = vrot.slane %v587_v55, 2 }
 0x30a   :  { %v1198_v38 = vrot.slane %v1197_v34, 4  ;;  %1857 = vmatmul.msk.f32.vlgmr.msra.gmra.mxu0 %vm504_vm12, %v760_v25 }
 0x30b   :  { %v1204_v40 = vsel %vm1196_vm14, %v1195_v33, 0.0  ;;  %v589_v26 = vmax.f32 %v587_v55, %v588_v39  ;;  %v1039_v49 = vpop.xlane.xlu1 %1038  ;;  %1235 = vmatpush.msra.mxu0 %v1214_v35 }
 0x30c   :  { %v1199_v43 = vadd.f32 %v1198_v38, %v1197_v34  ;;  %v1205_v63 = vrot.slane %v1204_v40, 4  ;;  %v1043_v44 = vsel %vm584_vm13, %v1039_v49, -inf }
 0x30d   :  { %v590_v48 = vrot.slane %v589_v26, 1  ;;  %v1044_v50 = vrot.slane %v1043_v44, 4  ;;  %1236 = vmatpush.msra.mxu0 %v1213_v41 }
 0x30e   :  { %v1200_v47 = vrot.slane %v1199_v43, 2  ;;  %v1206_v42 = vadd.f32 %v1205_v63, %v1204_v40 }
 0x30f   :  { %v1961_v53 = vpop.eup %1960  ;;  %v591_v0 = vmax.f32 %v589_v26, %v590_v48  ;;  %v1045_v1 = vmax.f32 %v1043_v44, %v1044_v50  ;;  %1237 = vmatpush.msra.mxu0 %v1212_v45  ;;  %v1921_v26 = vld [vmem:[%s2856_s14] ss:$0 sm:$0xff] }
 0x310   :  { %v1201_v15 = vadd.f32 %v1200_v47, %v1199_v43  ;;  %v1207_v62 = vrot.slane %v1206_v42, 2  ;;  %v984_v58 = vmul.f32 %v1961_v53, %v2585_v20 }
 0x311   :  { %v599_v12 = vsub.f32 %v2394_v11, %v591_v0  ;;  %v1046_v14 = vrot.slane %v1045_v1, 2  ;;  %1238 = vmatpush.msra.mxu0 %v1211_v51 }
 0x312   :  { %v1202_v9 = vrot.slane %v1201_v15, 1  ;;  %v1208_v8 = vadd.f32 %v1207_v62, %v1206_v42  ;;  %1863 = vmatmul.msk.f32.vlgmr.msrb.gmra.mxu0 %vm504_vm12, %v984_v58 }
 0x313   :  { %v1047_v18 = vmax.f32 %v1045_v1, %v1046_v14  ;;  %v583_v30 = vpop.xlane.xlu1 %582  ;;  %v601_v36 = vmul.f32 1.442695, %v599_v12 }
 0x314   :  { %v1209_v16 = vrot.slane %v1208_v8, 1  ;;  %1124 = vrot.lane.b32.xlu2 %v421_v29, %s2158_s10  ;;  %v1203_v32 = vadd.f32 %v1202_v9, %v1201_v15  ;;  %v592_v13 = vsel %vm584_vm13, %v583_v30, -inf }
 0x315   :  { %v1048_v21 = vrot.slane %v1047_v18, 1  ;;  %v593_v20 = vrot.slane %v592_v13, 4  ;;  %1962 = vpow2.f32 %v601_v36 }
 0x316   :  { %v1210_v24 = vadd.f32 %v1209_v16, %v1208_v8 }
 0x317   :  { %v1049_v27 = vmax.f32 %v1047_v18, %v1048_v21  ;;  %v594_v11 = vmax.f32 %v592_v13, %v593_v20 }
 0x318   :  { %v1220_v28 = vsel %vm1219_vm15, %v1210_v24, %v1203_v32 }
 0x319   :  { %v1057_v4 = vsub.f32 %v2598_v23, %v1049_v27  ;;  %v595_v10 = vrot.slane %v594_v11, 2 }
 0x31a   :  { %1868 = vmatmul.msk.f32.vlgmr.msra.gmra.mxu0 %vm169_vm0, %v1220_v28 }
 0x31b   :  { %v2641_v52 = vpop.eup %1962  ;;  %v596_v29 = vmax.f32 %v594_v11, %v595_v10  ;;  %v1059_v19 = vmul.f32 1.442695, %v1057_v4 }
 0x31c   :  { %v605_v31 = vsel %vm577_vm11, %v2641_v52, 0.0 }
 0x31d   :  { %v597_v61 = vrot.slane %v596_v29, 1  ;;  %606 = vadd.xlane.f32.xlu0 %v605_v31  ;;  %1964 = vpow2.f32 %v1059_v19 }
 0x31f   :  { %v598_v7 = vmax.f32 %v596_v29, %v597_v61 }
 0x321   :  { %v600_v54 = vsub.f32 %v2412_v22, %v598_v7  ;;  %v822_v22 = vsel %vm577_vm11, %v2440_v60, -inf }
 0x323   :  { %v2646_v55 = vpop.eup %1964  ;;  %v603_v33 = vmul.f32 1.442695, %v600_v54 }
 0x324   :  { %v1063_v23 = vsel %vm577_vm11, %v2646_v55, 0.0 }
 0x325   :  { %1064 = vadd.xlane.f32.xlu1 %v1063_v23  ;;  %1966 = vpow2.f32 %v603_v33 }
 0x326   :  { %v847_v38 = vpop.xlane.xlu1 %846 }
 0x327   :  { %v853_v39 = vrot.slane %v847_v38, 4  ;;  %v1872_v38 = vld [vmem:[%s2853_s11 + $0x38] sm:$0xff] }
 0x329   :  { %v857_v41 = vsel %vm265_vm2, %v853_v39, 0.0 }
 0x32b   :  { %v2650_v34 = vpop.eup %1966 }
 0x32c   :  { %v608_v25 = vsel %vm577_vm11, %v2650_v34, 0.0 }
 0x32d   :  { %609 = vadd.xlane.f32.xlu1 %v608_v25 }
 0x331   :  { %1096 = vrot.lane.b32.xlu0 %v419_v17, %s2158_s10  ;;  %v858_v17 = vrot.slane %v857_v41, 4 }
 0x333   :  { %v859_v44 = vadd.f32 %v858_v17, %v857_v41  ;;  %v1870_v41 = vld [vmem:[%s2853_s11 + $0x28] sm:$0xff] }
 0x335   :  { %v860_v15 = vrot.slane %v859_v44, 2 }
 0x337   :  { %v861_v14 = vadd.f32 %v860_v15, %v859_v44 }
 0x339   :  { %v862_v36 = vrot.slane %v861_v14, 1 }
 0x33b   :  { %v863_v24 = vadd.f32 %v862_v36, %v861_v14 }
 0x346   :  { %877 = vrot.lane.b32.xlu1 %v2493_v3, %s2159_s13 }
 0x370   :  { %823 = vmax.xlane.f32.xlu1 %v822_v22 }
 0x387   :  { %v2660_v35 = vpop.f32.mrf.mxu0 }
 0x389   :  { %904 = vrot.lane.b32.xlu1 %v2523_v37, %s2159_s13 }
 0x38f   :  { %v2663_v40 = vpop.f32.mrf.mxu0 }
 0x390   :  { %v607_v43 = vpop.xlane.xlu0 %606 }
 0x391   :  { %v613_v2 = vrot.slane %v607_v43, 4 }
 0x393   :  { %v617_v63 = vsel %vm265_vm2, %v613_v2, 0.0  ;;  %v1869_v2 = vld [vmem:[%s2853_s11 + $0x20] sm:$0xff] }
 0x394   :  { %v618_v3 = vrot.slane %v617_v63, 4 }
 0x396   :  { %v619_v49 = vadd.f32 %v618_v3, %v617_v63 }
 0x397   :  { %v1240_v45 = vpop.f32.mrf.mxu0 }
 0x398   :  { %v620_v47 = vrot.slane %v619_v49, 2  ;;  %v1241_v37 = vadd.f32 %v1921_v26, %v1240_v45  ;;  %v1065_v42 = vpop.xlane.xlu1 %1064 }
 0x399   :  { %v1071_v48 = vrot.slane %v1065_v42, 4 }
 0x39a   :  { %v621_v50 = vadd.f32 %v620_v47, %v619_v49  ;;  %v1244_v51 = vrot.slane %v1241_v37, 1  ;;  %v1245_v53 = vperm.slane %v1241_v37, 0 }
 0x39b   :  { %v1075_v62 = vsel %vm265_vm2, %v1071_v48, 0.0  ;;  %v1068_v48 = vpop.xlane.xlu2 %1067 }
 0x39c   :  { %v622_v0 = vrot.slane %v621_v50, 1  ;;  %v1246_v1 = vperm.slane %v1244_v51, 0  ;;  %v2672_v58 = vadd.f32 %v1245_v53, %v2319_v5  ;;  %v1076_v9 = vrot.slane %v1075_v62, 4 }
 0x39e   :  { %v623_v8 = vadd.f32 %v622_v0, %v621_v50  ;;  %v2675_v12 = vadd.f32 %v1246_v1, %v2324_v6  ;;  %1260 = vst [vmem:[#allocation1] ss:$2 sm:$0xff] %v2672_v58  ;;  %v1077_v16 = vadd.f32 %v1076_v9, %v1075_v62  ;;  %v1072_v9 = vrot.slane %v1068_v48, 4 }
 0x3a0   :  { %1968 = vrcp.f32 %v623_v8  ;;  %1262 = vst [vmem:[#allocation1 + $0x1] ss:$2 sm:$0xff] %v2675_v12  ;;  %v610_v18 = vpop.xlane.xlu1 %609  ;;  %v1078_v32 = vrot.slane %v1077_v16, 2  ;;  %v1082_v8 = vsel %vm265_vm2, %v1072_v9, 0.0  ;;  %v1923_v9 = vld [vmem:[%s2856_s14 + $0x1] ss:$0 sm:$0xff] }
 0x3a1   :  { %v614_v30 = vrot.slane %v610_v18, 4  ;;  %1970 = vrcp.f32 %v863_v24  ;;  %v1083_v14 = vrot.slane %v1082_v8, 4 }
 0x3a2   :  { %v1079_v27 = vadd.f32 %v1078_v32, %v1077_v16 }
 0x3a3   :  { %v624_v13 = vsel %vm265_vm2, %v614_v30, 0.0  ;;  %v1097_v39 = vpop.permute.xlu0 %1096  ;;  %v1125_v53 = vpop.permute.xlu2 %1124  ;;  %v1084_v30 = vadd.f32 %v1083_v14, %v1082_v8 }
 0x3a4   :  { %v625_v5 = vrot.slane %v624_v13, 4  ;;  %v1080_v10 = vrot.slane %v1079_v27, 1 }
 0x3a6   :  { %v1969_v21 = vpop.eup %1968  ;;  %v626_v20 = vadd.f32 %v625_v5, %v624_v13  ;;  %v1081_v31 = vadd.f32 %v1080_v10, %v1079_v27 }
 0x3a7   :  { %v633_v6 = vmul.f32 %v1969_v21, %v2641_v52  ;;  %v1971_v61 = vpop.eup %1970  ;;  %v1263_v17 = vld.sshfl [vmem:[#allocation1] sm:$0xff pattern:$0x75316420]  ;;  %v1085_v21 = vrot.slane %v1084_v30, 2 }
 0x3a8   :  { %v627_v11 = vrot.slane %v626_v20, 2  ;;  %v873_v7 = vmul.f32 %v1971_v61, %v2606_v59  ;;  %v1871_v59 = vld [vmem:[%s2853_s11 + $0x30] sm:$0xff] }
 0x3a9   :  { %v636_v28 = vrot.slane %v633_v6, 4  ;;  %v1086_v6 = vadd.f32 %v1085_v21, %v1084_v30  ;;  %v1403_v21 = vld [vmem:[#allocation9 + $0x48] sm:$0xff] }
 0x3aa   :  { %v628_v4 = vadd.f32 %v627_v11, %v626_v20  ;;  %v876_v52 = vrot.slane %v873_v7, 4 }
 0x3ab   :  { %1853 = vmatmul.msk.f32.vlgmr.msrb.gmra.mxu1 %vm504_vm12, %v636_v28 }
 0x3ac   :  { %v629_v29 = vrot.slane %v628_v4, 1 }
 0x3ae   :  { %v630_v19 = vadd.f32 %v629_v29, %v628_v4  ;;  %v1087_v29 = vrot.slane %v1086_v6, 1 }
 0x3b0   :  { %1972 = vrcp.f32 %v630_v19 }
 0x3b1   :  { %1974 = vrcp.f32 %v1081_v31 }
 0x3b6   :  { %v1973_v54 = vpop.eup %1972 }
 0x3b7   :  { %v634_v33 = vmul.f32 %v1973_v54, %v2650_v34  ;;  %v1975_v25 = vpop.eup %1974  ;;  %v1088_v54 = vadd.f32 %v1087_v29, %v1086_v6 }
 0x3b8   :  { %v878_v23 = vpop.permute.xlu1 %877  ;;  %v1091_v34 = vmul.f32 %v1975_v25, %v2646_v55 }
 0x3b9   :  { %897 = vmatpush.msra.mxu1 %v878_v23  ;;  %v664_v22 = vrot.slane %v634_v33, 4 }
 0x3ba   :  { %1859 = vmatmul.msk.f32.vlgmr.msra.gmra.mxu1 %vm504_vm12, %v876_v52  ;;  %v1094_v43 = vrot.slane %v1091_v34, 4  ;;  %v1310_v34 = vld [vmem:[#allocation9 + $0x38] sm:$0xff] }
 0x3bb   :  { %1116 = vmatpush.msrb.mxu1 %v1097_v39  ;;  %1854 = vmatmul.msk.f32.vlgmr.msra.gmra.mxu2 %vm504_vm12, %v664_v22 }
 0x3bd   :  { %1278 = vmatpush.msra.mxu1 %v1872_v38 }
 0x3bf   :  { %1279 = vmatpush.msra.mxu1 %v1871_v59 }
 0x3c1   :  { %1280 = vmatpush.msra.mxu1 %v1870_v41 }
 0x3c2   :  { %1865 = vmatmul.msk.f32.vlgmr.msrb.gmra.mxu1 %vm504_vm12, %v1094_v43 }
 0x3c3   :  { %1281 = vmatpush.msra.mxu1 %v1869_v2  ;;  %v1309_v2 = vld [vmem:[#allocation9 + $0x30] sm:$0xff] }
 0x3ca   :  { %1873 = vmatmul.msk.f32.vlgmr.msra.gmra.mxu1 %vm169_vm0, %v1263_v17 }
 0x3e3   :  { %v824_v63 = vpop.xlane.xlu1 %823 }
 0x3e4   :  { %v832_v55 = vsel %vm584_vm13, %v824_v63, -inf }
 0x3e5   :  { %v833_v3 = vrot.slane %v832_v55, 4 }
 0x3e7   :  { %v834_v26 = vmax.f32 %v832_v55, %v833_v3  ;;  %v1308_v55 = vld [vmem:[#allocation9 + $0x28] sm:$0xff] }
 0x3e9   :  { %v835_v49 = vrot.slane %v834_v26, 2 }
 0x3eb   :  { %v836_v44 = vmax.f32 %v834_v26, %v835_v49  ;;  %v1307_v26 = vld [vmem:[#allocation9 + $0x20] sm:$0xff] }
 0x3ed   :  { %v837_v45 = vrot.slane %v836_v44, 1 }
 0x3ef   :  { %v838_v47 = vmax.f32 %v836_v44, %v837_v45 }
 0x3f1   :  { %v840_v37 = vsub.f32 %v2440_v60, %v838_v47  ;;  %v1922_v60 = vld [vmem:[%s2854_s12 + $0x1] ss:$0 sm:$0xff] }
 0x3f3   :  { %v843_v42 = vmul.f32 1.442695, %v840_v37 }
 0x3f5   :  { %1976 = vpow2.f32 %v843_v42 }
 0x3fb   :  { %v1977_v50 = vpop.eup %1976  ;;  %v905_v51 = vpop.permute.xlu1 %904 }
 0x3fc   :  { %924 = vmatpush.msrb.mxu2 %v905_v51  ;;  %v848_v15 = vsel %vm577_vm11, %v1977_v50, 0.0  ;;  %v1876_v51 = vld [vmem:[%s2853_s11 + $0x48] sm:$0xff] }
 0x3fd   :  { %849 = vadd.xlane.f32.xlu0 %v848_v15 }
 0x3fe   :  { %1144 = vmatpush.msra.mxu2 %v1125_v53  ;;  %v1875_v53 = vld [vmem:[%s2853_s11 + $0x40] sm:$0xff] }
 0x428   :  { %v660_v62 = vpop.f32.mrf.mxu1 }
 0x437   :  { %v2704_v0 = vpop.f32.mrf.mxu1 }
 0x43e   :  { %v688_v28 = vpop.f32.mrf.mxu2 }
 0x43f   :  { %v2706_v1 = vpop.f32.mrf.mxu1 }
 0x447   :  { %v1283_v16 = vpop.f32.mrf.mxu1 }
 0x448   :  { %v1284_v18 = vadd.f32 %v1922_v60, %v1283_v16 }
 0x44a   :  { %v1286_v13 = vmax.f32 %v1284_v18, 0.0 }
 0x44c   :  { %v1288_v27 = vrot.slane %v1286_v13, 4  ;;  %v1290_v31 = vmul.f32 %v1286_v13, %v660_v62  ;;  %v1405_v13 = vld [vmem:[#allocation9 + $0x58] sm:$0xff] }
 0x44d   :  { %1425 = vmatpush.msrb.mxu0 %v1405_v13 }
 0x44e   :  { %v1291_v10 = vmul.f32 %v1288_v27, %v688_v28  ;;  %v1292_v33 = vsel %vm1196_vm14, %v1290_v31, 0.0 }
 0x44f   :  { %v1293_v52 = vrot.slane %v1292_v33, 4 }
 0x450   :  { %v1299_v7 = vsel %vm1196_vm14, %v1291_v10, 0.0 }
 0x451   :  { %v1300_v23 = vrot.slane %v1299_v7, 4  ;;  %v1294_v39 = vadd.f32 %v1293_v52, %v1292_v33 }
 0x453   :  { %v1301_v22 = vadd.f32 %v1300_v23, %v1299_v7  ;;  %v1295_v17 = vrot.slane %v1294_v39, 2 }
 0x455   :  { %v1302_v43 = vrot.slane %v1301_v22, 2  ;;  %v1296_v49 = vadd.f32 %v1295_v17, %v1294_v39  ;;  %v1883_v39 = vld [vmem:[%s2853_s11 + $0x70] sm:$0xff] }
 0x457   :  { %v1303_v3 = vadd.f32 %v1302_v43, %v1301_v22  ;;  %v1297_v47 = vrot.slane %v1296_v49, 1 }
 0x459   :  { %v1304_v45 = vrot.slane %v1303_v3, 1  ;;  %v1298_v42 = vadd.f32 %v1297_v47, %v1296_v49  ;;  %v1498_v47 = vld [vmem:[#allocation9 + $0x68] sm:$0xff] }
 0x45b   :  { %v1305_v37 = vadd.f32 %v1304_v45, %v1303_v3  ;;  %v1499_v45 = vld [vmem:[#allocation9 + $0x70] sm:$0xff] }
 0x45d   :  { %v1315_v48 = vsel %vm1219_vm15, %v1305_v37, %v1298_v42  ;;  %v1497_v37 = vld [vmem:[#allocation9 + $0x60] sm:$0xff] }
 0x45e   :  { %v1926_v42 = vld [vmem:[%s2854_s12 + $0x3] ss:$0 sm:$0xff] }
 0x470   :  { %v850_v36 = vpop.xlane.xlu0 %849 }
 0x471   :  { %v854_v32 = vrot.slane %v850_v36, 4 }
 0x473   :  { %v864_v5 = vsel %vm265_vm2, %v854_v32, 0.0 }
 0x474   :  { %v865_v20 = vrot.slane %v864_v5, 4 }
 0x476   :  { %v866_v24 = vadd.f32 %v865_v20, %v864_v5  ;;  %v1404_v5 = vld [vmem:[#allocation9 + $0x50] sm:$0xff]  ;;  %v1402_v20 = vld [vmem:[#allocation9 + $0x40] sm:$0xff] }
 0x477   :  { %1426 = vmatpush.msrb.mxu0 %v1404_v5 }
 0x478   :  { %v867_v11 = vrot.slane %v866_v24, 2 }
 0x479   :  { %1427 = vmatpush.msrb.mxu0 %v1403_v21 }
 0x47a   :  { %v868_v4 = vadd.f32 %v867_v11, %v866_v24  ;;  %v1924_v24 = vld [vmem:[%s2854_s12 + $0x2] ss:$0 sm:$0xff] }
 0x47b   :  { %1428 = vmatpush.msrb.mxu0 %v1402_v20 }
 0x47c   :  { %v869_v19 = vrot.slane %v868_v4, 1 }
 0x47e   :  { %v870_v61 = vadd.f32 %v869_v19, %v868_v4 }
 0x480   :  { %1978 = vrcp.f32 %v870_v61 }
 0x481   :  { %1980 = vrcp.f32 %v1088_v54 }
 0x486   :  { %v1979_v25 = vpop.eup %1978 }
 0x487   :  { %v874_v38 = vmul.f32 %v1979_v25, %v1977_v50  ;;  %v1981_v41 = vpop.eup %1980  ;;  %v1877_v50 = vld [vmem:[%s2853_s11 + $0x50] sm:$0xff] }
 0x488   :  { %v1092_v63 = vmul.f32 %v1981_v41, %v2615_v56  ;;  %v1878_v56 = vld [vmem:[%s2853_s11 + $0x58] sm:$0xff]  ;;  %v1925_v41 = vld [vmem:[%s2856_s14 + $0x2] ss:$0 sm:$0xff] }
 0x489   :  { %v903_v59 = vrot.slane %v874_v38, 4  ;;  %1373 = vmatpush.msrb.mxu3 %v1878_v56 }
 0x48a   :  { %v1122_v44 = vrot.slane %v1092_v63, 4 }
 0x48b   :  { %1860 = vmatmul.msk.f32.vlgmr.msrb.gmra.mxu2 %vm504_vm12, %v903_v59  ;;  %1374 = vmatpush.msrb.mxu3 %v1877_v50  ;;  %v1882_v59 = vld [vmem:[%s2853_s11 + $0x68] sm:$0xff] }
 0x48c   :  { %1330 = vmatpush.msrb.mxu2 %v1310_v34  ;;  %v1881_v34 = vld [vmem:[%s2853_s11 + $0x60] sm:$0xff] }
 0x48d   :  { %1375 = vmatpush.msrb.mxu3 %v1876_v51 }
 0x48e   :  { %1331 = vmatpush.msrb.mxu2 %v1309_v2 }
 0x48f   :  { %1376 = vmatpush.msrb.mxu3 %v1875_v53 }
 0x490   :  { %1332 = vmatpush.msrb.mxu2 %v1308_v55 }
 0x492   :  { %1333 = vmatpush.msrb.mxu2 %v1307_v26 }
 0x493   :  { %1866 = vmatmul.msk.f32.vlgmr.msra.gmra.mxu2 %vm504_vm12, %v1122_v44  ;;  %v1500_v44 = vld [vmem:[#allocation9 + $0x78] sm:$0xff] }
 0x494   :  { %1520 = vmatpush.msra.mxu2 %v1500_v44 }
 0x496   :  { %1521 = vmatpush.msra.mxu2 %v1499_v45 }
 0x498   :  { %1522 = vmatpush.msra.mxu2 %v1498_v47 }
 0x49a   :  { %1523 = vmatpush.msra.mxu2 %v1497_v37 }
 0x49b   :  { %1874 = vmatmul.msk.f32.vlgmr.msrb.gmra.mxu2 %vm169_vm0, %v1315_v48 }
 0x50e   :  { %v2732_v15 = vpop.f32.mrf.mxu2 }
 0x516   :  { %v2734_v62 = vpop.f32.mrf.mxu2 }
 0x51e   :  { %v1335_v8 = vpop.f32.mrf.mxu2 }
 0x51f   :  { %v1336_v60 = vadd.f32 %v1923_v9, %v1335_v8 }
 0x521   :  { %v1339_v14 = vrot.slane %v1336_v60, 1  ;;  %v1340_v16 = vperm.slane %v1336_v60, 0 }
 0x523   :  { %v1341_v18 = vperm.slane %v1339_v14, 0  ;;  %v1344_v30 = vadd.f32 %v1340_v16, %v2672_v58 }
 0x525   :  { %v1345_v36 = vadd.f32 %v1341_v18, %v2675_v12  ;;  %1355 = vst [vmem:[#allocation1] ss:$2 sm:$0xff] %v1344_v30 }
 0x527   :  { %1357 = vst [vmem:[#allocation1 + $0x1] ss:$2 sm:$0xff] %v1345_v36 }
 0x52e   :  { %v1358_v32 = vld.sshfl [vmem:[#allocation1] sm:$0xff pattern:$0x75316420] }
 0x52f   :  { %1879 = vmatmul.msk.f32.vlgmr.msrb.gmra.mxu3 %vm169_vm0, %v1358_v32 }
 0x5b2   :  { %v1378_v58 = vpop.f32.mrf.mxu3 }
 0x5b3   :  { %v1379_v27 = vadd.f32 %v1924_v24, %v1378_v58 }
 0x5b5   :  { %v1381_v12 = vmax.f32 %v1379_v27, 0.0  ;;  %v1889_v27 = vld [vmem:[%s2853_s11 + $0x90] sm:$0xff] }
 0x5b7   :  { %v1383_v6 = vrot.slane %v1381_v12, 4  ;;  %v1385_v11 = vmul.f32 %v1381_v12, %v2612_v46  ;;  %v1888_v12 = vld [vmem:[%s2853_s11 + $0x88] sm:$0xff] }
 0x5b9   :  { %v1386_v28 = vmul.f32 %v1383_v6, %v2660_v35  ;;  %v1387_v4 = vsel %vm1196_vm14, %v1385_v11, 0.0  ;;  %v1884_v35 = vld [vmem:[%s2853_s11 + $0x78] sm:$0xff]  ;;  %v1887_v6 = vld [vmem:[%s2853_s11 + $0x80] sm:$0xff] }
 0x5ba   :  { %v1388_v10 = vrot.slane %v1387_v4, 4  ;;  %1468 = vmatpush.msrb.mxu1 %v1884_v35  ;;  %v1927_v11 = vld [vmem:[%s2856_s14 + $0x3] ss:$0 sm:$0xff] }
 0x5bb   :  { %v1394_v29 = vsel %vm1196_vm14, %v1386_v28, 0.0 }
 0x5bc   :  { %v1389_v19 = vadd.f32 %v1388_v10, %v1387_v4  ;;  %v1395_v31 = vrot.slane %v1394_v29, 4  ;;  %1469 = vmatpush.msrb.mxu1 %v1883_v39 }
 0x5be   :  { %v1390_v61 = vrot.slane %v1389_v19, 2  ;;  %v1396_v7 = vadd.f32 %v1395_v31, %v1394_v29  ;;  %1470 = vmatpush.msrb.mxu1 %v1882_v59 }
 0x5c0   :  { %v1391_v54 = vadd.f32 %v1390_v61, %v1389_v19  ;;  %v1397_v33 = vrot.slane %v1396_v7, 2  ;;  %1471 = vmatpush.msrb.mxu1 %v1881_v34 }
 0x5c2   :  { %v1392_v23 = vrot.slane %v1391_v54, 1  ;;  %v1398_v52 = vadd.f32 %v1397_v33, %v1396_v7  ;;  %v1594_v33 = vld [vmem:[#allocation9 + $0x90] sm:$0xff] }
 0x5c4   :  { %v1399_v25 = vrot.slane %v1398_v52, 1  ;;  %v1393_v22 = vadd.f32 %v1392_v23, %v1391_v54  ;;  %v1595_v54 = vld [vmem:[#allocation9 + $0x98] sm:$0xff]  ;;  %v1593_v23 = vld [vmem:[#allocation9 + $0x88] sm:$0xff] }
 0x5c5   :  { %1615 = vmatpush.msra.mxu0 %v1595_v54 }
 0x5c6   :  { %v1400_v38 = vadd.f32 %v1399_v25, %v1398_v52  ;;  %v1592_v52 = vld [vmem:[#allocation9 + $0x80] sm:$0xff] }
 0x5c7   :  { %1616 = vmatpush.msra.mxu0 %v1594_v33  ;;  %v1928_v25 = vld [vmem:[%s2854_s12 + $0x4] ss:$0 sm:$0xff] }
 0x5c8   :  { %v1410_v46 = vsel %vm1219_vm15, %v1400_v38, %v1393_v22 }
 0x5c9   :  { %1880 = vmatmul.msk.f32.vlgmr.msrb.gmra.mxu0 %vm169_vm0, %v1410_v46 }
 0x5ca   :  { %1617 = vmatpush.msra.mxu0 %v1593_v23  ;;  %v1742_v23 = vld [vmem:[#allocation10 + $0x10] sm:$0xff] }
 0x5cc   :  { %1618 = vmatpush.msra.mxu0 %v1592_v52  ;;  %v1741_v52 = vld [vmem:[#allocation10 + $0x8] sm:$0xff] }
 0x646   :  { %v1430_v43 = vpop.f32.mrf.mxu0 }
 0x647   :  { %v1431_v2 = vadd.f32 %v1925_v41, %v1430_v43 }
 0x649   :  { %v1434_v17 = vrot.slane %v1431_v2, 1  ;;  %v1435_v63 = vperm.slane %v1431_v2, 0 }
 0x64b   :  { %v1436_v55 = vperm.slane %v1434_v17, 0  ;;  %v1439_v3 = vadd.f32 %v1435_v63, %v1344_v30 }
 0x64d   :  { %v1440_v26 = vadd.f32 %v1436_v55, %v1345_v36  ;;  %1450 = vst [vmem:[#allocation1] ss:$2 sm:$0xff] %v1439_v3 }
 0x64f   :  { %1452 = vst [vmem:[#allocation1 + $0x1] ss:$2 sm:$0xff] %v1440_v26 }
 0x656   :  { %v1453_v49 = vld.sshfl [vmem:[#allocation1] sm:$0xff pattern:$0x75316420] }
 0x657   :  { %1885 = vmatmul.msk.f32.vlgmr.msrb.gmra.mxu1 %vm169_vm0, %v1453_v49 }
 0x6d4   :  { %v1473_v48 = vpop.f32.mrf.mxu1 }
 0x6d5   :  { %v1474_v56 = vadd.f32 %v1926_v42, %v1473_v48  ;;  %v1895_v42 = vld [vmem:[%s2853_s11 + $0xb0] sm:$0xff]  ;;  %v1894_v48 = vld [vmem:[%s2853_s11 + $0xa8] sm:$0xff] }
 0x6d7   :  { %v1476_v50 = vmax.f32 %v1474_v56, 0.0  ;;  %v1893_v56 = vld [vmem:[%s2853_s11 + $0xa0] sm:$0xff] }
 0x6d9   :  { %v1478_v51 = vrot.slane %v1476_v50, 4  ;;  %v1480_v53 = vmul.f32 %v1476_v50, %v2704_v0  ;;  %v1929_v50 = vld [vmem:[%s2856_s14 + $0x4] ss:$0 sm:$0xff] }
 0x6db   :  { %v1481_v9 = vmul.f32 %v1478_v51, %v2732_v15  ;;  %v1482_v8 = vsel %vm1196_vm14, %v1480_v53, 0.0  ;;  %v1890_v15 = vld [vmem:[%s2853_s11 + $0x98] sm:$0xff] }
 0x6dc   :  { %v1483_v60 = vrot.slane %v1482_v8, 4  ;;  %1563 = vmatpush.msra.mxu3 %v1890_v15 }
 0x6dd   :  { %v1489_v14 = vsel %vm1196_vm14, %v1481_v9, 0.0 }
 0x6de   :  { %v1484_v16 = vadd.f32 %v1483_v60, %v1482_v8  ;;  %v1490_v18 = vrot.slane %v1489_v14, 4  ;;  %1564 = vmatpush.msra.mxu3 %v1889_v27 }
 0x6e0   :  { %v1485_v30 = vrot.slane %v1484_v16, 2  ;;  %v1491_v36 = vadd.f32 %v1490_v18, %v1489_v14  ;;  %1565 = vmatpush.msra.mxu3 %v1888_v12 }
 0x6e2   :  { %v1486_v32 = vadd.f32 %v1485_v30, %v1484_v16  ;;  %v1492_v13 = vrot.slane %v1491_v36, 2  ;;  %1566 = vmatpush.msra.mxu3 %v1887_v6  ;;  %v1690_v30 = vld [vmem:[#allocation9 + $0xb8] sm:$0xff] }
 0x6e3   :  { %1710 = vmatpush.msrb.mxu2 %v1690_v30 }
 0x6e4   :  { %v1487_v5 = vrot.slane %v1486_v32, 1  ;;  %v1493_v21 = vadd.f32 %v1492_v13, %v1491_v36  ;;  %v1689_v36 = vld [vmem:[#allocation9 + $0xb0] sm:$0xff]  ;;  %v1687_v13 = vld [vmem:[#allocation9 + $0xa0] sm:$0xff] }
 0x6e5   :  { %1711 = vmatpush.msrb.mxu2 %v1689_v36  ;;  %v1933_v36 = vld [vmem:[%s2860_s18] ss:$0 sm:$0xff] }
 0x6e6   :  { %v1494_v20 = vrot.slane %v1493_v21, 1  ;;  %v1488_v24 = vadd.f32 %v1487_v5, %v1486_v32  ;;  %v1688_v32 = vld [vmem:[#allocation9 + $0xa8] sm:$0xff]  ;;  %v1930_v5 = vld [vmem:[%s2854_s12 + $0x5] ss:$0 sm:$0xff] }
 0x6e7   :  { %1712 = vmatpush.msrb.mxu2 %v1688_v32 }
 0x6e8   :  { %v1495_v58 = vadd.f32 %v1494_v20, %v1493_v21 }
 0x6e9   :  { %1713 = vmatpush.msrb.mxu2 %v1687_v13 }
 0x6ea   :  { %v1505_v0 = vsel %vm1219_vm15, %v1495_v58, %v1488_v24 }
 0x6eb   :  { %1886 = vmatmul.msk.f32.vlgmr.msra.gmra.mxu2 %vm169_vm0, %v1505_v0 }
 0x76e   :  { %v1525_v28 = vpop.f32.mrf.mxu2 }
 0x76f   :  { %v1526_v4 = vadd.f32 %v1927_v11, %v1525_v28 }
 0x771   :  { %v1529_v10 = vrot.slane %v1526_v4, 1  ;;  %v1530_v29 = vperm.slane %v1526_v4, 0 }
 0x773   :  { %v1531_v19 = vperm.slane %v1529_v10, 0  ;;  %v1534_v31 = vadd.f32 %v1530_v29, %v1439_v3 }
 0x775   :  { %v1535_v61 = vadd.f32 %v1531_v19, %v1440_v26  ;;  %1545 = vst [vmem:[#allocation1] ss:$2 sm:$0xff] %v1534_v31 }
 0x777   :  { %1547 = vst [vmem:[#allocation1 + $0x1] ss:$2 sm:$0xff] %v1535_v61 }
 0x77e   :  { %v1548_v7 = vld.sshfl [vmem:[#allocation1] sm:$0xff pattern:$0x75316420] }
 0x77f   :  { %1891 = vmatmul.msk.f32.vlgmr.msra.gmra.mxu3 %vm169_vm0, %v1548_v7 }
 0x802   :  { %v1568_v22 = vpop.f32.mrf.mxu3 }
 0x803   :  { %v1569_v38 = vadd.f32 %v1928_v25, %v1568_v22  ;;  %v1740_v25 = vld [vmem:[#allocation10] sm:$0xff]  ;;  %v1781_v22 = vld [vmem:[#allocation12 + $0x38] sm:$0xff] }
 0x804   :  { %1798 = vmatpush.msrb.mxu0 %v1781_v22 }
 0x805   :  { %v1571_v46 = vmax.f32 %v1569_v38, 0.0  ;;  %v1780_v38 = vld [vmem:[#allocation12 + $0x30] sm:$0xff] }
 0x806   :  { %1799 = vmatpush.msrb.mxu0 %v1780_v38 }
 0x807   :  { %v1573_v35 = vrot.slane %v1571_v46, 4  ;;  %v1575_v39 = vmul.f32 %v1571_v46, %v2617_v57  ;;  %v1779_v46 = vld [vmem:[#allocation12 + $0x28] sm:$0xff] }
 0x808   :  { %1800 = vmatpush.msrb.mxu0 %v1779_v46 }
 0x809   :  { %v1576_v59 = vmul.f32 %v1573_v35, %v2663_v40  ;;  %v1577_v34 = vsel %vm1196_vm14, %v1575_v39, 0.0  ;;  %v1896_v40 = vld [vmem:[%s2853_s11 + $0xb8] sm:$0xff]  ;;  %v1778_v35 = vld [vmem:[#allocation12 + $0x20] sm:$0xff] }
 0x80a   :  { %v1578_v41 = vrot.slane %v1577_v34, 4  ;;  %1658 = vmatpush.msra.mxu1 %v1896_v40  ;;  %v1931_v39 = vld [vmem:[%s2856_s14 + $0x5] ss:$0 sm:$0xff]  ;;  %1801 = vmatpush.msrb.mxu0 %v1778_v35 }
 0x80b   :  { %v1584_v43 = vsel %vm1196_vm14, %v1576_v59, 0.0  ;;  %v1777_v59 = vld [vmem:[#allocation12 + $0x18] sm:$0xff] }
 0x80c   :  { %v1579_v2 = vadd.f32 %v1578_v41, %v1577_v34  ;;  %v1585_v17 = vrot.slane %v1584_v43, 4  ;;  %1659 = vmatpush.msra.mxu1 %v1895_v42  ;;  %1802 = vmatpush.msrb.mxu0 %v1777_v59 }
 0x80e   :  { %v1580_v63 = vrot.slane %v1579_v2, 2  ;;  %v1586_v55 = vadd.f32 %v1585_v17, %v1584_v43  ;;  %1660 = vmatpush.msra.mxu1 %v1894_v48 }
 0x810   :  { %v1581_v3 = vadd.f32 %v1580_v63, %v1579_v2  ;;  %v1587_v26 = vrot.slane %v1586_v55, 2  ;;  %1661 = vmatpush.msra.mxu1 %v1893_v56 }
 0x812   :  { %v1582_v49 = vrot.slane %v1581_v3, 1  ;;  %v1588_v44 = vadd.f32 %v1587_v26, %v1586_v55 }
 0x814   :  { %v1589_v45 = vrot.slane %v1588_v44, 1  ;;  %v1583_v47 = vadd.f32 %v1582_v49, %v1581_v3 }
 0x816   :  { %v1590_v37 = vadd.f32 %v1589_v45, %v1588_v44 }
 0x818   :  { %v1600_v57 = vsel %vm1219_vm15, %v1590_v37, %v1583_v47 }
 0x819   :  { %1892 = vmatmul.msk.f32.vlgmr.msra.gmra.mxu0 %vm169_vm0, %v1600_v57 }
 0x896   :  { %v1620_v51 = vpop.f32.mrf.mxu0 }
 0x897   :  { %v1621_v53 = vadd.f32 %v1929_v50, %v1620_v51 }
 0x899   :  { %v1624_v9 = vrot.slane %v1621_v53, 1  ;;  %v1625_v8 = vperm.slane %v1621_v53, 0 }
 0x89b   :  { %v1626_v60 = vperm.slane %v1624_v9, 0  ;;  %v1629_v14 = vadd.f32 %v1625_v8, %v1534_v31  ;;  %v1776_v9 = vld [vmem:[#allocation12 + $0x10] sm:$0xff]  ;;  %v1775_v8 = vld [vmem:[#allocation12 + $0x8] sm:$0xff] }
 0x89c   :  { %1803 = vmatpush.msrb.mxu0 %v1776_v9 }
 0x89d   :  { %v1630_v16 = vadd.f32 %v1626_v60, %v1535_v61  ;;  %1640 = vst [vmem:[#allocation1] ss:$2 sm:$0xff] %v1629_v14  ;;  %v1774_v60 = vld [vmem:[#allocation12] sm:$0xff] }
 0x89e   :  { %1804 = vmatpush.msrb.mxu0 %v1775_v8 }
 0x89f   :  { %1642 = vst [vmem:[#allocation1 + $0x1] ss:$2 sm:$0xff] %v1630_v16 }
 0x8a0   :  { %1805 = vmatpush.msrb.mxu0 %v1774_v60 }
 0x8a6   :  { %v1643_v18 = vld.sshfl [vmem:[#allocation1] sm:$0xff pattern:$0x75316420] }
 0x8a7   :  { %1897 = vmatmul.msk.f32.vlgmr.msra.gmra.mxu1 %vm169_vm0, %v1643_v18 }
 0x924   :  { %v1663_v21 = vpop.f32.mrf.mxu1 }
 0x925   :  { %v1664_v20 = vadd.f32 %v1930_v5, %v1663_v21 }
 0x927   :  { %v1666_v24 = vmax.f32 %v1664_v20, 0.0 }
 0x929   :  { %v1668_v58 = vrot.slane %v1666_v24, 4  ;;  %v1670_v0 = vmul.f32 %v1666_v24, %v2706_v1 }
 0x92b   :  { %v1671_v15 = vmul.f32 %v1668_v58, %v2734_v62  ;;  %v1672_v27 = vsel %vm1196_vm14, %v1670_v0, 0.0  ;;  %v1743_v62 = vld [vmem:[#allocation10 + $0x18] sm:$0xff] }
 0x92c   :  { %v1673_v12 = vrot.slane %v1672_v27, 4  ;;  %1765 = vmatpush.msrb.mxu3 %v1743_v62 }
 0x92d   :  { %v1679_v6 = vsel %vm1196_vm14, %v1671_v15, 0.0 }
 0x92e   :  { %v1674_v11 = vadd.f32 %v1673_v12, %v1672_v27  ;;  %v1680_v28 = vrot.slane %v1679_v6, 4  ;;  %1766 = vmatpush.msrb.mxu3 %v1742_v23 }
 0x930   :  { %v1675_v4 = vrot.slane %v1674_v11, 2  ;;  %v1681_v10 = vadd.f32 %v1680_v28, %v1679_v6  ;;  %1767 = vmatpush.msrb.mxu3 %v1741_v52 }
 0x932   :  { %v1676_v29 = vadd.f32 %v1675_v4, %v1674_v11  ;;  %v1682_v19 = vrot.slane %v1681_v10, 2  ;;  %1768 = vmatpush.msrb.mxu3 %v1740_v25 }
 0x934   :  { %v1677_v31 = vrot.slane %v1676_v29, 1  ;;  %v1683_v61 = vadd.f32 %v1682_v19, %v1681_v10 }
 0x936   :  { %v1684_v7 = vrot.slane %v1683_v61, 1  ;;  %v1678_v54 = vadd.f32 %v1677_v31, %v1676_v29 }
 0x938   :  { %v1685_v33 = vadd.f32 %v1684_v7, %v1683_v61 }
 0x93a   :  { %v1695_v1 = vsel %vm1219_vm15, %v1685_v33, %v1678_v54 }
 0x93b   :  { %1898 = vmatmul.msk.f32.vlgmr.msrb.gmra.mxu2 %vm169_vm0, %v1695_v1 }
 0x9be   :  { %v1715_v34 = vpop.f32.mrf.mxu2 }
 0x9bf   :  { %v1716_v41 = vadd.f32 %v1931_v39, %v1715_v34 }
 0x9c1   :  { %v1719_v43 = vrot.slane %v1716_v41, 1  ;;  %v1720_v2 = vperm.slane %v1716_v41, 0 }
 0x9c3   :  { %v1721_v17 = vperm.slane %v1719_v43, 0  ;;  %v1724_v63 = vadd.f32 %v1720_v2, %v1629_v14  ;;  %v1932_v14 = vld [vmem:[%s2858_s16] ss:$0 sm:$0xff] }
 0x9c5   :  { %v1725_v55 = vadd.f32 %v1721_v17, %v1630_v16  ;;  %v1726_v3 = vsel %vm1196_vm14, %v1724_v63, 0.0 }
 0x9c6   :  { %v1727_v26 = vrot.slane %v1726_v3, 4 }
 0x9c7   :  { %v1733_v49 = vsel %vm1196_vm14, %v1725_v55, 0.0 }
 0x9c8   :  { %v1728_v44 = vadd.f32 %v1727_v26, %v1726_v3  ;;  %v1734_v45 = vrot.slane %v1733_v49, 4 }
 0x9ca   :  { %v1729_v47 = vrot.slane %v1728_v44, 2  ;;  %v1735_v37 = vadd.f32 %v1734_v45, %v1733_v49 }
 0x9cc   :  { %v1730_v57 = vadd.f32 %v1729_v47, %v1728_v44  ;;  %v1736_v40 = vrot.slane %v1735_v37, 2 }
 0x9ce   :  { %v1731_v42 = vrot.slane %v1730_v57, 1  ;;  %v1737_v48 = vadd.f32 %v1736_v40, %v1735_v37 }
 0x9d0   :  { %v1738_v56 = vrot.slane %v1737_v48, 1  ;;  %v1732_v50 = vadd.f32 %v1731_v42, %v1730_v57 }
 0x9d2   :  { %v1739_v51 = vadd.f32 %v1738_v56, %v1737_v48 }
 0x9d4   :  { %v1750_v53 = vsel %vm1219_vm15, %v1739_v51, %v1732_v50 }
 0x9d5   :  { %1899 = vmatmul.msk.f32.vlgmr.msrb.gmra.mxu3 %vm169_vm0, %v1750_v53 }
 0xa58   :  { %v1770_v16 = vpop.f32.mrf.mxu3 }
 0xa59   :  { %v1771_v18 = vadd.f32 %v1932_v14, %v1770_v16 }
 0xa5b   :  { %v1773_v30 = vmax.f32 %v1771_v18, 0.0 }
 0xa5d   :  { %1900 = vmatmul.msk.f32.vlgmr.msrb.gmra.mxu0 %vm1786_vm1, %v1773_v30 }
 0xada   :  { %v1807_v32 = vpop.f32.mrf.mxu0 }
 0xadb   :  { %v1808_v13 = vadd.f32 %v1933_v36, %v1807_v32 }
 0xadd   :  { %1810 = vst [vmem:[#allocation13] sm:$0x3] %v1808_v13 }
 0xade   :  { %1821 = dma.vmem_to_hbm [thread:$0]  %s1817_s2, 32, %s1819_s4, [#allocation4]  }
 0xadf   :  { %2146 = dma.done.wait [#allocation4], 32  }
 0xae0   :  { %2147 = vsyncadd [#allocation4], 4294967264 }
 0xae1   :  { %1830 = vsyncpa [#allocation3], 1 }
 0xae2   :  { %1831 = vsyncpa [#allocation8], 1 }
 0xae3   :  { %1832 = vsyncpa [#allocation11], 1 }
 0xae4   :  { %1833 = vsyncpa [#allocation4], 1 }
 0xae5   :  { %1834 = vsyncpa [#allocation5], 1 }

</bundles_post_ra>
